<compile_context>
chip_gen: v7x
topology: tpu7x:2x2x1
jax: 0.10.0
libtpu: 0.0.40
codegen_flags: <defaults>
</compile_context>

<pallas_src>
import jax
import jax.numpy as jnp
from jax.experimental import pallas as pl
from jax.experimental.pallas import tpu as pltpu

LANE = 128


def _round_up(n, m):
    return ((n + m - 1) // m) * m


# ---------------------------------------------------------------------------
# Layer 1: y = relu(x @ W1 + b1), x:(M,3072) bf16, W1:(3072,2048) bf16
# Grid over the output-feature axis only (tk == full K).
# ---------------------------------------------------------------------------
def _layer1_kernel(x_ref, w_ref, b_ref, o_ref):
    y = jnp.dot(x_ref[...], w_ref[...], preferred_element_type=jnp.float32)
    o_ref[...] = jnp.maximum(y + b_ref[...], 0.0)


def layer1_pallas(x_bf16, w, b, *, tn=512):
    M, K = x_bf16.shape
    Kw, N = w.shape
    assert K == Kw and N % tn == 0
    return pl.pallas_call(
        _layer1_kernel,
        out_shape=jax.ShapeDtypeStruct((M, N), jnp.float32),
        grid_spec=pltpu.PrefetchScalarGridSpec(
            num_scalar_prefetch=0,
            grid=(N // tn,),
            in_specs=[
                pl.BlockSpec((M, K), lambda n: (0, 0)),
                pl.BlockSpec((K, tn), lambda n: (0, n)),
                pl.BlockSpec((1, tn), lambda n: (0, n)),
            ],
            out_specs=pl.BlockSpec((M, tn), lambda n: (0, n)),
        ),
        compiler_params=pltpu.CompilerParams(
            dimension_semantics=("parallel",)
        ),
    )(x_bf16, w, b)


# ---------------------------------------------------------------------------
# Layers 2-5 fused: all weights (<2 MB bf16) VMEM-resident, one kernel body.
# ReLU on every layer except the last; output written once, lane-dense.
# ---------------------------------------------------------------------------
def _tail_kernel(x_ref, *refs):
    o_ref = refs[-1]
    wbs = refs[:-1]
    n_layers = len(wbs) // 2
    h = x_ref[...].astype(jnp.bfloat16)
    for i in range(n_layers):
        w_r, b_r = wbs[2 * i], wbs[2 * i + 1]
        y = jnp.dot(h, w_r[...], preferred_element_type=jnp.float32) + b_r[...]
        if i < n_layers - 1:
            h = jnp.maximum(y, 0.0).astype(jnp.bfloat16)
        else:
            o_ref[...] = y


def tail_pallas(x, tail_params):
    M = x.shape[0]
    flat_args = [x]
    in_specs = [pl.BlockSpec(x.shape, lambda i: (0, 0))]
    for w, b in tail_params:
        flat_args += [w, b]
        in_specs += [
            pl.BlockSpec(w.shape, lambda i: (0, 0)),
            pl.BlockSpec(b.shape, lambda i: (0, 0)),
        ]
    n_out = tail_params[-1][0].shape[1]
    return pl.pallas_call(
        _tail_kernel,
        out_shape=jax.ShapeDtypeStruct((M, n_out), jnp.float32),
        grid_spec=pltpu.PrefetchScalarGridSpec(
            num_scalar_prefetch=0,
            grid=(1,),
            in_specs=in_specs,
            out_specs=pl.BlockSpec((M, n_out), lambda i: (0, 0)),
        ),
        compiler_params=pltpu.CompilerParams(
            dimension_semantics=("arbitrary",)
        ),
    )(*flat_args)


# ---------------------------------------------------------------------------
# Params & forward
# ---------------------------------------------------------------------------
def init_params(key, input_size, output_size):
    """PyTorch-style uniform(-1/sqrt(fan_in), 1/sqrt(fan_in)).

    Weights stored (in, out) in bfloat16, biases (1, out) in float32; both
    feature dims zero-padded to multiples of 128.
    """
    dims = [input_size, 2000, 600, 200, 50, output_size]
    params = []
    for i in range(len(dims) - 1):
        fan_in, fan_out = dims[i], dims[i + 1]
        key, kw, kb = jax.random.split(key, 3)
        bound = 1.0 / float(fan_in) ** 0.5
        w = jax.random.uniform(
            kw, (fan_in, fan_out), jnp.float32, minval=-bound, maxval=bound
        )
        b = jax.random.uniform(
            kb, (fan_out,), jnp.float32, minval=-bound, maxval=bound
        )
        kp, npd = _round_up(fan_in, LANE), _round_up(fan_out, LANE)
        w_pad = (
            jnp.zeros((kp, npd), jnp.float32)
            .at[:fan_in, :fan_out]
            .set(w)
            .astype(jnp.bfloat16)
        )
        b_pad = jnp.zeros((1, npd), jnp.float32).at[0, :fan_out].set(b)
        params.append((w_pad, b_pad))
    return params


def cifar_dnn_forward(x_nchw, params, output_size):
    b = x_nchw.shape[0]
    x = x_nchw.reshape(b, -1).astype(jnp.float32)
    assert x.shape[1] == 3072, "CifarDNN forward hard-codes 3072 input features"

    w1, b1 = params[0]
    h1 = layer1_pallas(x.astype(jnp.bfloat16), w1, b1, tn=512)
    out = tail_pallas(h1, params[1:])
    return out[:, :output_size]


def reference_forward(x_nchw, params, output_size):
    """Pure-JAX reference using the identical bf16-weight / f32-accumulate math."""
    b = x_nchw.shape[0]
    h = x_nchw.reshape(b, -1).astype(jnp.bfloat16)
    n = len(params)
    y = None
    for i, (w, bias) in enumerate(params):
        y = jnp.dot(h, w, preferred_element_type=jnp.float32) + bias
        if i < n - 1:
            h = jnp.maximum(y, 0.0).astype(jnp.bfloat16)
    return y[:, :output_size]


if __name__ == "__main__":
    INPUT_SIZE = 3 * 32 * 32  # 3072 — forced by x.reshape(-1, 3072)
    OUTPUT_SIZE = 10
    BATCH = 2

    key = jax.random.PRNGKey(0)
    key, kx = jax.random.split(key)
    x = jax.random.normal(kx, (BATCH, 3, 32, 32), jnp.float32)

    params = init_params(key, INPUT_SIZE, OUTPUT_SIZE)

    out = jax.block_until_ready(cifar_dnn_forward(x, params, OUTPUT_SIZE))
    ref = jax.block_until_ready(reference_forward(x, params, OUTPUT_SIZE))

    assert out.shape == (BATCH, OUTPUT_SIZE)
    assert jnp.allclose(out, ref, atol=1e-2, rtol=1e-2), float(
        jnp.max(jnp.abs(out - ref))
    )

    print("KERNEL_OK")
</pallas_src>

<mosaic_0001>
module attributes {stable_mosaic.version = 11 : i64} {
  func.func @_layer1_kernel(%arg0: i32, %arg1: memref<2x3072xbf16, #tpu.memory_space<vmem>>, %arg2: memref<3072x512xbf16, #tpu.memory_space<vmem>>, %arg3: memref<1x512xf32, #tpu.memory_space<vmem>>, %arg4: memref<2x512xf32, #tpu.memory_space<vmem>>) attributes {dimension_semantics = [#tpu.dimension_semantics<parallel>], iteration_bounds = array<i64: 4>, scalar_prefetch = 0 : i64, scratch_operands = 0 : i64, tpu.core_type = #tpu.core_type<tc>, window_params = [{pipeline_mode = #tpu.pipeline_mode<synchronous>, transform_indices = @transform_0, window_bounds = array<i64: 2, 3072>}, {transform_indices = @transform_1, window_bounds = array<i64: 3072, 512>}, {transform_indices = @transform_2, window_bounds = array<i64: 1, 512>}, {transform_indices = @transform_3, window_bounds = array<i64: 2, 512>}]} {
    %c0 = arith.constant 0 : index
    %c0_0 = arith.constant 0 : index
    %0 = vector.load %arg1[%c0, %c0_0] : memref<2x3072xbf16, #tpu.memory_space<vmem>>, vector<2x3072xbf16>
    %c0_1 = arith.constant 0 : index
    %c0_2 = arith.constant 0 : index
    %1 = vector.load %arg2[%c0_1, %c0_2] : memref<3072x512xbf16, #tpu.memory_space<vmem>>, vector<3072x512xbf16>
    %cst = arith.constant dense<0.000000e+00> : vector<2x512xf32>
    %2 = tpu.matmul %0, %1, %cst {dimension_numbers = #tpu.dot_dimension_numbers<[1], [0], [0], [1], [0, 0, 1, 1], [], []>} : vector<2x3072xbf16>, vector<3072x512xbf16>, vector<2x512xf32> -> vector<2x512xf32>
    %c0_3 = arith.constant 0 : index
    %c0_4 = arith.constant 0 : index
    %3 = vector.load %arg3[%c0_3, %c0_4] : memref<1x512xf32, #tpu.memory_space<vmem>>, vector<1x512xf32>
    %4 = vector.broadcast %3 : vector<1x512xf32> to vector<2x512xf32>
    %5 = arith.addf %2, %4 : vector<2x512xf32>
    %cst_5 = arith.constant 0.000000e+00 : f32
    %6 = vector.broadcast %cst_5 : f32 to vector<2x512xf32>
    %7 = arith.maximumf %5, %6 : vector<2x512xf32>
    %c0_6 = arith.constant 0 : index
    %c0_7 = arith.constant 0 : index
    %8 = vector.load %arg4[%c0_6, %c0_7] : memref<2x512xf32, #tpu.memory_space<vmem>>, vector<2x512xf32>
    tpu.vector_store %arg4[%c0_6, %c0_7], %7 {strides = array<i32>} : memref<2x512xf32, #tpu.memory_space<vmem>>, vector<2x512xf32>,
    return
  }
  func.func @transform_0(%arg0: i32) -> (i32, i32) {
    %c0_i32 = arith.constant 0 : i32
    %c0_i32_0 = arith.constant 0 : i32
    %c0_i32_1 = arith.constant 0 : i32
    return %c0_i32, %c0_i32_0 : i32, i32
  }
  func.func @transform_1(%arg0: i32) -> (i32, i32) {
    %c0_i32 = arith.constant 0 : i32
    %c0_i32_0 = arith.constant 0 : i32
    return %c0_i32, %arg0 : i32, i32
  }
  func.func @transform_2(%arg0: i32) -> (i32, i32) {
    %c0_i32 = arith.constant 0 : i32
    %c0_i32_0 = arith.constant 0 : i32
    return %c0_i32, %arg0 : i32, i32
  }
  func.func @transform_3(%arg0: i32) -> (i32, i32) {
    %c0_i32 = arith.constant 0 : i32
    %c0_i32_0 = arith.constant 0 : i32
    return %c0_i32, %arg0 : i32, i32
  }
}

</mosaic_0001>

<bundles_post_ra>
// kernel: tpu_custom_call.1
= control target key start
LH: loop header
LB: loop body
LE: loop exit
PB: predicated region body
PF: predicated region fallthrough
CT: control target
= control target key end

     0   :  { %8 = vsyncpa [#allocation3], 0  ;;  %s9602_s0 = inlined_call_operand.hbm [shape: bf16[2,3072], index: 0, kind: input, shape index: {}]   ;;  %s9603_s1 = inlined_call_operand.hbm [shape: bf16[3072,2048], index: 1, kind: input, shape index: {}]   ;;  %s9604_s2 = inlined_call_operand.hbm [shape: f32[1,2048], index: 2, kind: input, shape index: {}]   ;;  %s9605_s3 = inlined_call_operand.hbm [shape: f32[2,2048], index: 3, kind: output, shape index: {}]  }
   0x1   :  { %9 = vsyncpa [#allocation6], 0 }
   0x2   :  { %11 = vsyncpa [#allocation6 + $0x1], 0 }
   0x3   :  { %12 = vsyncpa [#allocation4], 0 }
   0x4   :  { %14 = vsyncpa [#allocation4 + $0x1], 0  ;;  %s8471_s12 = smov 0   ;;  %s8473_s13 = smov 0  }
   0x5   :  { %s8475_s14 = smov 0   ;;  %s8477_s15 = smov 0  }
   0x6 LB: > { %s8492_s16 = sadd.s32 1, %s8440_s15   ;;  %s48_s17 = sadd.s32 1, %s8436_s14  ;;  %s8440_s15 = sphi %s8477_s15, %s9631_s15   ;;  %s8436_s14 = sphi %s8475_s14, %s9630_s14   ;;  %s8432_s13 = sphi %s8473_s13, %s9629_s13   ;;  %s8428_s12 = sphi %s8471_s12, %s9628_s12  }
   0x7   : > { %s45_s18 = ssub.s32 %s8440_s15, %s8492_s16  ;;  %p55_p0 = scmp.ne.s32.totalorder %s8436_s14, %s8432_s13 }
   0x8   : > { %p46_p1 = scmp.eq.s32.totalorder %s45_s18, 0  ;;  %p56_p2 = scmp.eq.s32.totalorder %s8440_s15, 0 }
   0x9   : > { %p7084_p3 = scmp.lt.s32.totalorder %s8440_s15, 4  ;;  %s148_s20 = sand.u32 1, %s8440_s15  }
   0xa   : > { %s8502_s19 = scalar_select %p46_p1, %s8436_s14, %s48_s17  }
   0xb   : > { %p57_p4 = por %p56_p2, %p55_p0  ;;  %s150_s21 = sand.u32 1, %s8436_s14  }
   0xc   : > { %s7056_s22 = smul.u32 6144, %s150_s21  ;;  %s6961_s23 = sshll.u32 %s8440_s15, 8 }
   0xd   : > { %s8515_s26 = scalar_lea.hbm %s9603_s1, %s6961_s23  ;;  %p8517_p5 = pnand %p7084_p3, %p57_p4 }
   0xe   : > { %s152_s28 = scalar_lea.vmem [#allocation5], %s7056_s22  ;;  %s8523_s30 = scalar_lea.sflag [#allocation6], %s148_s20 }
   0xf   : > { %s9613_s27 = scalar_select %p8517_p5, 1, 0 }
  0x10   : > { %s159_s29 = sshll.u32 %s152_s28, 4  ;;  %s8282_s4 = scalar_lea.hbm %s8515_s26, 98304  ;;  %s8521_s29 = int_to_ptr.vmem [resolvable:$true] %s159_s29 }
  0x11   : > { %p8283_p6 = scmp.ne.s32.totalorder %s8515_s26, %s8282_s4  ;;  %p9607_p7 = pneg %p8517_p5 }
  0x12   : > { %s8287_s7 = scalar_lea.hbm %s9603_s1, 393216  ;;  %p8288_p10 = scmp.lt.u32.totalorder %s8515_s26, %s9603_s1 }
  0x13   : > { %p8285_p8 = pnand %p9607_p7, %p8283_p6  ;;  %p8289_p11 = scmp.lt.u32.totalorder %s8287_s7, %s8282_s4 }
  0x14   : > { %p8291_p13 = scmp.lt.u32.totalorder %s8282_s4, %s8515_s26 }
  0x15   : > { %p8286_p9 = pneg %p8285_p8  ;;  %p8290_p12 = por %p8289_p11, %p8288_p10 }
  0x17   : > { %p8292_p1 = por %p8291_p13, %p8290_p12 }
  0x19   : > { %p8293_p2 = pnand %p8292_p1, %p8286_p9 }
  0x1b   : > { %8296 = shalt.err (!%p8293_p2)
}
  0x1c   : > { %s8297_s10 = scalar_lea.vmem %s8521_s29, 98304  ;;  %s8442_s11 = smov [#allocation5]  }
  0x1d   : > { %p8298_p3 = scmp.ne.s32.totalorder %s8521_s29, %s8297_s10  ;;  %s8302_s17 = sshll.u32 %s8442_s11, 4  ;;  %s8303_s17 = int_to_ptr.vmem [resolvable:$false] %s8302_s17 }
  0x1e   : > { %s8304_s18 = scalar_lea.vmem %s8303_s17, 196608  ;;  %p8305_p8 = scmp.lt.s32.totalorder %s8521_s29, %s8303_s17 }
  0x1f   : > { %p8300_p4 = pnand %p8298_p3, %p9607_p7  ;;  %p8306_p10 = scmp.lt.s32.totalorder %s8304_s18, %s8297_s10 }
  0x21   : > { %p8301_p6 = pneg %p8300_p4  ;;  %p8307_p11 = por %p8306_p10, %p8305_p8 }
  0x23   : > { %p8308_p12 = pnand %p8307_p11, %p8301_p6 }
  0x25   : > { %8311 = shalt.err (!%p8308_p12)
}
  0x26   : > { %s8443_s20 = smov 1024   ;;  %s8444_s22 = smov 256  }
  0x27   : > { %s8445_s23 = smov 16   ;;  %s8552_s24 = sadd.s32 4294967295, %s8440_s15  }
  0x28   : > { %7075 = dma.hbm_to_vmem [thread:$0]  (!%p8517_p5), %s8515_s26, 98304, %s8521_s29, %s8523_s30, %s8443_s20, %s8444_s22, %s8445_s23  }
  0x29   : > { %s6175_s25 = sadd.s32 4294967294, %s8440_s15   ;;  %p61_p9 = scmp.ne.s32.totalorder %s8432_s13, %s8428_s12 }
  0x2a   : > { %p9606_p13 = scmp.eq.s32.totalorder %s8552_s24, 0  ;;  %p111_p1 = scmp.eq.s32.totalorder %s8552_s24, 3 }
  0x2b   : > { %p117_p2 = scmp.eq.s32.totalorder %s6175_s25, 3  ;;  %p6176_p3 = scmp.ge.s32.totalorder %s8440_s15, 1 }
  0x2c   : > { %p8562_p4 = por %p9606_p13, %p61_p9  ;;  %p8569_p6 = por %p111_p1, %p55_p0 }
  0x2d   : > { %p8573_p8 = por %p117_p2, %p61_p9  ;;  %p124_p10 = scmp.lt.s32.totalorder %s8440_s15, 5 }
  0x2e   : > { %s9614_s28 = scalar_select %p8562_p4, 1, 0 }
  0x2f   : > { %s9615_s26 = scalar_select %p8569_p6, 1, 0 }
  0x30   : > { %s9616_s29 = scalar_select %p8573_p8, 1, 0 }
  0x31   : > { %p8578_p11 = pnand %p6176_p3, %p124_p10  ;;  %s8446_s5 = smov [#allocation2]  }
  0x32   : > { %s137_s6 = sshll.u32 %s8446_s5, 4  ;;  %s6181_s7 = sshll.u32 %s150_s21, 2  ;;  %s138_s6 = int_to_ptr.vmem [resolvable:$true] %s137_s6 }
  0x33   : > { %s9617_s4 = scalar_select %p8578_p11, 1, 0 }
  0x34   : > { %p7068_p12 = pneg %p8578_p11  ;;  %s6962_s8 = sshll.u32 %s8440_s15, 6 }
  0x35   : > { %s173_s9 = scalar_lea.vmem [#allocation7], %s6181_s7  ;;  %s8596_s20 = scalar_lea.hbm %s9604_s2, %s6962_s8 }
  0x36   : > { %s181_s10 = sshll.u32 %s173_s9, 4  ;;  %p8589_p0 = pnand %p7068_p12, %p9606_p13  ;;  %s8598_s10 = int_to_ptr.vmem [resolvable:$true] %s181_s10 }
  0x37   : > { %s8312_s23 = scalar_lea.hbm %s9602_s0, 384 }
  0x38   : > { %p8313_p9 = scmp.ne.s32.totalorder %s9602_s0, %s8312_s23  ;;  %p8314_p1 = pneg %p8589_p0 }
  0x39   : > { %p8319_p10 = scmp.lt.u32.totalorder %s8312_s23, %s9602_s0 }
  0x3a   : > { %p8315_p2 = pnand %p8314_p1, %p8313_p9 }
  0x3c   : > { %p8316_p3 = pneg %p8315_p2 }
  0x3e   : > { %p8321_p12 = pnand %p8319_p10, %p8316_p3 }
  0x40   : > { %8324 = shalt.err (!%p8321_p12)
}
  0x41   : > { %s8325_s8 = scalar_lea.vmem %s138_s6, 384  ;;  %p8333_p6 = scmp.lt.s32.totalorder %s138_s6, %s138_s6 }
  0x42   : > { %p8326_p13 = scmp.ne.s32.totalorder %s138_s6, %s8325_s8  ;;  %p8334_p4 = scmp.lt.s32.totalorder %s8325_s8, %s8325_s8 }
  0x44   : > { %p8328_p7 = pnand %p8326_p13, %p8314_p1  ;;  %p8335_p11 = por %p8334_p4, %p8333_p6 }
  0x46   : > { %p8329_p8 = pneg %p8328_p7 }
  0x48   : > { %p8336_p5 = pnand %p8335_p11, %p8329_p8 }
  0x4a   : > { %8339 = shalt.err (!%p8336_p5)
}
  0x4b   : > { %7071 = dma.hbm_to_vmem [thread:$0]  (!%p8589_p0), %s9602_s0, 384, %s138_s6, [#allocation3]  }
  0x4c   : > { %s8340_s21 = scalar_lea.hbm %s8596_s20, 64  ;;  %p9619_p13 = scmp.ne.s32.totalorder %s9613_s27, 0 }
  0x4d   : > { %p8341_p9 = scmp.ne.s32.totalorder %s8596_s20, %s8340_s21  ;;  %s8345_s25 = scalar_lea.hbm %s9604_s2, 256 }
  0x4e   : > { %p9620_p7 = pneg %p9619_p13  ;;  %p8346_p5 = scmp.lt.u32.totalorder %s8596_s20, %s9604_s2 }
  0x4f   : > { %p8347_p4 = scmp.lt.u32.totalorder %s8345_s25, %s8340_s21  ;;  %p8349_p8 = scmp.lt.u32.totalorder %s8340_s21, %s8596_s20 }
  0x50   : > { %p8343_p1 = pnand %p8341_p9, %p9620_p7 }
  0x51   : > { %p8348_p6 = por %p8347_p4, %p8346_p5 }
  0x52   : > { %p8344_p2 = pneg %p8343_p1 }
  0x53   : > { %p8350_p11 = por %p8349_p8, %p8348_p6 }
  0x55   : > { %p8351_p3 = pnand %p8350_p11, %p8344_p2 }
  0x57   : > { %8354 = shalt.err (!%p8351_p3)
}
  0x58   : > { %s8355_s6 = scalar_lea.vmem %s8598_s10, 64  ;;  %p9621_p10 = pmov %p9620_p7 }
  0x59   : > { %p8356_p0 = scmp.ne.s32.totalorder %s8598_s10, %s8355_s6  ;;  %s8447_s7 = smov [#allocation7]  }
  0x5a   : > { %s8360_s9 = sshll.u32 %s8447_s7, 4  ;;  %s8361_s9 = int_to_ptr.vmem [resolvable:$false] %s8360_s9 }
  0x5b   : > { %p8358_p12 = pnand %p8356_p0, %p9621_p10  ;;  %s8362_s8 = scalar_lea.vmem %s8361_s9, 128 }
  0x5c   : > { %p8363_p7 = scmp.lt.s32.totalorder %s8598_s10, %s8361_s9  ;;  %p8364_p1 = scmp.lt.s32.totalorder %s8362_s8, %s8355_s6 }
  0x5d   : > { %p8359_p9 = pneg %p8358_p12 }
  0x5e   : > { %p8365_p5 = por %p8364_p1, %p8363_p7 }
  0x60   : > { %p8366_p4 = pnand %p8365_p5, %p8359_p9 }
  0x62   : > { %8369 = shalt.err (!%p8366_p4)
}
  0x63   : > { %7078 = dma.hbm_to_vmem [thread:$0]  (!%p9619_p13), %s8596_s20, 64, %s8598_s10, %s8523_s30  }
  0x64   : > { %p9622_p2 = scmp.ne.s32.totalorder %s9617_s4, 0 }
  0x65   : > { %p9623_p6 = scmp.eq.s32.totalorder (!%p9622_p2), %s8552_s24, 0 }
  0x66   : > { %190 = sbr.rel (%p9622_p2) target bundleno = 1121 (0x461), region = 32 }
  0x6d   : > { %8415 = dma.done.wait (%p9623_p6), [#allocation3], 384   ;;  %p9624_p8 = pmov %p9623_p6 }
  0x6e   : > { %s196_s17 = sand.u32 1, %s8552_s24   ;;  %s8648_s18 = sand.u32 1, %s8432_s13  }
  0x6f   : > { %8417 = vsyncadd (%p9624_p8), [#allocation3], 4294966912  ;;  %s7057_s27 = smul.u32 6144, %s8648_s18  ;;  %s197_s21 = scalar_lea.sflag [#allocation6], %s196_s17 }
  0x70   : > { %p9625_p13 = scmp.ne.s32.totalorder %s9614_s28, 0 }
  0x71   : > { %s8651_s22 = scalar_lea.vmem [#allocation5], %s7057_s27 }
  0x72   : > { %8419 = dma.done.wait (%p9625_p13), %s197_s21, 98368  }
  0x73   : > { %8421 = vsyncadd (%p9625_p13), %s197_s21, 4294868928  ;;  %v7125_v0 = vld [vmem:[%s8651_s22 + $0x4] ss:$16 sps:$4 sm:$0xff]   ;;  %v7127_v1 = vld [vmem:[%s8651_s22 + $0xc] ss:$16 sps:$4 sm:$0xff]   ;;  %v1013_v36 = vlaneseq  ;;  %s6186_s30 = sshll.u32 %s8648_s18, 2 }
  0x74   : > { %5047 = vmatprep.subr.bf16.mxu0 %v7125_v0  ;;  %v7129_v2 = vld [vmem:[%s8651_s22] ss:$16 sps:$4 sm:$0xff]   ;;  %v7130_v3 = vld [vmem:[%s8651_s22 + $0x8] ss:$16 sps:$4 sm:$0xff]   ;;  %5539 = vmatprep.subr.bf16.mxu1 %v7127_v1  ;;  %v7131_v4 = vld [vmem:[%s8651_s22 + $0x24] ss:$16 sps:$4 sm:$0xff]  }
  0x75   : > { %5048 = vmatpush1.bf16.msra.mxu0 %v7129_v2  ;;  %5540 = vmatpush1.bf16.msra.mxu1 %v7130_v3  ;;  %v7133_v5 = vld [vmem:[%s8651_s22 + $0x2c] ss:$16 sps:$4 sm:$0xff]   ;;  %v7135_v6 = vld [vmem:[%s8651_s22 + $0x20] ss:$16 sps:$4 sm:$0xff]   ;;  %v7136_v7 = vld [vmem:[%s8651_s22 + $0x28] ss:$16 sps:$4 sm:$0xff]  }
  0x76   : > { %5049 = vmatprep.subr.bf16.mxu0 %v7131_v4  ;;  %5541 = vmatprep.subr.bf16.mxu1 %v7133_v5  ;;  %v7137_v8 = vld [vmem:[%s8651_s22 + $0x44] ss:$16 sps:$4 sm:$0xff]   ;;  %v7139_v9 = vld [vmem:[%s8651_s22 + $0x4c] ss:$16 sps:$4 sm:$0xff]   ;;  %v7141_v10 = vld [vmem:[%s8651_s22 + $0x40] ss:$16 sps:$4 sm:$0xff]  }
  0x77   : > { %v7142_v11 = vld [vmem:[%s8651_s22 + $0x48] ss:$16 sps:$4 sm:$0xff]   ;;  %v7143_v12 = vld [vmem:[%s8651_s22 + $0x64] ss:$16 sps:$4 sm:$0xff]   ;;  %v7145_v13 = vld [vmem:[%s8651_s22 + $0x6c] ss:$16 sps:$4 sm:$0xff]  }
  0x78   : > { %v7147_v14 = vld [vmem:[%s8651_s22 + $0x60] ss:$16 sps:$4 sm:$0xff]   ;;  %v7148_v15 = vld [vmem:[%s8651_s22 + $0x68] ss:$16 sps:$4 sm:$0xff]   ;;  %v7149_v16 = vld [vmem:[%s8651_s22 + $0x84] ss:$16 sps:$4 sm:$0xff]  }
  0x79   : > { %5050 = vmatpush1.bf16.msra.mxu0 %v7135_v6  ;;  %5542 = vmatpush1.bf16.msra.mxu1 %v7136_v7  ;;  %v7151_v17 = vld [vmem:[%s8651_s22 + $0x8c] ss:$16 sps:$4 sm:$0xff]   ;;  %v7153_v18 = vld [vmem:[%s8651_s22 + $0x80] ss:$16 sps:$4 sm:$0xff]   ;;  %v7154_v19 = vld [vmem:[%s8651_s22 + $0x88] ss:$16 sps:$4 sm:$0xff]  }
  0x7a   : > { %5051 = vmatprep.subr.bf16.mxu0 %v7137_v8  ;;  %5543 = vmatprep.subr.bf16.mxu1 %v7139_v9  ;;  %v7155_v20 = vld [vmem:[%s8651_s22 + $0xa4] ss:$16 sps:$4 sm:$0xff]   ;;  %v7157_v21 = vld [vmem:[%s8651_s22 + $0xac] ss:$16 sps:$4 sm:$0xff]   ;;  %v7159_v22 = vld [vmem:[%s8651_s22 + $0xa0] ss:$16 sps:$4 sm:$0xff]  }
  0x7b   : > { %v7160_v23 = vld [vmem:[%s8651_s22 + $0xa8] ss:$16 sps:$4 sm:$0xff]   ;;  %v7161_v24 = vld [vmem:[%s8651_s22 + $0xc4] ss:$16 sps:$4 sm:$0xff]   ;;  %v7163_v25 = vld [vmem:[%s8651_s22 + $0xcc] ss:$16 sps:$4 sm:$0xff]  }
  0x7c   : > { %v7165_v26 = vld [vmem:[%s8651_s22 + $0xc0] ss:$16 sps:$4 sm:$0xff]   ;;  %v7166_v27 = vld [vmem:[%s8651_s22 + $0xc8] ss:$16 sps:$4 sm:$0xff]   ;;  %v7167_v28 = vld [vmem:[%s8651_s22 + $0xe4] ss:$16 sps:$4 sm:$0xff]  }
  0x7d   : > { %5052 = vmatpush1.bf16.msra.mxu0 %v7141_v10  ;;  %5544 = vmatpush1.bf16.msra.mxu1 %v7142_v11  ;;  %v7169_v29 = vld [vmem:[%s8651_s22 + $0xec] ss:$16 sps:$4 sm:$0xff]   ;;  %v7171_v30 = vld [vmem:[%s8651_s22 + $0xe0] ss:$16 sps:$4 sm:$0xff]   ;;  %v7172_v31 = vld [vmem:[%s8651_s22 + $0xe8] ss:$16 sps:$4 sm:$0xff]  }
  0x7e   : > { %5053 = vmatprep.subr.bf16.mxu0 %v7143_v12  ;;  %5545 = vmatprep.subr.bf16.mxu1 %v7145_v13  ;;  %v7173_v32 = vld [vmem:[%s8651_s22 + $0x104] ss:$16 sps:$4 sm:$0xff]   ;;  %v7175_v33 = vld [vmem:[%s8651_s22 + $0x10c] ss:$16 sps:$4 sm:$0xff]   ;;  %v7177_v34 = vld [vmem:[%s8651_s22 + $0x100] ss:$16 sps:$4 sm:$0xff]  }
  0x7f   : > { %v7178_v35 = vld [vmem:[%s8651_s22 + $0x108] ss:$16 sps:$4 sm:$0xff]   ;;  %v8448_v37 = vmov 1966171168   ;;  %v7179_v39 = vld [vmem:[%s8651_s22 + $0x124] ss:$16 sps:$4 sm:$0xff]  }
  0x80   : > { %v1038_v38 = vunpack.c.l.s4 %v8448_v37  ;;  %v7181_v40 = vld [vmem:[%s8651_s22 + $0x12c] ss:$16 sps:$4 sm:$0xff]   ;;  %v7183_v41 = vld [vmem:[%s8651_s22 + $0x120] ss:$16 sps:$4 sm:$0xff]   ;;  %v8696_v42 = vshrl.u32 %v1013_v36, 7  ;;  %s209_s28 = scalar_lea.vmem [#allocation7], %s6186_s30 }
  0x81   : > { %5054 = vmatpush1.bf16.msra.mxu0 %v7147_v14  ;;  %5546 = vmatpush1.bf16.msra.mxu1 %v7148_v15  ;;  %v7184_v44 = vld [vmem:[%s8651_s22 + $0x128] ss:$16 sps:$4 sm:$0xff]   ;;  %v7185_v45 = vld [vmem:[%s8651_s22 + $0x144] ss:$16 sps:$4 sm:$0xff]   ;;  %v7187_v46 = vld [vmem:[%s8651_s22 + $0x14c] ss:$16 sps:$4 sm:$0xff]  }
  0x82   : > { %5055 = vmatprep.subr.bf16.mxu0 %v7149_v16  ;;  %5547 = vmatprep.subr.bf16.mxu1 %v7151_v17  ;;  %v1039_v43 = vunpack.c.0.s8 %v1038_v38  ;;  %v7189_v47 = vld [vmem:[%s8651_s22 + $0x140] ss:$16 sps:$4 sm:$0xff]   ;;  %v7190_v48 = vld [vmem:[%s8651_s22 + $0x148] ss:$16 sps:$4 sm:$0xff]   ;;  %v7191_v50 = vld [vmem:[%s8651_s22 + $0x164] ss:$16 sps:$4 sm:$0xff]  }
  0x83   : > { %v7193_v51 = vld [vmem:[%s8651_s22 + $0x16c] ss:$16 sps:$4 sm:$0xff]   ;;  %v7195_v53 = vld [vmem:[%s8651_s22 + $0x160] ss:$16 sps:$4 sm:$0xff]   ;;  %v7196_v55 = vld [vmem:[%s8651_s22 + $0x168] ss:$16 sps:$4 sm:$0xff]  }
  0x84   : > { %v8704_v49 = vsub.s32 %v1039_v43, %v8696_v42  ;;  %v8708_v52 = vld [vmem:[#allocation2] sm:$0xff]  ;;  %v7197_v56 = vld [vmem:[%s8651_s22 + $0x184] ss:$16 sps:$4 sm:$0xff]   ;;  %v7201_v59 = vld [vmem:[%s8651_s22 + $0x180] ss:$16 sps:$4 sm:$0xff]   ;;  %s6187_s4 = sshll.u32 %s8648_s18, 3 }
  0x85   : > { %5056 = vmatpush1.bf16.msra.mxu0 %v7153_v18  ;;  %5548 = vmatpush1.bf16.msra.mxu1 %v7154_v19  ;;  %v7199_v57 = vld [vmem:[%s8651_s22 + $0x18c] ss:$16 sps:$4 sm:$0xff]   ;;  %v7202_v61 = vld [vmem:[%s8651_s22 + $0x188] ss:$16 sps:$4 sm:$0xff]   ;;  %v7203_v62 = vld [vmem:[%s8651_s22 + $0x1a4] ss:$16 sps:$4 sm:$0xff]  }
  0x86   : > { %5057 = vmatprep.subr.bf16.mxu0 %v7155_v20  ;;  %5549 = vmatprep.subr.bf16.mxu1 %v7157_v21  ;;  %v1043_v54 = vrot.slane %v8708_v52, %v8704_v49  ;;  %v7205_v63 = vld [vmem:[%s8651_s22 + $0x1ac] ss:$16 sps:$4 sm:$0xff]   ;;  %v7207_v0 = vld [vmem:[%s8651_s22 + $0x1a0] ss:$16 sps:$4 sm:$0xff]   ;;  %v7208_v1 = vld [vmem:[%s8651_s22 + $0x1a8] ss:$16 sps:$4 sm:$0xff]  }
  0x87   : > { %v7209_v2 = vld [vmem:[%s8651_s22 + $0x1c4] ss:$16 sps:$4 sm:$0xff]   ;;  %v7211_v3 = vld [vmem:[%s8651_s22 + $0x1cc] ss:$16 sps:$4 sm:$0xff]   ;;  %v7213_v4 = vld [vmem:[%s8651_s22 + $0x1c0] ss:$16 sps:$4 sm:$0xff]  }
  0x88   : > { %v1051_v58 = vcombine.high %v1043_v54, %v1043_v54  ;;  %v7214_v5 = vld [vmem:[%s8651_s22 + $0x1c8] ss:$16 sps:$4 sm:$0xff]   ;;  %v7215_v6 = vld [vmem:[%s8651_s22 + $0x1e4] ss:$16 sps:$4 sm:$0xff]   ;;  %v7217_v7 = vld [vmem:[%s8651_s22 + $0x1ec] ss:$16 sps:$4 sm:$0xff]   ;;  %v8735_v13 = vrot.slane %v1043_v54, %v8704_v49 }
  0x89   : > { %5058 = vmatpush1.bf16.msra.mxu0 %v7159_v22  ;;  %5550 = vmatpush1.bf16.msra.mxu1 %v7160_v23  ;;  %v7219_v8 = vld [vmem:[%s8651_s22 + $0x1e0] ss:$16 sps:$4 sm:$0xff]   ;;  %v7220_v9 = vld [vmem:[%s8651_s22 + $0x1e8] ss:$16 sps:$4 sm:$0xff]   ;;  %v7223_v10 = vld [vmem:[%s8651_s22 + $0x204] ss:$16 sps:$4 sm:$0xff]  }
  0x8a   : > { %5059 = vmatprep.subr.bf16.mxu0 %v7161_v24  ;;  %5551 = vmatprep.subr.bf16.mxu1 %v7163_v25  ;;  %v1073_v60 = vrot.slane %v1051_v58, %v8704_v49  ;;  %v7226_v11 = vld [vmem:[%s8651_s22 + $0x20c] ss:$16 sps:$4 sm:$0xff]   ;;  %v7221_v12 = vld [vmem:[%s8651_s22 + $0x200] ss:$16 sps:$4 sm:$0xff]   ;;  %v7224_v14 = vld [vmem:[%s8651_s22 + $0x208] ss:$16 sps:$4 sm:$0xff]  }
  0x8b   : > { %v7229_v15 = vld [vmem:[%s8651_s22 + $0x224] ss:$16 sps:$4 sm:$0xff]   ;;  %v7232_v16 = vld [vmem:[%s8651_s22 + $0x22c] ss:$16 sps:$4 sm:$0xff]   ;;  %v7227_v18 = vld [vmem:[%s8651_s22 + $0x220] ss:$16 sps:$4 sm:$0xff]  }
  0x8c   : > { %5079 = vmatprep.mubr.bf16.mxu0 %v1073_v60  ;;  %5571 = vmatprep.mubr.bf16.mxu1 %v1073_v60  ;;  %v1083_v17 = vcombine.high %v1073_v60, %v1073_v60  ;;  %v7230_v19 = vld [vmem:[%s8651_s22 + $0x228] ss:$16 sps:$4 sm:$0xff]   ;;  %v7235_v20 = vld [vmem:[%s8651_s22 + $0x244] ss:$16 sps:$4 sm:$0xff]   ;;  %v7238_v21 = vld [vmem:[%s8651_s22 + $0x24c] ss:$16 sps:$4 sm:$0xff]  }
  0x8d   : > { %5060 = vmatpush1.bf16.msra.mxu0 %v7165_v26  ;;  %5552 = vmatpush1.bf16.msra.mxu1 %v7166_v27  ;;  %v7233_v22 = vld [vmem:[%s8651_s22 + $0x240] ss:$16 sps:$4 sm:$0xff]   ;;  %v7236_v23 = vld [vmem:[%s8651_s22 + $0x248] ss:$16 sps:$4 sm:$0xff]   ;;  %v7241_v24 = vld [vmem:[%s8651_s22 + $0x264] ss:$16 sps:$4 sm:$0xff]  }
  0x8e   : > { %5061 = vmatprep.subr.bf16.mxu0 %v7167_v28  ;;  %5553 = vmatprep.subr.bf16.mxu1 %v7169_v29  ;;  %v7244_v25 = vld [vmem:[%s8651_s22 + $0x26c] ss:$16 sps:$4 sm:$0xff]   ;;  %v7239_v26 = vld [vmem:[%s8651_s22 + $0x260] ss:$16 sps:$4 sm:$0xff]   ;;  %v7242_v27 = vld [vmem:[%s8651_s22 + $0x268] ss:$16 sps:$4 sm:$0xff]  }
  0x8f   : > { %v7247_v28 = vld [vmem:[%s8651_s22 + $0x284] ss:$16 sps:$4 sm:$0xff]   ;;  %v7250_v29 = vld [vmem:[%s8651_s22 + $0x28c] ss:$16 sps:$4 sm:$0xff]   ;;  %v7257_v38 = vld [vmem:[%s8651_s22 + $0x2c0] ss:$16 sps:$4 sm:$0xff]  }
  0x90   : > { %v7259_v36 = vld [vmem:[%s8651_s22 + $0x2c4] ss:$16 sps:$4 sm:$0xff]   ;;  %v7262_v37 = vld [vmem:[%s8651_s22 + $0x2cc] ss:$16 sps:$4 sm:$0xff]   ;;  %v7263_v43 = vld [vmem:[%s8651_s22 + $0x2e0] ss:$16 sps:$4 sm:$0xff]  }
  0x91   : > { %5062 = vmatpush1.bf16.msra.mxu0 %v7171_v30  ;;  %5554 = vmatpush1.bf16.msra.mxu1 %v7172_v31  ;;  %v7245_v30 = vld [vmem:[%s8651_s22 + $0x280] ss:$16 sps:$4 sm:$0xff]   ;;  %v7248_v31 = vld [vmem:[%s8651_s22 + $0x288] ss:$16 sps:$4 sm:$0xff]   ;;  %v7292_v60 = vld [vmem:[%s8651_s22 + $0x36c] ss:$16 sps:$4 sm:$0xff]  }
  0x92   : > { %5063 = vmatprep.subr.bf16.mxu0 %v7173_v32  ;;  %5555 = vmatprep.subr.bf16.mxu1 %v7175_v33  ;;  %v7253_v32 = vld [vmem:[%s8651_s22 + $0x2a4] ss:$16 sps:$4 sm:$0xff]   ;;  %v7256_v33 = vld [vmem:[%s8651_s22 + $0x2ac] ss:$16 sps:$4 sm:$0xff]   ;;  %v7278_v54 = vld [vmem:[%s8651_s22 + $0x328] ss:$16 sps:$4 sm:$0xff]  }
  0x93   : > { %v7284_v58 = vld [vmem:[%s8651_s22 + $0x348] ss:$16 sps:$4 sm:$0xff]   ;;  %s6963_s10 = sshll.u32 %s8552_s24, 7  ;;  %s236_s20 = scalar_lea.vmem [#allocation8], %s6187_s4 }
  0x94   : > { %s6073_s23 = sshll.u32 %s236_s20, 4  ;;  %s9559_s5 = scalar_lea.hbm %s9605_s3, %s6963_s10  ;;  %s9561_s23 = int_to_ptr.vmem [resolvable:$true] %s6073_s23 }
  0x95   : > { %5064 = vmatpush1.bf16.msra.mxu0 %v7177_v34  ;;  %5556 = vmatpush1.bf16.msra.mxu1 %v7178_v35  ;;  %v7251_v34 = vld [vmem:[%s8651_s22 + $0x2a0] ss:$16 sps:$4 sm:$0xff]   ;;  %v7254_v35 = vld [vmem:[%s8651_s22 + $0x2a8] ss:$16 sps:$4 sm:$0xff]   ;;  %s6059_s6 = scalar_lea.sflag [#allocation4], %s8648_s18  ;;  %s8370_s7 = scalar_lea.vmem %s9561_s23, 128 }
  0x96   : > { %5065 = vmatprep.subr.bf16.mxu0 %v7179_v39  ;;  %5557 = vmatprep.subr.bf16.mxu1 %v7181_v40  ;;  %v7260_v39 = vld [vmem:[%s8651_s22 + $0x2c8] ss:$16 sps:$4 sm:$0xff]   ;;  %v7265_v40 = vld [vmem:[%s8651_s22 + $0x2e4] ss:$16 sps:$4 sm:$0xff]   ;;  %p8371_p11 = scmp.ne.s32.totalorder %s9561_s23, %s8370_s7  ;;  %p9626_p3 = scmp.ne.s32.totalorder %s9615_s26, 0 }
  0x97   : > { %s8450_s24 = smov [#allocation8]  }
  0x98   : > { %p8372_p0 = pnand %p8371_p11, %p9626_p3  ;;  %s8374_s9 = sshll.u32 %s8450_s24, 4  ;;  %s8375_s9 = int_to_ptr.vmem [resolvable:$false] %s8374_s9 }
  0x99   : > { %5066 = vmatpush1.bf16.msra.mxu0 %v7183_v41  ;;  %5558 = vmatpush1.bf16.msra.mxu1 %v7184_v44  ;;  %v7268_v41 = vld [vmem:[%s8651_s22 + $0x2ec] ss:$16 sps:$4 sm:$0xff]   ;;  %v7266_v44 = vld [vmem:[%s8651_s22 + $0x2e8] ss:$16 sps:$4 sm:$0xff]   ;;  %s8376_s8 = scalar_lea.vmem %s8375_s9, 256  ;;  %p8377_p12 = scmp.lt.s32.totalorder %s9561_s23, %s8375_s9 }
  0x9a   : > { %5067 = vmatprep.subr.bf16.mxu0 %v7185_v45  ;;  %5559 = vmatprep.subr.bf16.mxu1 %v7187_v46  ;;  %v7271_v45 = vld [vmem:[%s8651_s22 + $0x304] ss:$16 sps:$4 sm:$0xff]   ;;  %v7274_v46 = vld [vmem:[%s8651_s22 + $0x30c] ss:$16 sps:$4 sm:$0xff]   ;;  %p8373_p10 = pneg %p8372_p0  ;;  %p8378_p9 = scmp.lt.s32.totalorder %s8376_s8, %s8370_s7 }
  0x9c   : > { %p8379_p7 = por %p8378_p9, %p8377_p12 }
  0x9d   : > { %5068 = vmatpush1.bf16.msra.mxu0 %v7189_v47  ;;  %5560 = vmatpush1.bf16.msra.mxu1 %v7190_v48  ;;  %v7269_v47 = vld [vmem:[%s8651_s22 + $0x300] ss:$16 sps:$4 sm:$0xff]   ;;  %v7272_v48 = vld [vmem:[%s8651_s22 + $0x308] ss:$16 sps:$4 sm:$0xff]  }
  0x9e   : > { %5069 = vmatprep.subr.bf16.mxu0 %v7191_v50  ;;  %5561 = vmatprep.subr.bf16.mxu1 %v7193_v51  ;;  %v7277_v50 = vld [vmem:[%s8651_s22 + $0x324] ss:$16 sps:$4 sm:$0xff]   ;;  %v7280_v51 = vld [vmem:[%s8651_s22 + $0x32c] ss:$16 sps:$4 sm:$0xff]   ;;  %p8380_p1 = pnand %p8379_p7, %p8373_p10 }
  0xa1   : > { %5070 = vmatpush1.bf16.msra.mxu0 %v7195_v53  ;;  %5562 = vmatpush1.bf16.msra.mxu1 %v7196_v55  ;;  %v7275_v53 = vld [vmem:[%s8651_s22 + $0x320] ss:$16 sps:$4 sm:$0xff]   ;;  %v7283_v55 = vld [vmem:[%s8651_s22 + $0x344] ss:$16 sps:$4 sm:$0xff]  }
  0xa2   : > { %5071 = vmatprep.subr.bf16.mxu0 %v7197_v56  ;;  %5563 = vmatprep.subr.bf16.mxu1 %v7199_v57  ;;  %v7286_v56 = vld [vmem:[%s8651_s22 + $0x34c] ss:$16 sps:$4 sm:$0xff]   ;;  %v7281_v57 = vld [vmem:[%s8651_s22 + $0x340] ss:$16 sps:$4 sm:$0xff]  }
  0xa5   : > { %5072 = vmatpush1.bf16.msra.mxu0 %v7201_v59  ;;  %5564 = vmatpush1.bf16.msra.mxu1 %v7202_v61  ;;  %v7289_v59 = vld [vmem:[%s8651_s22 + $0x364] ss:$16 sps:$4 sm:$0xff]   ;;  %v7287_v61 = vld [vmem:[%s8651_s22 + $0x360] ss:$16 sps:$4 sm:$0xff]  }
  0xa6   : > { %5073 = vmatprep.subr.bf16.mxu0 %v7203_v62  ;;  %5565 = vmatprep.subr.bf16.mxu1 %v7205_v63  ;;  %v7290_v62 = vld [vmem:[%s8651_s22 + $0x368] ss:$16 sps:$4 sm:$0xff]   ;;  %v7295_v63 = vld [vmem:[%s8651_s22 + $0x384] ss:$16 sps:$4 sm:$0xff]  }
  0xa9   : > { %5074 = vmatpush1.bf16.msra.mxu0 %v7207_v0  ;;  %5566 = vmatpush1.bf16.msra.mxu1 %v7208_v1  ;;  %v7298_v0 = vld [vmem:[%s8651_s22 + $0x38c] ss:$16 sps:$4 sm:$0xff]   ;;  %v7293_v1 = vld [vmem:[%s8651_s22 + $0x380] ss:$16 sps:$4 sm:$0xff]  }
  0xaa   : > { %5075 = vmatprep.subr.bf16.mxu0 %v7209_v2  ;;  %5567 = vmatprep.subr.bf16.mxu1 %v7211_v3  ;;  %v7296_v2 = vld [vmem:[%s8651_s22 + $0x388] ss:$16 sps:$4 sm:$0xff]   ;;  %v7301_v3 = vld [vmem:[%s8651_s22 + $0x3a4] ss:$16 sps:$4 sm:$0xff]  }
  0xad   : > { %5076 = vmatpush1.bf16.msra.mxu0 %v7213_v4  ;;  %5568 = vmatpush1.bf16.msra.mxu1 %v7214_v5  ;;  %v7304_v4 = vld [vmem:[%s8651_s22 + $0x3ac] ss:$16 sps:$4 sm:$0xff]   ;;  %v7299_v5 = vld [vmem:[%s8651_s22 + $0x3a0] ss:$16 sps:$4 sm:$0xff]  }
  0xae   : > { %5077 = vmatprep.subr.bf16.mxu0 %v7215_v6  ;;  %5569 = vmatprep.subr.bf16.mxu1 %v7217_v7  ;;  %v7302_v6 = vld [vmem:[%s8651_s22 + $0x3a8] ss:$16 sps:$4 sm:$0xff]   ;;  %v7307_v7 = vld [vmem:[%s8651_s22 + $0x3c4] ss:$16 sps:$4 sm:$0xff]  }
  0xb1   : > { %5078 = vmatpush1.bf16.msra.mxu0 %v7219_v8  ;;  %5570 = vmatpush1.bf16.msra.mxu1 %v7220_v9  ;;  %v7310_v8 = vld [vmem:[%s8651_s22 + $0x3cc] ss:$16 sps:$4 sm:$0xff]   ;;  %v1036_v9 = vcombine.high %v8708_v52, %v8708_v52  ;;  %v7314_v52 = vld [vmem:[%s8651_s22 + $0x3e8] ss:$16 sps:$4 sm:$0xff]  }
  0xb2   : > { %5088 = vmatprep.subr.bf16.mxu0 %v7223_v10  ;;  %5580 = vmatprep.subr.bf16.mxu1 %v7226_v11  ;;  %v7305_v10 = vld [vmem:[%s8651_s22 + $0x3c0] ss:$16 sps:$4 sm:$0xff]   ;;  %v7308_v11 = vld [vmem:[%s8651_s22 + $0x3c8] ss:$16 sps:$4 sm:$0xff]  }
  0xb4   : > { %5080 = vmatmul.mubr.bf16.vlgmr.msra.gmra.mrb[0].mxu0 %v8735_v13  ;;  %5572 = vmatmul.mubr.bf16.vlgmr.msra.gmra.mrb[0].mxu1 %v8735_v13 }
  0xb5   : > { %5089 = vmatpush1.bf16.msra.mxu0 %v7221_v12  ;;  %5581 = vmatpush1.bf16.msra.mxu1 %v7224_v14  ;;  %v7313_v12 = vld [vmem:[%s8651_s22 + $0x3e4] ss:$16 sps:$4 sm:$0xff]   ;;  %v7316_v14 = vld [vmem:[%s8651_s22 + $0x3ec] ss:$16 sps:$4 sm:$0xff]  }
  0xb6   : > { %5090 = vmatprep.subr.bf16.mxu0 %v7229_v15  ;;  %5582 = vmatprep.subr.bf16.mxu1 %v7232_v16  ;;  %v8801_v15 = vrot.slane %v1036_v9, %v8704_v49  ;;  %v7311_v16 = vld [vmem:[%s8651_s22 + $0x3e0] ss:$16 sps:$4 sm:$0xff]   ;;  %v7392_v9 = vld [vmem:[%s8651_s22 + $0x588] ss:$16 sps:$4 sm:$0xff]  }
  0xb7   : > { %5120 = vmatprep.mubr.bf16.mxu0 %v1083_v17  ;;  %5612 = vmatprep.mubr.bf16.mxu1 %v1083_v17  ;;  %v7319_v17 = vld [vmem:[%s8651_s22 + $0x404] ss:$16 sps:$4 sm:$0xff]  }
  0xb9   : > { %5091 = vmatpush1.bf16.msra.mxu0 %v7227_v18  ;;  %5583 = vmatpush1.bf16.msra.mxu1 %v7230_v19  ;;  %v7322_v18 = vld [vmem:[%s8651_s22 + $0x40c] ss:$16 sps:$4 sm:$0xff]   ;;  %v1052_v19 = vcombine.high %v8801_v15, %v8801_v15 }
  0xba   : > { %5092 = vmatprep.subr.bf16.mxu0 %v7235_v20  ;;  %5584 = vmatprep.subr.bf16.mxu1 %v7238_v21  ;;  %v7317_v20 = vld [vmem:[%s8651_s22 + $0x400] ss:$16 sps:$4 sm:$0xff]   ;;  %v1081_v21 = vcombine.high %v8735_v13, %v8735_v13  ;;  %v7326_v13 = vld [vmem:[%s8651_s22 + $0x428] ss:$16 sps:$4 sm:$0xff]  }
  0xbd   : > { %5093 = vmatpush1.bf16.msra.mxu0 %v7233_v22  ;;  %5585 = vmatpush1.bf16.msra.mxu1 %v7236_v23  ;;  %v7320_v22 = vld [vmem:[%s8651_s22 + $0x408] ss:$16 sps:$4 sm:$0xff]   ;;  %v7325_v23 = vld [vmem:[%s8651_s22 + $0x424] ss:$16 sps:$4 sm:$0xff]  }
  0xbe   : > { %5094 = vmatprep.subr.bf16.mxu0 %v7241_v24  ;;  %5586 = vmatprep.subr.bf16.mxu1 %v7244_v25  ;;  %v7328_v24 = vld [vmem:[%s8651_s22 + $0x42c] ss:$16 sps:$4 sm:$0xff]   ;;  %v8816_v25 = vrot.slane %v1052_v19, %v8704_v49  ;;  %v7409_v19 = vld [vmem:[%s8651_s22 + $0x5e4] ss:$16 sps:$4 sm:$0xff]  }
  0xc1   : > { %5095 = vmatpush1.bf16.msra.mxu0 %v7239_v26  ;;  %5587 = vmatpush1.bf16.msra.mxu1 %v7242_v27  ;;  %v7323_v26 = vld [vmem:[%s8651_s22 + $0x420] ss:$16 sps:$4 sm:$0xff]   ;;  %v7331_v27 = vld [vmem:[%s8651_s22 + $0x444] ss:$16 sps:$4 sm:$0xff]  }
  0xc2   : > { %5096 = vmatprep.subr.bf16.mxu0 %v7247_v28  ;;  %5588 = vmatprep.subr.bf16.mxu1 %v7250_v29  ;;  %v7334_v28 = vld [vmem:[%s8651_s22 + $0x44c] ss:$16 sps:$4 sm:$0xff]   ;;  %v7329_v29 = vld [vmem:[%s8651_s22 + $0x440] ss:$16 sps:$4 sm:$0xff]  }
  0xc5   : > { %5097 = vmatpush1.bf16.msra.mxu0 %v7245_v30  ;;  %5589 = vmatpush1.bf16.msra.mxu1 %v7248_v31  ;;  %v7332_v30 = vld [vmem:[%s8651_s22 + $0x448] ss:$16 sps:$4 sm:$0xff]   ;;  %v7337_v31 = vld [vmem:[%s8651_s22 + $0x464] ss:$16 sps:$4 sm:$0xff]  }
  0xc6   : > { %5098 = vmatprep.subr.bf16.mxu0 %v7253_v32  ;;  %5590 = vmatprep.subr.bf16.mxu1 %v7256_v33  ;;  %v7340_v32 = vld [vmem:[%s8651_s22 + $0x46c] ss:$16 sps:$4 sm:$0xff]   ;;  %v7335_v33 = vld [vmem:[%s8651_s22 + $0x460] ss:$16 sps:$4 sm:$0xff]  }
  0xc9   : > { %5099 = vmatpush1.bf16.msra.mxu0 %v7251_v34  ;;  %5591 = vmatpush1.bf16.msra.mxu1 %v7254_v35  ;;  %v7338_v34 = vld [vmem:[%s8651_s22 + $0x468] ss:$16 sps:$4 sm:$0xff]   ;;  %v7343_v35 = vld [vmem:[%s8651_s22 + $0x484] ss:$16 sps:$4 sm:$0xff]  }
  0xca   : > { %5100 = vmatprep.subr.bf16.mxu0 %v7259_v36  ;;  %5592 = vmatprep.subr.bf16.mxu1 %v7262_v37  ;;  %v7346_v36 = vld [vmem:[%s8651_s22 + $0x48c] ss:$16 sps:$4 sm:$0xff]   ;;  %v7341_v37 = vld [vmem:[%s8651_s22 + $0x480] ss:$16 sps:$4 sm:$0xff]  }
  0xcd   : > { %5101 = vmatpush1.bf16.msra.mxu0 %v7257_v38  ;;  %5593 = vmatpush1.bf16.msra.mxu1 %v7260_v39  ;;  %v7344_v38 = vld [vmem:[%s8651_s22 + $0x488] ss:$16 sps:$4 sm:$0xff]   ;;  %v7349_v39 = vld [vmem:[%s8651_s22 + $0x4a4] ss:$16 sps:$4 sm:$0xff]  }
  0xce   : > { %5102 = vmatprep.subr.bf16.mxu0 %v7265_v40  ;;  %5594 = vmatprep.subr.bf16.mxu1 %v7268_v41  ;;  %v7352_v40 = vld [vmem:[%s8651_s22 + $0x4ac] ss:$16 sps:$4 sm:$0xff]   ;;  %v7347_v41 = vld [vmem:[%s8651_s22 + $0x4a0] ss:$16 sps:$4 sm:$0xff]  }
  0xd1   : > { %5103 = vmatpush1.bf16.msra.mxu0 %v7263_v43  ;;  %5595 = vmatpush1.bf16.msra.mxu1 %v7266_v44  ;;  %v7350_v43 = vld [vmem:[%s8651_s22 + $0x4a8] ss:$16 sps:$4 sm:$0xff]   ;;  %v7355_v44 = vld [vmem:[%s8651_s22 + $0x4c4] ss:$16 sps:$4 sm:$0xff]  }
  0xd2   : > { %5104 = vmatprep.subr.bf16.mxu0 %v7271_v45  ;;  %5596 = vmatprep.subr.bf16.mxu1 %v7274_v46  ;;  %v7358_v45 = vld [vmem:[%s8651_s22 + $0x4cc] ss:$16 sps:$4 sm:$0xff]   ;;  %v7353_v46 = vld [vmem:[%s8651_s22 + $0x4c0] ss:$16 sps:$4 sm:$0xff]  }
  0xd5   : > { %5105 = vmatpush1.bf16.msra.mxu0 %v7269_v47  ;;  %5597 = vmatpush1.bf16.msra.mxu1 %v7272_v48  ;;  %v7356_v47 = vld [vmem:[%s8651_s22 + $0x4c8] ss:$16 sps:$4 sm:$0xff]   ;;  %v7361_v48 = vld [vmem:[%s8651_s22 + $0x4e4] ss:$16 sps:$4 sm:$0xff]  }
  0xd6   : > { %5106 = vmatprep.subr.bf16.mxu0 %v7277_v50  ;;  %5598 = vmatprep.subr.bf16.mxu1 %v7280_v51  ;;  %v7364_v50 = vld [vmem:[%s8651_s22 + $0x4ec] ss:$16 sps:$4 sm:$0xff]   ;;  %v7359_v51 = vld [vmem:[%s8651_s22 + $0x4e0] ss:$16 sps:$4 sm:$0xff]  }
  0xd9   : > { %5107 = vmatpush1.bf16.msra.mxu0 %v7275_v53  ;;  %5599 = vmatpush1.bf16.msra.mxu1 %v7278_v54  ;;  %v7362_v53 = vld [vmem:[%s8651_s22 + $0x4e8] ss:$16 sps:$4 sm:$0xff]   ;;  %v7367_v54 = vld [vmem:[%s8651_s22 + $0x504] ss:$16 sps:$4 sm:$0xff]  }
  0xda   : > { %5108 = vmatprep.subr.bf16.mxu0 %v7283_v55  ;;  %5600 = vmatprep.subr.bf16.mxu1 %v7286_v56  ;;  %v7370_v55 = vld [vmem:[%s8651_s22 + $0x50c] ss:$16 sps:$4 sm:$0xff]   ;;  %v7365_v56 = vld [vmem:[%s8651_s22 + $0x500] ss:$16 sps:$4 sm:$0xff]  }
  0xdd   : > { %5109 = vmatpush1.bf16.msra.mxu0 %v7281_v57  ;;  %5601 = vmatpush1.bf16.msra.mxu1 %v7284_v58  ;;  %v7368_v57 = vld [vmem:[%s8651_s22 + $0x508] ss:$16 sps:$4 sm:$0xff]   ;;  %v7373_v58 = vld [vmem:[%s8651_s22 + $0x524] ss:$16 sps:$4 sm:$0xff]  }
  0xde   : > { %5110 = vmatprep.subr.bf16.mxu0 %v7289_v59  ;;  %5602 = vmatprep.subr.bf16.mxu1 %v7292_v60  ;;  %v7376_v59 = vld [vmem:[%s8651_s22 + $0x52c] ss:$16 sps:$4 sm:$0xff]   ;;  %v7371_v60 = vld [vmem:[%s8651_s22 + $0x520] ss:$16 sps:$4 sm:$0xff]  }
  0xe1   : > { %5111 = vmatpush1.bf16.msra.mxu0 %v7287_v61  ;;  %5603 = vmatpush1.bf16.msra.mxu1 %v7290_v62  ;;  %v7374_v61 = vld [vmem:[%s8651_s22 + $0x528] ss:$16 sps:$4 sm:$0xff]   ;;  %v7379_v62 = vld [vmem:[%s8651_s22 + $0x544] ss:$16 sps:$4 sm:$0xff]  }
  0xe2   : > { %5112 = vmatprep.subr.bf16.mxu0 %v7295_v63  ;;  %5604 = vmatprep.subr.bf16.mxu1 %v7298_v0  ;;  %v7382_v63 = vld [vmem:[%s8651_s22 + $0x54c] ss:$16 sps:$4 sm:$0xff]   ;;  %v7377_v0 = vld [vmem:[%s8651_s22 + $0x540] ss:$16 sps:$4 sm:$0xff]  }
  0xe5   : > { %5113 = vmatpush1.bf16.msra.mxu0 %v7293_v1  ;;  %5605 = vmatpush1.bf16.msra.mxu1 %v7296_v2  ;;  %v7380_v1 = vld [vmem:[%s8651_s22 + $0x548] ss:$16 sps:$4 sm:$0xff]   ;;  %v7385_v2 = vld [vmem:[%s8651_s22 + $0x564] ss:$16 sps:$4 sm:$0xff]  }
  0xe6   : > { %5114 = vmatprep.subr.bf16.mxu0 %v7301_v3  ;;  %5606 = vmatprep.subr.bf16.mxu1 %v7304_v4  ;;  %v7388_v3 = vld [vmem:[%s8651_s22 + $0x56c] ss:$16 sps:$4 sm:$0xff]   ;;  %v7383_v4 = vld [vmem:[%s8651_s22 + $0x560] ss:$16 sps:$4 sm:$0xff]  }
  0xe9   : > { %5115 = vmatpush1.bf16.msra.mxu0 %v7299_v5  ;;  %5607 = vmatpush1.bf16.msra.mxu1 %v7302_v6  ;;  %v7386_v5 = vld [vmem:[%s8651_s22 + $0x568] ss:$16 sps:$4 sm:$0xff]   ;;  %v7391_v6 = vld [vmem:[%s8651_s22 + $0x584] ss:$16 sps:$4 sm:$0xff]  }
  0xea   : > { %5116 = vmatprep.subr.bf16.mxu0 %v7307_v7  ;;  %5608 = vmatprep.subr.bf16.mxu1 %v7310_v8  ;;  %v7394_v7 = vld [vmem:[%s8651_s22 + $0x58c] ss:$16 sps:$4 sm:$0xff]   ;;  %v7389_v8 = vld [vmem:[%s8651_s22 + $0x580] ss:$16 sps:$4 sm:$0xff]  }
  0xed   : > { %5117 = vmatpush1.bf16.msra.mxu0 %v7305_v10  ;;  %5609 = vmatpush1.bf16.msra.mxu1 %v7308_v11  ;;  %v7397_v10 = vld [vmem:[%s8651_s22 + $0x5a4] ss:$16 sps:$4 sm:$0xff]   ;;  %v7400_v11 = vld [vmem:[%s8651_s22 + $0x5ac] ss:$16 sps:$4 sm:$0xff]  }
  0xee   : > { %5118 = vmatprep.subr.bf16.mxu0 %v7313_v12  ;;  %5610 = vmatprep.subr.bf16.mxu1 %v7316_v14  ;;  %v7395_v12 = vld [vmem:[%s8651_s22 + $0x5a0] ss:$16 sps:$4 sm:$0xff]   ;;  %v7398_v14 = vld [vmem:[%s8651_s22 + $0x5a8] ss:$16 sps:$4 sm:$0xff]  }
  0xf1   : > { %5119 = vmatpush1.bf16.msra.mxu0 %v7311_v16  ;;  %5611 = vmatpush1.bf16.msra.mxu1 %v7314_v52  ;;  %v7403_v16 = vld [vmem:[%s8651_s22 + $0x5c4] ss:$16 sps:$4 sm:$0xff]   ;;  %v7406_v52 = vld [vmem:[%s8651_s22 + $0x5cc] ss:$16 sps:$4 sm:$0xff]  }
  0xf2   : > { %5129 = vmatprep.subr.bf16.mxu0 %v7319_v17  ;;  %5621 = vmatprep.subr.bf16.mxu1 %v7322_v18  ;;  %v7401_v17 = vld [vmem:[%s8651_s22 + $0x5c0] ss:$16 sps:$4 sm:$0xff]   ;;  %v7404_v18 = vld [vmem:[%s8651_s22 + $0x5c8] ss:$16 sps:$4 sm:$0xff]  }
  0xf4   : > { %5121 = vmatmul.mubr.bf16.vlgmr.msra.gmra.mrb[0].mxu0 %v1081_v21  ;;  %5613 = vmatmul.mubr.bf16.vlgmr.msra.gmra.mrb[0].mxu1 %v1081_v21  ;;  %v7407_v21 = vld [vmem:[%s8651_s22 + $0x5e0] ss:$16 sps:$4 sm:$0xff]  }
  0xf5   : > { %5130 = vmatpush1.bf16.msra.mxu0 %v7317_v20  ;;  %5622 = vmatpush1.bf16.msra.mxu1 %v7320_v22  ;;  %v7412_v20 = vld [vmem:[%s8651_s22 + $0x5ec] ss:$16 sps:$4 sm:$0xff]   ;;  %v7410_v22 = vld [vmem:[%s8651_s22 + $0x5e8] ss:$16 sps:$4 sm:$0xff]  }
  0xf6   : > { %5131 = vmatprep.subr.bf16.mxu0 %v7325_v23  ;;  %5623 = vmatprep.subr.bf16.mxu1 %v7328_v24  ;;  %v7416_v23 = vld [vmem:[%s8651_s22 + $0x604] ss:$16 sps:$4 sm:$0xff]   ;;  %v7419_v24 = vld [vmem:[%s8651_s22 + $0x60c] ss:$16 sps:$4 sm:$0xff]  }
  0xf7   : > { %5161 = vmatprep.mubr.bf16.mxu0 %v8816_v25  ;;  %5653 = vmatprep.mubr.bf16.mxu1 %v8816_v25 }
  0xf9   : > { %5132 = vmatpush1.bf16.msra.mxu0 %v7323_v26  ;;  %5624 = vmatpush1.bf16.msra.mxu1 %v7326_v13  ;;  %v7414_v26 = vld [vmem:[%s8651_s22 + $0x600] ss:$16 sps:$4 sm:$0xff]   ;;  %v8883_v13 = vrot.slane %v8801_v15, %v8704_v49 }
  0xfa   : > { %5133 = vmatprep.subr.bf16.mxu0 %v7331_v27  ;;  %5625 = vmatprep.subr.bf16.mxu1 %v7334_v28  ;;  %v7417_v27 = vld [vmem:[%s8651_s22 + $0x608] ss:$16 sps:$4 sm:$0xff]   ;;  %v7422_v28 = vld [vmem:[%s8651_s22 + $0x624] ss:$16 sps:$4 sm:$0xff]   ;;  %v7420_v15 = vld [vmem:[%s8651_s22 + $0x620] ss:$16 sps:$4 sm:$0xff]  }
  0xfd   : > { %5134 = vmatpush1.bf16.msra.mxu0 %v7329_v29  ;;  %5626 = vmatpush1.bf16.msra.mxu1 %v7332_v30  ;;  %v7425_v29 = vld [vmem:[%s8651_s22 + $0x62c] ss:$16 sps:$4 sm:$0xff]   ;;  %v1084_v30 = vcombine.high %v8816_v25, %v8816_v25  ;;  %v7426_v25 = vld [vmem:[%s8651_s22 + $0x640] ss:$16 sps:$4 sm:$0xff]  }
  0xfe   : > { %5135 = vmatprep.subr.bf16.mxu0 %v7337_v31  ;;  %5627 = vmatprep.subr.bf16.mxu1 %v7340_v32  ;;  %v7423_v31 = vld [vmem:[%s8651_s22 + $0x628] ss:$16 sps:$4 sm:$0xff]   ;;  %v7428_v32 = vld [vmem:[%s8651_s22 + $0x644] ss:$16 sps:$4 sm:$0xff]  }
 0x101   : > { %5136 = vmatpush1.bf16.msra.mxu0 %v7335_v33  ;;  %5628 = vmatpush1.bf16.msra.mxu1 %v7338_v34  ;;  %v7431_v33 = vld [vmem:[%s8651_s22 + $0x64c] ss:$16 sps:$4 sm:$0xff]   ;;  %v7429_v34 = vld [vmem:[%s8651_s22 + $0x648] ss:$16 sps:$4 sm:$0xff]  }
 0x102   : > { %5137 = vmatprep.subr.bf16.mxu0 %v7343_v35  ;;  %5629 = vmatprep.subr.bf16.mxu1 %v7346_v36  ;;  %v7434_v35 = vld [vmem:[%s8651_s22 + $0x664] ss:$16 sps:$4 sm:$0xff]   ;;  %v7437_v36 = vld [vmem:[%s8651_s22 + $0x66c] ss:$16 sps:$4 sm:$0xff]  }
 0x105   : > { %5138 = vmatpush1.bf16.msra.mxu0 %v7341_v37  ;;  %5630 = vmatpush1.bf16.msra.mxu1 %v7344_v38  ;;  %v7432_v37 = vld [vmem:[%s8651_s22 + $0x660] ss:$16 sps:$4 sm:$0xff]   ;;  %v7435_v38 = vld [vmem:[%s8651_s22 + $0x668] ss:$16 sps:$4 sm:$0xff]  }
 0x106   : > { %5139 = vmatprep.subr.bf16.mxu0 %v7349_v39  ;;  %5631 = vmatprep.subr.bf16.mxu1 %v7352_v40  ;;  %v7440_v39 = vld [vmem:[%s8651_s22 + $0x684] ss:$16 sps:$4 sm:$0xff]   ;;  %v7443_v40 = vld [vmem:[%s8651_s22 + $0x68c] ss:$16 sps:$4 sm:$0xff]  }
 0x109   : > { %5140 = vmatpush1.bf16.msra.mxu0 %v7347_v41  ;;  %5632 = vmatpush1.bf16.msra.mxu1 %v7350_v43  ;;  %v7438_v41 = vld [vmem:[%s8651_s22 + $0x680] ss:$16 sps:$4 sm:$0xff]   ;;  %v7441_v43 = vld [vmem:[%s8651_s22 + $0x688] ss:$16 sps:$4 sm:$0xff]  }
 0x10a   : > { %5141 = vmatprep.subr.bf16.mxu0 %v7355_v44  ;;  %5633 = vmatprep.subr.bf16.mxu1 %v7358_v45  ;;  %v7446_v44 = vld [vmem:[%s8651_s22 + $0x6a4] ss:$16 sps:$4 sm:$0xff]   ;;  %v7449_v45 = vld [vmem:[%s8651_s22 + $0x6ac] ss:$16 sps:$4 sm:$0xff]  }
 0x10d   : > { %5142 = vmatpush1.bf16.msra.mxu0 %v7353_v46  ;;  %5634 = vmatpush1.bf16.msra.mxu1 %v7356_v47  ;;  %v7444_v46 = vld [vmem:[%s8651_s22 + $0x6a0] ss:$16 sps:$4 sm:$0xff]   ;;  %v7447_v47 = vld [vmem:[%s8651_s22 + $0x6a8] ss:$16 sps:$4 sm:$0xff]  }
 0x10e   : > { %5143 = vmatprep.subr.bf16.mxu0 %v7361_v48  ;;  %5635 = vmatprep.subr.bf16.mxu1 %v7364_v50  ;;  %v7452_v48 = vld [vmem:[%s8651_s22 + $0x6c4] ss:$16 sps:$4 sm:$0xff]   ;;  %v7455_v50 = vld [vmem:[%s8651_s22 + $0x6cc] ss:$16 sps:$4 sm:$0xff]  }
 0x111   : > { %5144 = vmatpush1.bf16.msra.mxu0 %v7359_v51  ;;  %5636 = vmatpush1.bf16.msra.mxu1 %v7362_v53  ;;  %v7450_v51 = vld [vmem:[%s8651_s22 + $0x6c0] ss:$16 sps:$4 sm:$0xff]   ;;  %v7453_v53 = vld [vmem:[%s8651_s22 + $0x6c8] ss:$16 sps:$4 sm:$0xff]  }
 0x112   : > { %5145 = vmatprep.subr.bf16.mxu0 %v7367_v54  ;;  %5637 = vmatprep.subr.bf16.mxu1 %v7370_v55  ;;  %v7458_v54 = vld [vmem:[%s8651_s22 + $0x6e4] ss:$16 sps:$4 sm:$0xff]   ;;  %v7461_v55 = vld [vmem:[%s8651_s22 + $0x6ec] ss:$16 sps:$4 sm:$0xff]  }
 0x115   : > { %5146 = vmatpush1.bf16.msra.mxu0 %v7365_v56  ;;  %5638 = vmatpush1.bf16.msra.mxu1 %v7368_v57  ;;  %v7456_v56 = vld [vmem:[%s8651_s22 + $0x6e0] ss:$16 sps:$4 sm:$0xff]   ;;  %v7459_v57 = vld [vmem:[%s8651_s22 + $0x6e8] ss:$16 sps:$4 sm:$0xff]  }
 0x116   : > { %5147 = vmatprep.subr.bf16.mxu0 %v7373_v58  ;;  %5639 = vmatprep.subr.bf16.mxu1 %v7376_v59  ;;  %v7464_v58 = vld [vmem:[%s8651_s22 + $0x704] ss:$16 sps:$4 sm:$0xff]   ;;  %v7467_v59 = vld [vmem:[%s8651_s22 + $0x70c] ss:$16 sps:$4 sm:$0xff]  }
 0x119   : > { %5148 = vmatpush1.bf16.msra.mxu0 %v7371_v60  ;;  %5640 = vmatpush1.bf16.msra.mxu1 %v7374_v61  ;;  %v7462_v60 = vld [vmem:[%s8651_s22 + $0x700] ss:$16 sps:$4 sm:$0xff]   ;;  %v7465_v61 = vld [vmem:[%s8651_s22 + $0x708] ss:$16 sps:$4 sm:$0xff]  }
 0x11a   : > { %5149 = vmatprep.subr.bf16.mxu0 %v7379_v62  ;;  %5641 = vmatprep.subr.bf16.mxu1 %v7382_v63  ;;  %v7470_v62 = vld [vmem:[%s8651_s22 + $0x724] ss:$16 sps:$4 sm:$0xff]   ;;  %v7473_v63 = vld [vmem:[%s8651_s22 + $0x72c] ss:$16 sps:$4 sm:$0xff]  }
 0x11d   : > { %5150 = vmatpush1.bf16.msra.mxu0 %v7377_v0  ;;  %5642 = vmatpush1.bf16.msra.mxu1 %v7380_v1  ;;  %v7468_v0 = vld [vmem:[%s8651_s22 + $0x720] ss:$16 sps:$4 sm:$0xff]   ;;  %v7471_v1 = vld [vmem:[%s8651_s22 + $0x728] ss:$16 sps:$4 sm:$0xff]  }
 0x11e   : > { %5151 = vmatprep.subr.bf16.mxu0 %v7385_v2  ;;  %5643 = vmatprep.subr.bf16.mxu1 %v7388_v3  ;;  %v7476_v2 = vld [vmem:[%s8651_s22 + $0x744] ss:$16 sps:$4 sm:$0xff]   ;;  %v7479_v3 = vld [vmem:[%s8651_s22 + $0x74c] ss:$16 sps:$4 sm:$0xff]  }
 0x121   : > { %5152 = vmatpush1.bf16.msra.mxu0 %v7383_v4  ;;  %5644 = vmatpush1.bf16.msra.mxu1 %v7386_v5  ;;  %v7474_v4 = vld [vmem:[%s8651_s22 + $0x740] ss:$16 sps:$4 sm:$0xff]   ;;  %v7477_v5 = vld [vmem:[%s8651_s22 + $0x748] ss:$16 sps:$4 sm:$0xff]  }
 0x122   : > { %5153 = vmatprep.subr.bf16.mxu0 %v7391_v6  ;;  %5645 = vmatprep.subr.bf16.mxu1 %v7394_v7  ;;  %v7482_v6 = vld [vmem:[%s8651_s22 + $0x764] ss:$16 sps:$4 sm:$0xff]   ;;  %v7485_v7 = vld [vmem:[%s8651_s22 + $0x76c] ss:$16 sps:$4 sm:$0xff]  }
 0x125   : > { %5154 = vmatpush1.bf16.msra.mxu0 %v7389_v8  ;;  %5646 = vmatpush1.bf16.msra.mxu1 %v7392_v9  ;;  %v7480_v8 = vld [vmem:[%s8651_s22 + $0x760] ss:$16 sps:$4 sm:$0xff]   ;;  %v7483_v9 = vld [vmem:[%s8651_s22 + $0x768] ss:$16 sps:$4 sm:$0xff]  }
 0x126   : > { %5155 = vmatprep.subr.bf16.mxu0 %v7397_v10  ;;  %5647 = vmatprep.subr.bf16.mxu1 %v7400_v11  ;;  %v7488_v10 = vld [vmem:[%s8651_s22 + $0x784] ss:$16 sps:$4 sm:$0xff]   ;;  %v7491_v11 = vld [vmem:[%s8651_s22 + $0x78c] ss:$16 sps:$4 sm:$0xff]  }
 0x129   : > { %5156 = vmatpush1.bf16.msra.mxu0 %v7395_v12  ;;  %5648 = vmatpush1.bf16.msra.mxu1 %v7398_v14  ;;  %v7486_v12 = vld [vmem:[%s8651_s22 + $0x780] ss:$16 sps:$4 sm:$0xff]   ;;  %v7489_v14 = vld [vmem:[%s8651_s22 + $0x788] ss:$16 sps:$4 sm:$0xff]  }
 0x12a   : > { %5157 = vmatprep.subr.bf16.mxu0 %v7403_v16  ;;  %5649 = vmatprep.subr.bf16.mxu1 %v7406_v52  ;;  %v7494_v16 = vld [vmem:[%s8651_s22 + $0x7a4] ss:$16 sps:$4 sm:$0xff]   ;;  %v7497_v52 = vld [vmem:[%s8651_s22 + $0x7ac] ss:$16 sps:$4 sm:$0xff]  }
 0x12d   : > { %5158 = vmatpush1.bf16.msra.mxu0 %v7401_v17  ;;  %5650 = vmatpush1.bf16.msra.mxu1 %v7404_v18  ;;  %v7492_v17 = vld [vmem:[%s8651_s22 + $0x7a0] ss:$16 sps:$4 sm:$0xff]   ;;  %v7495_v18 = vld [vmem:[%s8651_s22 + $0x7a8] ss:$16 sps:$4 sm:$0xff]  }
 0x12e   : > { %5159 = vmatprep.subr.bf16.mxu0 %v7409_v19  ;;  %5651 = vmatprep.subr.bf16.mxu1 %v7412_v20  ;;  %v7500_v19 = vld [vmem:[%s8651_s22 + $0x7c4] ss:$16 sps:$4 sm:$0xff]   ;;  %v7503_v20 = vld [vmem:[%s8651_s22 + $0x7cc] ss:$16 sps:$4 sm:$0xff]  }
 0x131   : > { %5160 = vmatpush1.bf16.msra.mxu0 %v7407_v21  ;;  %5652 = vmatpush1.bf16.msra.mxu1 %v7410_v22  ;;  %v8944_v21 = vld.sshfl [vmem:[#allocation2 + $0x8] sm:$0xff pattern:$0x75316420] }
 0x132   : > { %5170 = vmatprep.subr.bf16.mxu0 %v7416_v23  ;;  %5662 = vmatprep.subr.bf16.mxu1 %v7419_v24  ;;  %v7498_v22 = vld [vmem:[%s8651_s22 + $0x7c0] ss:$16 sps:$4 sm:$0xff]   ;;  %v7501_v23 = vld [vmem:[%s8651_s22 + $0x7c8] ss:$16 sps:$4 sm:$0xff]   ;;  %v7506_v24 = vld [vmem:[%s8651_s22 + $0x7e4] ss:$16 sps:$4 sm:$0xff]  }
 0x134   : > { %5162 = vmatmul.mubr.bf16.vlgmr.msra.gmra.mrb[0].mxu0 %v8883_v13  ;;  %5654 = vmatmul.mubr.bf16.vlgmr.msra.gmra.mrb[0].mxu1 %v8883_v13 }
 0x135   : > { %5171 = vmatpush1.bf16.msra.mxu0 %v7414_v26  ;;  %5663 = vmatpush1.bf16.msra.mxu1 %v7417_v27  ;;  %v7509_v26 = vld [vmem:[%s8651_s22 + $0x7ec] ss:$16 sps:$4 sm:$0xff]   ;;  %v7504_v27 = vld [vmem:[%s8651_s22 + $0x7e0] ss:$16 sps:$4 sm:$0xff]  }
 0x136   : > { %5172 = vmatprep.subr.bf16.mxu0 %v7422_v28  ;;  %5664 = vmatprep.subr.bf16.mxu1 %v7425_v29  ;;  %v7507_v28 = vld [vmem:[%s8651_s22 + $0x7e8] ss:$16 sps:$4 sm:$0xff]   ;;  %v7512_v29 = vld [vmem:[%s8651_s22 + $0x804] ss:$16 sps:$4 sm:$0xff]  }
 0x137   : > { %5202 = vmatprep.mubr.bf16.mxu0 %v1084_v30  ;;  %5694 = vmatprep.mubr.bf16.mxu1 %v1084_v30  ;;  %v7515_v30 = vld [vmem:[%s8651_s22 + $0x80c] ss:$16 sps:$4 sm:$0xff]  }
 0x139   : > { %5173 = vmatpush1.bf16.msra.mxu0 %v7420_v15  ;;  %5665 = vmatpush1.bf16.msra.mxu1 %v7423_v31  ;;  %v1100_v15 = vcombine.high %v8944_v21, %v8944_v21  ;;  %v1082_v31 = vcombine.high %v8883_v13, %v8883_v13  ;;  %v7516_v13 = vld [vmem:[%s8651_s22 + $0x820] ss:$16 sps:$4 sm:$0xff]  }
 0x13a   : > { %5174 = vmatprep.subr.bf16.mxu0 %v7428_v32  ;;  %5666 = vmatprep.subr.bf16.mxu1 %v7431_v33  ;;  %v7510_v32 = vld [vmem:[%s8651_s22 + $0x800] ss:$16 sps:$4 sm:$0xff]   ;;  %v7513_v33 = vld [vmem:[%s8651_s22 + $0x808] ss:$16 sps:$4 sm:$0xff]  }
 0x13d   : > { %5175 = vmatpush1.bf16.msra.mxu0 %v7426_v25  ;;  %5667 = vmatpush1.bf16.msra.mxu1 %v7429_v34  ;;  %v7518_v25 = vld [vmem:[%s8651_s22 + $0x824] ss:$16 sps:$4 sm:$0xff]   ;;  %v7521_v34 = vld [vmem:[%s8651_s22 + $0x82c] ss:$16 sps:$4 sm:$0xff]  }
 0x13e   : > { %5176 = vmatprep.subr.bf16.mxu0 %v7434_v35  ;;  %5668 = vmatprep.subr.bf16.mxu1 %v7437_v36  ;;  %v8963_v35 = vrot.slane %v1100_v15, %v8704_v49  ;;  %v7519_v36 = vld [vmem:[%s8651_s22 + $0x828] ss:$16 sps:$4 sm:$0xff]   ;;  %v7602_v15 = vld [vmem:[%s8651_s22 + $0x9e4] ss:$16 sps:$4 sm:$0xff]  }
 0x141   : > { %5177 = vmatpush1.bf16.msra.mxu0 %v7432_v37  ;;  %5669 = vmatpush1.bf16.msra.mxu1 %v7435_v38  ;;  %v7524_v37 = vld [vmem:[%s8651_s22 + $0x844] ss:$16 sps:$4 sm:$0xff]   ;;  %v7527_v38 = vld [vmem:[%s8651_s22 + $0x84c] ss:$16 sps:$4 sm:$0xff]  }
 0x142   : > { %5178 = vmatprep.subr.bf16.mxu0 %v7440_v39  ;;  %5670 = vmatprep.subr.bf16.mxu1 %v7443_v40  ;;  %v7522_v39 = vld [vmem:[%s8651_s22 + $0x840] ss:$16 sps:$4 sm:$0xff]   ;;  %v7525_v40 = vld [vmem:[%s8651_s22 + $0x848] ss:$16 sps:$4 sm:$0xff]  }
 0x145   : > { %5179 = vmatpush1.bf16.msra.mxu0 %v7438_v41  ;;  %5671 = vmatpush1.bf16.msra.mxu1 %v7441_v43  ;;  %v7530_v41 = vld [vmem:[%s8651_s22 + $0x864] ss:$16 sps:$4 sm:$0xff]   ;;  %v7533_v43 = vld [vmem:[%s8651_s22 + $0x86c] ss:$16 sps:$4 sm:$0xff]  }
 0x146   : > { %5180 = vmatprep.subr.bf16.mxu0 %v7446_v44  ;;  %5672 = vmatprep.subr.bf16.mxu1 %v7449_v45  ;;  %v7528_v44 = vld [vmem:[%s8651_s22 + $0x860] ss:$16 sps:$4 sm:$0xff]   ;;  %v7531_v45 = vld [vmem:[%s8651_s22 + $0x868] ss:$16 sps:$4 sm:$0xff]  }
 0x149   : > { %5181 = vmatpush1.bf16.msra.mxu0 %v7444_v46  ;;  %5673 = vmatpush1.bf16.msra.mxu1 %v7447_v47  ;;  %v7536_v46 = vld [vmem:[%s8651_s22 + $0x884] ss:$16 sps:$4 sm:$0xff]   ;;  %v7539_v47 = vld [vmem:[%s8651_s22 + $0x88c] ss:$16 sps:$4 sm:$0xff]  }
 0x14a   : > { %5182 = vmatprep.subr.bf16.mxu0 %v7452_v48  ;;  %5674 = vmatprep.subr.bf16.mxu1 %v7455_v50  ;;  %v7534_v48 = vld [vmem:[%s8651_s22 + $0x880] ss:$16 sps:$4 sm:$0xff]   ;;  %v7537_v50 = vld [vmem:[%s8651_s22 + $0x888] ss:$16 sps:$4 sm:$0xff]  }
 0x14d   : > { %5183 = vmatpush1.bf16.msra.mxu0 %v7450_v51  ;;  %5675 = vmatpush1.bf16.msra.mxu1 %v7453_v53  ;;  %v7542_v51 = vld [vmem:[%s8651_s22 + $0x8a4] ss:$16 sps:$4 sm:$0xff]   ;;  %v7545_v53 = vld [vmem:[%s8651_s22 + $0x8ac] ss:$16 sps:$4 sm:$0xff]  }
 0x14e   : > { %5184 = vmatprep.subr.bf16.mxu0 %v7458_v54  ;;  %5676 = vmatprep.subr.bf16.mxu1 %v7461_v55  ;;  %v7540_v54 = vld [vmem:[%s8651_s22 + $0x8a0] ss:$16 sps:$4 sm:$0xff]   ;;  %v7543_v55 = vld [vmem:[%s8651_s22 + $0x8a8] ss:$16 sps:$4 sm:$0xff]  }
 0x151   : > { %5185 = vmatpush1.bf16.msra.mxu0 %v7456_v56  ;;  %5677 = vmatpush1.bf16.msra.mxu1 %v7459_v57  ;;  %v7548_v56 = vld [vmem:[%s8651_s22 + $0x8c4] ss:$16 sps:$4 sm:$0xff]   ;;  %v7551_v57 = vld [vmem:[%s8651_s22 + $0x8cc] ss:$16 sps:$4 sm:$0xff]  }
 0x152   : > { %5186 = vmatprep.subr.bf16.mxu0 %v7464_v58  ;;  %5678 = vmatprep.subr.bf16.mxu1 %v7467_v59  ;;  %v7546_v58 = vld [vmem:[%s8651_s22 + $0x8c0] ss:$16 sps:$4 sm:$0xff]   ;;  %v7549_v59 = vld [vmem:[%s8651_s22 + $0x8c8] ss:$16 sps:$4 sm:$0xff]  }
 0x155   : > { %5187 = vmatpush1.bf16.msra.mxu0 %v7462_v60  ;;  %5679 = vmatpush1.bf16.msra.mxu1 %v7465_v61  ;;  %v7554_v60 = vld [vmem:[%s8651_s22 + $0x8e4] ss:$16 sps:$4 sm:$0xff]   ;;  %v7557_v61 = vld [vmem:[%s8651_s22 + $0x8ec] ss:$16 sps:$4 sm:$0xff]  }
 0x156   : > { %5188 = vmatprep.subr.bf16.mxu0 %v7470_v62  ;;  %5680 = vmatprep.subr.bf16.mxu1 %v7473_v63  ;;  %v7552_v62 = vld [vmem:[%s8651_s22 + $0x8e0] ss:$16 sps:$4 sm:$0xff]   ;;  %v7555_v63 = vld [vmem:[%s8651_s22 + $0x8e8] ss:$16 sps:$4 sm:$0xff]  }
 0x159   : > { %5189 = vmatpush1.bf16.msra.mxu0 %v7468_v0  ;;  %5681 = vmatpush1.bf16.msra.mxu1 %v7471_v1  ;;  %v7560_v0 = vld [vmem:[%s8651_s22 + $0x904] ss:$16 sps:$4 sm:$0xff]   ;;  %v7563_v1 = vld [vmem:[%s8651_s22 + $0x90c] ss:$16 sps:$4 sm:$0xff]  }
 0x15a   : > { %5190 = vmatprep.subr.bf16.mxu0 %v7476_v2  ;;  %5682 = vmatprep.subr.bf16.mxu1 %v7479_v3  ;;  %v7558_v2 = vld [vmem:[%s8651_s22 + $0x900] ss:$16 sps:$4 sm:$0xff]   ;;  %v7561_v3 = vld [vmem:[%s8651_s22 + $0x908] ss:$16 sps:$4 sm:$0xff]  }
 0x15d   : > { %5191 = vmatpush1.bf16.msra.mxu0 %v7474_v4  ;;  %5683 = vmatpush1.bf16.msra.mxu1 %v7477_v5  ;;  %v7566_v4 = vld [vmem:[%s8651_s22 + $0x924] ss:$16 sps:$4 sm:$0xff]   ;;  %v7569_v5 = vld [vmem:[%s8651_s22 + $0x92c] ss:$16 sps:$4 sm:$0xff]  }
 0x15e   : > { %5192 = vmatprep.subr.bf16.mxu0 %v7482_v6  ;;  %5684 = vmatprep.subr.bf16.mxu1 %v7485_v7  ;;  %v7564_v6 = vld [vmem:[%s8651_s22 + $0x920] ss:$16 sps:$4 sm:$0xff]   ;;  %v7567_v7 = vld [vmem:[%s8651_s22 + $0x928] ss:$16 sps:$4 sm:$0xff]  }
 0x161   : > { %5193 = vmatpush1.bf16.msra.mxu0 %v7480_v8  ;;  %5685 = vmatpush1.bf16.msra.mxu1 %v7483_v9  ;;  %v7572_v8 = vld [vmem:[%s8651_s22 + $0x944] ss:$16 sps:$4 sm:$0xff]   ;;  %v7575_v9 = vld [vmem:[%s8651_s22 + $0x94c] ss:$16 sps:$4 sm:$0xff]  }
 0x162   : > { %5194 = vmatprep.subr.bf16.mxu0 %v7488_v10  ;;  %5686 = vmatprep.subr.bf16.mxu1 %v7491_v11  ;;  %v7570_v10 = vld [vmem:[%s8651_s22 + $0x940] ss:$16 sps:$4 sm:$0xff]   ;;  %v7573_v11 = vld [vmem:[%s8651_s22 + $0x948] ss:$16 sps:$4 sm:$0xff]  }
 0x165   : > { %5195 = vmatpush1.bf16.msra.mxu0 %v7486_v12  ;;  %5687 = vmatpush1.bf16.msra.mxu1 %v7489_v14  ;;  %v7578_v12 = vld [vmem:[%s8651_s22 + $0x964] ss:$16 sps:$4 sm:$0xff]   ;;  %v7581_v14 = vld [vmem:[%s8651_s22 + $0x96c] ss:$16 sps:$4 sm:$0xff]  }
 0x166   : > { %5196 = vmatprep.subr.bf16.mxu0 %v7494_v16  ;;  %5688 = vmatprep.subr.bf16.mxu1 %v7497_v52  ;;  %v7576_v16 = vld [vmem:[%s8651_s22 + $0x960] ss:$16 sps:$4 sm:$0xff]   ;;  %v7579_v52 = vld [vmem:[%s8651_s22 + $0x968] ss:$16 sps:$4 sm:$0xff]  }
 0x169   : > { %5197 = vmatpush1.bf16.msra.mxu0 %v7492_v17  ;;  %5689 = vmatpush1.bf16.msra.mxu1 %v7495_v18  ;;  %v7584_v17 = vld [vmem:[%s8651_s22 + $0x984] ss:$16 sps:$4 sm:$0xff]   ;;  %v7587_v18 = vld [vmem:[%s8651_s22 + $0x98c] ss:$16 sps:$4 sm:$0xff]  }
 0x16a   : > { %5198 = vmatprep.subr.bf16.mxu0 %v7500_v19  ;;  %5690 = vmatprep.subr.bf16.mxu1 %v7503_v20  ;;  %v7582_v19 = vld [vmem:[%s8651_s22 + $0x980] ss:$16 sps:$4 sm:$0xff]   ;;  %v7585_v20 = vld [vmem:[%s8651_s22 + $0x988] ss:$16 sps:$4 sm:$0xff]  }
 0x16d   : > { %5199 = vmatpush1.bf16.msra.mxu0 %v7498_v22  ;;  %5691 = vmatpush1.bf16.msra.mxu1 %v7501_v23  ;;  %v7590_v22 = vld [vmem:[%s8651_s22 + $0x9a4] ss:$16 sps:$4 sm:$0xff]   ;;  %v7593_v23 = vld [vmem:[%s8651_s22 + $0x9ac] ss:$16 sps:$4 sm:$0xff]  }
 0x16e   : > { %5200 = vmatprep.subr.bf16.mxu0 %v7506_v24  ;;  %5692 = vmatprep.subr.bf16.mxu1 %v7509_v26  ;;  %v7588_v24 = vld [vmem:[%s8651_s22 + $0x9a0] ss:$16 sps:$4 sm:$0xff]   ;;  %v7591_v26 = vld [vmem:[%s8651_s22 + $0x9a8] ss:$16 sps:$4 sm:$0xff]  }
 0x171   : > { %5201 = vmatpush1.bf16.msra.mxu0 %v7504_v27  ;;  %5693 = vmatpush1.bf16.msra.mxu1 %v7507_v28  ;;  %v7596_v27 = vld [vmem:[%s8651_s22 + $0x9c4] ss:$16 sps:$4 sm:$0xff]   ;;  %v7599_v28 = vld [vmem:[%s8651_s22 + $0x9cc] ss:$16 sps:$4 sm:$0xff]  }
 0x172   : > { %5211 = vmatprep.subr.bf16.mxu0 %v7512_v29  ;;  %5703 = vmatprep.subr.bf16.mxu1 %v7515_v30  ;;  %v7594_v29 = vld [vmem:[%s8651_s22 + $0x9c0] ss:$16 sps:$4 sm:$0xff]   ;;  %v7597_v30 = vld [vmem:[%s8651_s22 + $0x9c8] ss:$16 sps:$4 sm:$0xff]  }
 0x174   : > { %5203 = vmatmul.mubr.bf16.vlgmr.msra.gmra.mrb[0].mxu0 %v1082_v31  ;;  %5695 = vmatmul.mubr.bf16.vlgmr.msra.gmra.mrb[0].mxu1 %v1082_v31  ;;  %v7605_v31 = vld [vmem:[%s8651_s22 + $0x9ec] ss:$16 sps:$4 sm:$0xff]  }
 0x175   : > { %5212 = vmatpush1.bf16.msra.mxu0 %v7510_v32  ;;  %5704 = vmatpush1.bf16.msra.mxu1 %v7513_v33  ;;  %v7600_v32 = vld [vmem:[%s8651_s22 + $0x9e0] ss:$16 sps:$4 sm:$0xff]   ;;  %v7603_v33 = vld [vmem:[%s8651_s22 + $0x9e8] ss:$16 sps:$4 sm:$0xff]  }
 0x176   : > { %5213 = vmatprep.subr.bf16.mxu0 %v7518_v25  ;;  %5705 = vmatprep.subr.bf16.mxu1 %v7521_v34  ;;  %v7608_v25 = vld [vmem:[%s8651_s22 + $0xa04] ss:$16 sps:$4 sm:$0xff]   ;;  %v7611_v34 = vld [vmem:[%s8651_s22 + $0xa0c] ss:$16 sps:$4 sm:$0xff]  }
 0x177   : > { %5243 = vmatprep.mubr.bf16.mxu0 %v8963_v35  ;;  %5735 = vmatprep.mubr.bf16.mxu1 %v8963_v35 }
 0x179   : > { %5214 = vmatpush1.bf16.msra.mxu0 %v7516_v13  ;;  %5706 = vmatpush1.bf16.msra.mxu1 %v7519_v36  ;;  %v9029_v13 = vrot.slane %v8944_v21, %v8704_v49  ;;  %v7606_v36 = vld [vmem:[%s8651_s22 + $0xa00] ss:$16 sps:$4 sm:$0xff]  }
 0x17a   : > { %5215 = vmatprep.subr.bf16.mxu0 %v7524_v37  ;;  %5707 = vmatprep.subr.bf16.mxu1 %v7527_v38  ;;  %v7609_v37 = vld [vmem:[%s8651_s22 + $0xa08] ss:$16 sps:$4 sm:$0xff]   ;;  %v7614_v38 = vld [vmem:[%s8651_s22 + $0xa24] ss:$16 sps:$4 sm:$0xff]   ;;  %v7612_v21 = vld [vmem:[%s8651_s22 + $0xa20] ss:$16 sps:$4 sm:$0xff]  }
 0x17d   : > { %5216 = vmatpush1.bf16.msra.mxu0 %v7522_v39  ;;  %5708 = vmatpush1.bf16.msra.mxu1 %v7525_v40  ;;  %v7617_v39 = vld [vmem:[%s8651_s22 + $0xa2c] ss:$16 sps:$4 sm:$0xff]   ;;  %v1132_v40 = vcombine.high %v8963_v35, %v8963_v35  ;;  %v7618_v35 = vld [vmem:[%s8651_s22 + $0xa40] ss:$16 sps:$4 sm:$0xff]  }
 0x17e   : > { %5217 = vmatprep.subr.bf16.mxu0 %v7530_v41  ;;  %5709 = vmatprep.subr.bf16.mxu1 %v7533_v43  ;;  %v7615_v41 = vld [vmem:[%s8651_s22 + $0xa28] ss:$16 sps:$4 sm:$0xff]   ;;  %v7620_v43 = vld [vmem:[%s8651_s22 + $0xa44] ss:$16 sps:$4 sm:$0xff]  }
 0x181   : > { %5218 = vmatpush1.bf16.msra.mxu0 %v7528_v44  ;;  %5710 = vmatpush1.bf16.msra.mxu1 %v7531_v45  ;;  %v7623_v44 = vld [vmem:[%s8651_s22 + $0xa4c] ss:$16 sps:$4 sm:$0xff]   ;;  %v7621_v45 = vld [vmem:[%s8651_s22 + $0xa48] ss:$16 sps:$4 sm:$0xff]  }
 0x182   : > { %5219 = vmatprep.subr.bf16.mxu0 %v7536_v46  ;;  %5711 = vmatprep.subr.bf16.mxu1 %v7539_v47  ;;  %v7626_v46 = vld [vmem:[%s8651_s22 + $0xa64] ss:$16 sps:$4 sm:$0xff]   ;;  %v7629_v47 = vld [vmem:[%s8651_s22 + $0xa6c] ss:$16 sps:$4 sm:$0xff]  }
 0x185   : > { %5220 = vmatpush1.bf16.msra.mxu0 %v7534_v48  ;;  %5712 = vmatpush1.bf16.msra.mxu1 %v7537_v50  ;;  %v7624_v48 = vld [vmem:[%s8651_s22 + $0xa60] ss:$16 sps:$4 sm:$0xff]   ;;  %v7627_v50 = vld [vmem:[%s8651_s22 + $0xa68] ss:$16 sps:$4 sm:$0xff]  }
 0x186   : > { %5221 = vmatprep.subr.bf16.mxu0 %v7542_v51  ;;  %5713 = vmatprep.subr.bf16.mxu1 %v7545_v53  ;;  %v7632_v51 = vld [vmem:[%s8651_s22 + $0xa84] ss:$16 sps:$4 sm:$0xff]   ;;  %v7635_v53 = vld [vmem:[%s8651_s22 + $0xa8c] ss:$16 sps:$4 sm:$0xff]  }
 0x189   : > { %5222 = vmatpush1.bf16.msra.mxu0 %v7540_v54  ;;  %5714 = vmatpush1.bf16.msra.mxu1 %v7543_v55  ;;  %v7630_v54 = vld [vmem:[%s8651_s22 + $0xa80] ss:$16 sps:$4 sm:$0xff]   ;;  %v7633_v55 = vld [vmem:[%s8651_s22 + $0xa88] ss:$16 sps:$4 sm:$0xff]  }
 0x18a   : > { %5223 = vmatprep.subr.bf16.mxu0 %v7548_v56  ;;  %5715 = vmatprep.subr.bf16.mxu1 %v7551_v57  ;;  %v7638_v56 = vld [vmem:[%s8651_s22 + $0xaa4] ss:$16 sps:$4 sm:$0xff]   ;;  %v7641_v57 = vld [vmem:[%s8651_s22 + $0xaac] ss:$16 sps:$4 sm:$0xff]  }
 0x18d   : > { %5224 = vmatpush1.bf16.msra.mxu0 %v7546_v58  ;;  %5716 = vmatpush1.bf16.msra.mxu1 %v7549_v59  ;;  %v7636_v58 = vld [vmem:[%s8651_s22 + $0xaa0] ss:$16 sps:$4 sm:$0xff]   ;;  %v7639_v59 = vld [vmem:[%s8651_s22 + $0xaa8] ss:$16 sps:$4 sm:$0xff]  }
 0x18e   : > { %5225 = vmatprep.subr.bf16.mxu0 %v7554_v60  ;;  %5717 = vmatprep.subr.bf16.mxu1 %v7557_v61  ;;  %v7644_v60 = vld [vmem:[%s8651_s22 + $0xac4] ss:$16 sps:$4 sm:$0xff]   ;;  %v7647_v61 = vld [vmem:[%s8651_s22 + $0xacc] ss:$16 sps:$4 sm:$0xff]  }
 0x191   : > { %5226 = vmatpush1.bf16.msra.mxu0 %v7552_v62  ;;  %5718 = vmatpush1.bf16.msra.mxu1 %v7555_v63  ;;  %v7642_v62 = vld [vmem:[%s8651_s22 + $0xac0] ss:$16 sps:$4 sm:$0xff]   ;;  %v7645_v63 = vld [vmem:[%s8651_s22 + $0xac8] ss:$16 sps:$4 sm:$0xff]  }
 0x192   : > { %5227 = vmatprep.subr.bf16.mxu0 %v7560_v0  ;;  %5719 = vmatprep.subr.bf16.mxu1 %v7563_v1  ;;  %v7650_v0 = vld [vmem:[%s8651_s22 + $0xae4] ss:$16 sps:$4 sm:$0xff]   ;;  %v7653_v1 = vld [vmem:[%s8651_s22 + $0xaec] ss:$16 sps:$4 sm:$0xff]  }
 0x195   : > { %5228 = vmatpush1.bf16.msra.mxu0 %v7558_v2  ;;  %5720 = vmatpush1.bf16.msra.mxu1 %v7561_v3  ;;  %v7648_v2 = vld [vmem:[%s8651_s22 + $0xae0] ss:$16 sps:$4 sm:$0xff]   ;;  %v7651_v3 = vld [vmem:[%s8651_s22 + $0xae8] ss:$16 sps:$4 sm:$0xff]  }
 0x196   : > { %5229 = vmatprep.subr.bf16.mxu0 %v7566_v4  ;;  %5721 = vmatprep.subr.bf16.mxu1 %v7569_v5  ;;  %v7656_v4 = vld [vmem:[%s8651_s22 + $0xb04] ss:$16 sps:$4 sm:$0xff]   ;;  %v7659_v5 = vld [vmem:[%s8651_s22 + $0xb0c] ss:$16 sps:$4 sm:$0xff]  }
 0x199   : > { %5230 = vmatpush1.bf16.msra.mxu0 %v7564_v6  ;;  %5722 = vmatpush1.bf16.msra.mxu1 %v7567_v7  ;;  %v7654_v6 = vld [vmem:[%s8651_s22 + $0xb00] ss:$16 sps:$4 sm:$0xff]   ;;  %v7657_v7 = vld [vmem:[%s8651_s22 + $0xb08] ss:$16 sps:$4 sm:$0xff]  }
 0x19a   : > { %5231 = vmatprep.subr.bf16.mxu0 %v7572_v8  ;;  %5723 = vmatprep.subr.bf16.mxu1 %v7575_v9  ;;  %v7662_v8 = vld [vmem:[%s8651_s22 + $0xb24] ss:$16 sps:$4 sm:$0xff]   ;;  %v7665_v9 = vld [vmem:[%s8651_s22 + $0xb2c] ss:$16 sps:$4 sm:$0xff]  }
 0x19d   : > { %5232 = vmatpush1.bf16.msra.mxu0 %v7570_v10  ;;  %5724 = vmatpush1.bf16.msra.mxu1 %v7573_v11  ;;  %v7660_v10 = vld [vmem:[%s8651_s22 + $0xb20] ss:$16 sps:$4 sm:$0xff]   ;;  %v7663_v11 = vld [vmem:[%s8651_s22 + $0xb28] ss:$16 sps:$4 sm:$0xff]  }
 0x19e   : > { %5233 = vmatprep.subr.bf16.mxu0 %v7578_v12  ;;  %5725 = vmatprep.subr.bf16.mxu1 %v7581_v14  ;;  %v7668_v12 = vld [vmem:[%s8651_s22 + $0xb44] ss:$16 sps:$4 sm:$0xff]   ;;  %v7671_v14 = vld [vmem:[%s8651_s22 + $0xb4c] ss:$16 sps:$4 sm:$0xff]  }
 0x1a1   : > { %5234 = vmatpush1.bf16.msra.mxu0 %v7576_v16  ;;  %5726 = vmatpush1.bf16.msra.mxu1 %v7579_v52  ;;  %v7666_v16 = vld [vmem:[%s8651_s22 + $0xb40] ss:$16 sps:$4 sm:$0xff]   ;;  %v7669_v52 = vld [vmem:[%s8651_s22 + $0xb48] ss:$16 sps:$4 sm:$0xff]  }
 0x1a2   : > { %5235 = vmatprep.subr.bf16.mxu0 %v7584_v17  ;;  %5727 = vmatprep.subr.bf16.mxu1 %v7587_v18  ;;  %v7674_v17 = vld [vmem:[%s8651_s22 + $0xb64] ss:$16 sps:$4 sm:$0xff]   ;;  %v7677_v18 = vld [vmem:[%s8651_s22 + $0xb6c] ss:$16 sps:$4 sm:$0xff]  }
 0x1a5   : > { %5236 = vmatpush1.bf16.msra.mxu0 %v7582_v19  ;;  %5728 = vmatpush1.bf16.msra.mxu1 %v7585_v20  ;;  %v7672_v19 = vld [vmem:[%s8651_s22 + $0xb60] ss:$16 sps:$4 sm:$0xff]   ;;  %v7675_v20 = vld [vmem:[%s8651_s22 + $0xb68] ss:$16 sps:$4 sm:$0xff]  }
 0x1a6   : > { %5237 = vmatprep.subr.bf16.mxu0 %v7590_v22  ;;  %5729 = vmatprep.subr.bf16.mxu1 %v7593_v23  ;;  %v7680_v22 = vld [vmem:[%s8651_s22 + $0xb84] ss:$16 sps:$4 sm:$0xff]   ;;  %v7683_v23 = vld [vmem:[%s8651_s22 + $0xb8c] ss:$16 sps:$4 sm:$0xff]  }
 0x1a9   : > { %5238 = vmatpush1.bf16.msra.mxu0 %v7588_v24  ;;  %5730 = vmatpush1.bf16.msra.mxu1 %v7591_v26  ;;  %v7678_v24 = vld [vmem:[%s8651_s22 + $0xb80] ss:$16 sps:$4 sm:$0xff]   ;;  %v7681_v26 = vld [vmem:[%s8651_s22 + $0xb88] ss:$16 sps:$4 sm:$0xff]  }
 0x1aa   : > { %5239 = vmatprep.subr.bf16.mxu0 %v7596_v27  ;;  %5731 = vmatprep.subr.bf16.mxu1 %v7599_v28  ;;  %v7686_v27 = vld [vmem:[%s8651_s22 + $0xba4] ss:$16 sps:$4 sm:$0xff]   ;;  %v7689_v28 = vld [vmem:[%s8651_s22 + $0xbac] ss:$16 sps:$4 sm:$0xff]  }
 0x1ad   : > { %5240 = vmatpush1.bf16.msra.mxu0 %v7594_v29  ;;  %5732 = vmatpush1.bf16.msra.mxu1 %v7597_v30  ;;  %v7684_v29 = vld [vmem:[%s8651_s22 + $0xba0] ss:$16 sps:$4 sm:$0xff]   ;;  %v7687_v30 = vld [vmem:[%s8651_s22 + $0xba8] ss:$16 sps:$4 sm:$0xff]  }
 0x1ae   : > { %5241 = vmatprep.subr.bf16.mxu0 %v7602_v15  ;;  %5733 = vmatprep.subr.bf16.mxu1 %v7605_v31  ;;  %v7692_v15 = vld [vmem:[%s8651_s22 + $0xbc4] ss:$16 sps:$4 sm:$0xff]   ;;  %v7695_v31 = vld [vmem:[%s8651_s22 + $0xbcc] ss:$16 sps:$4 sm:$0xff]  }
 0x1b1   : > { %5242 = vmatpush1.bf16.msra.mxu0 %v7600_v32  ;;  %5734 = vmatpush1.bf16.msra.mxu1 %v7603_v33  ;;  %v8280_v32 = vld [vmem:[#allocation2 + $0x8] sm:$0xff] }
 0x1b2   : > { %5252 = vmatprep.subr.bf16.mxu0 %v7608_v25  ;;  %5744 = vmatprep.subr.bf16.mxu1 %v7611_v34  ;;  %v1085_v33 = vcombine.high %v8280_v32, %v8280_v32  ;;  %v7690_v25 = vld [vmem:[%s8651_s22 + $0xbc0] ss:$16 sps:$4 sm:$0xff]   ;;  %v7693_v34 = vld [vmem:[%s8651_s22 + $0xbc8] ss:$16 sps:$4 sm:$0xff]  }
 0x1b3   : > { %v7774_v32 = vld [vmem:[%s8651_s22 + $0xd80] ss:$16 sps:$4 sm:$0xff]  }
 0x1b4   : > { %5244 = vmatmul.mubr.bf16.vlgmr.msra.gmra.mrb[0].mxu0 %v9029_v13  ;;  %5736 = vmatmul.mubr.bf16.vlgmr.msra.gmra.mrb[0].mxu1 %v9029_v13 }
 0x1b5   : > { %5253 = vmatpush1.bf16.msra.mxu0 %v7606_v36  ;;  %5745 = vmatpush1.bf16.msra.mxu1 %v7609_v37  ;;  %v7698_v36 = vld [vmem:[%s8651_s22 + $0xbe4] ss:$16 sps:$4 sm:$0xff]   ;;  %v7701_v37 = vld [vmem:[%s8651_s22 + $0xbec] ss:$16 sps:$4 sm:$0xff]  }
 0x1b6   : > { %5254 = vmatprep.subr.bf16.mxu0 %v7614_v38  ;;  %5746 = vmatprep.subr.bf16.mxu1 %v7617_v39  ;;  %v9096_v38 = vrot.slane %v1085_v33, %v8704_v49  ;;  %v7696_v39 = vld [vmem:[%s8651_s22 + $0xbe0] ss:$16 sps:$4 sm:$0xff]   ;;  %v7777_v33 = vld [vmem:[%s8651_s22 + $0xd88] ss:$16 sps:$4 sm:$0xff]  }
 0x1b7   : > { %5284 = vmatprep.mubr.bf16.mxu0 %v1132_v40  ;;  %5776 = vmatprep.mubr.bf16.mxu1 %v1132_v40  ;;  %v7699_v40 = vld [vmem:[%s8651_s22 + $0xbe8] ss:$16 sps:$4 sm:$0xff]  }
 0x1b9   : > { %5255 = vmatpush1.bf16.msra.mxu0 %v7612_v21  ;;  %5747 = vmatpush1.bf16.msra.mxu1 %v7615_v41  ;;  %v7704_v21 = vld [vmem:[%s8651_s22 + $0xc04] ss:$16 sps:$4 sm:$0xff]   ;;  %v7707_v41 = vld [vmem:[%s8651_s22 + $0xc0c] ss:$16 sps:$4 sm:$0xff]  }
 0x1ba   : > { %5256 = vmatprep.subr.bf16.mxu0 %v7620_v43  ;;  %5748 = vmatprep.subr.bf16.mxu1 %v7623_v44  ;;  %v1101_v43 = vcombine.high %v9096_v38, %v9096_v38  ;;  %v1130_v44 = vcombine.high %v9029_v13, %v9029_v13  ;;  %v7708_v13 = vld [vmem:[%s8651_s22 + $0xc20] ss:$16 sps:$4 sm:$0xff]  }
 0x1bd   : > { %5257 = vmatpush1.bf16.msra.mxu0 %v7618_v35  ;;  %5749 = vmatpush1.bf16.msra.mxu1 %v7621_v45  ;;  %v7702_v35 = vld [vmem:[%s8651_s22 + $0xc00] ss:$16 sps:$4 sm:$0xff]   ;;  %v7705_v45 = vld [vmem:[%s8651_s22 + $0xc08] ss:$16 sps:$4 sm:$0xff]  }
 0x1be   : > { %5258 = vmatprep.subr.bf16.mxu0 %v7626_v46  ;;  %5750 = vmatprep.subr.bf16.mxu1 %v7629_v47  ;;  %v7710_v46 = vld [vmem:[%s8651_s22 + $0xc24] ss:$16 sps:$4 sm:$0xff]   ;;  %v7713_v47 = vld [vmem:[%s8651_s22 + $0xc2c] ss:$16 sps:$4 sm:$0xff]  }
 0x1c1   : > { %5259 = vmatpush1.bf16.msra.mxu0 %v7624_v48  ;;  %5751 = vmatpush1.bf16.msra.mxu1 %v7627_v50  ;;  %v9111_v48 = vrot.slane %v1101_v43, %v8704_v49  ;;  %v7711_v50 = vld [vmem:[%s8651_s22 + $0xc28] ss:$16 sps:$4 sm:$0xff]   ;;  %v7794_v43 = vld [vmem:[%s8651_s22 + $0xde4] ss:$16 sps:$4 sm:$0xff]  }
 0x1c2   : > { %5260 = vmatprep.subr.bf16.mxu0 %v7632_v51  ;;  %5752 = vmatprep.subr.bf16.mxu1 %v7635_v53  ;;  %v7716_v51 = vld [vmem:[%s8651_s22 + $0xc44] ss:$16 sps:$4 sm:$0xff]   ;;  %v7719_v53 = vld [vmem:[%s8651_s22 + $0xc4c] ss:$16 sps:$4 sm:$0xff]  }
 0x1c5   : > { %5261 = vmatpush1.bf16.msra.mxu0 %v7630_v54  ;;  %5753 = vmatpush1.bf16.msra.mxu1 %v7633_v55  ;;  %v7714_v54 = vld [vmem:[%s8651_s22 + $0xc40] ss:$16 sps:$4 sm:$0xff]   ;;  %v7717_v55 = vld [vmem:[%s8651_s22 + $0xc48] ss:$16 sps:$4 sm:$0xff]  }
 0x1c6   : > { %5262 = vmatprep.subr.bf16.mxu0 %v7638_v56  ;;  %5754 = vmatprep.subr.bf16.mxu1 %v7641_v57  ;;  %v7722_v56 = vld [vmem:[%s8651_s22 + $0xc64] ss:$16 sps:$4 sm:$0xff]   ;;  %v7725_v57 = vld [vmem:[%s8651_s22 + $0xc6c] ss:$16 sps:$4 sm:$0xff]  }
 0x1c9   : > { %5263 = vmatpush1.bf16.msra.mxu0 %v7636_v58  ;;  %5755 = vmatpush1.bf16.msra.mxu1 %v7639_v59  ;;  %v7720_v58 = vld [vmem:[%s8651_s22 + $0xc60] ss:$16 sps:$4 sm:$0xff]   ;;  %v7723_v59 = vld [vmem:[%s8651_s22 + $0xc68] ss:$16 sps:$4 sm:$0xff]  }
 0x1ca   : > { %5264 = vmatprep.subr.bf16.mxu0 %v7644_v60  ;;  %5756 = vmatprep.subr.bf16.mxu1 %v7647_v61  ;;  %v7728_v60 = vld [vmem:[%s8651_s22 + $0xc84] ss:$16 sps:$4 sm:$0xff]   ;;  %v7731_v61 = vld [vmem:[%s8651_s22 + $0xc8c] ss:$16 sps:$4 sm:$0xff]  }
 0x1cd   : > { %5265 = vmatpush1.bf16.msra.mxu0 %v7642_v62  ;;  %5757 = vmatpush1.bf16.msra.mxu1 %v7645_v63  ;;  %v7726_v62 = vld [vmem:[%s8651_s22 + $0xc80] ss:$16 sps:$4 sm:$0xff]   ;;  %v7729_v63 = vld [vmem:[%s8651_s22 + $0xc88] ss:$16 sps:$4 sm:$0xff]  }
 0x1ce   : > { %5266 = vmatprep.subr.bf16.mxu0 %v7650_v0  ;;  %5758 = vmatprep.subr.bf16.mxu1 %v7653_v1  ;;  %v7734_v0 = vld [vmem:[%s8651_s22 + $0xca4] ss:$16 sps:$4 sm:$0xff]   ;;  %v7737_v1 = vld [vmem:[%s8651_s22 + $0xcac] ss:$16 sps:$4 sm:$0xff]  }
 0x1d1   : > { %5267 = vmatpush1.bf16.msra.mxu0 %v7648_v2  ;;  %5759 = vmatpush1.bf16.msra.mxu1 %v7651_v3  ;;  %v7732_v2 = vld [vmem:[%s8651_s22 + $0xca0] ss:$16 sps:$4 sm:$0xff]   ;;  %v7735_v3 = vld [vmem:[%s8651_s22 + $0xca8] ss:$16 sps:$4 sm:$0xff]  }
 0x1d2   : > { %5268 = vmatprep.subr.bf16.mxu0 %v7656_v4  ;;  %5760 = vmatprep.subr.bf16.mxu1 %v7659_v5  ;;  %v7740_v4 = vld [vmem:[%s8651_s22 + $0xcc4] ss:$16 sps:$4 sm:$0xff]   ;;  %v7743_v5 = vld [vmem:[%s8651_s22 + $0xccc] ss:$16 sps:$4 sm:$0xff]  }
 0x1d5   : > { %5269 = vmatpush1.bf16.msra.mxu0 %v7654_v6  ;;  %5761 = vmatpush1.bf16.msra.mxu1 %v7657_v7  ;;  %v7738_v6 = vld [vmem:[%s8651_s22 + $0xcc0] ss:$16 sps:$4 sm:$0xff]   ;;  %v7741_v7 = vld [vmem:[%s8651_s22 + $0xcc8] ss:$16 sps:$4 sm:$0xff]  }
 0x1d6   : > { %5270 = vmatprep.subr.bf16.mxu0 %v7662_v8  ;;  %5762 = vmatprep.subr.bf16.mxu1 %v7665_v9  ;;  %v7746_v8 = vld [vmem:[%s8651_s22 + $0xce4] ss:$16 sps:$4 sm:$0xff]   ;;  %v7749_v9 = vld [vmem:[%s8651_s22 + $0xcec] ss:$16 sps:$4 sm:$0xff]  }
 0x1d9   : > { %5271 = vmatpush1.bf16.msra.mxu0 %v7660_v10  ;;  %5763 = vmatpush1.bf16.msra.mxu1 %v7663_v11  ;;  %v7744_v10 = vld [vmem:[%s8651_s22 + $0xce0] ss:$16 sps:$4 sm:$0xff]   ;;  %v7747_v11 = vld [vmem:[%s8651_s22 + $0xce8] ss:$16 sps:$4 sm:$0xff]  }
 0x1da   : > { %5272 = vmatprep.subr.bf16.mxu0 %v7668_v12  ;;  %5764 = vmatprep.subr.bf16.mxu1 %v7671_v14  ;;  %v7752_v12 = vld [vmem:[%s8651_s22 + $0xd04] ss:$16 sps:$4 sm:$0xff]   ;;  %v7755_v14 = vld [vmem:[%s8651_s22 + $0xd0c] ss:$16 sps:$4 sm:$0xff]  }
 0x1dd   : > { %5273 = vmatpush1.bf16.msra.mxu0 %v7666_v16  ;;  %5765 = vmatpush1.bf16.msra.mxu1 %v7669_v52  ;;  %v7750_v16 = vld [vmem:[%s8651_s22 + $0xd00] ss:$16 sps:$4 sm:$0xff]   ;;  %v7753_v52 = vld [vmem:[%s8651_s22 + $0xd08] ss:$16 sps:$4 sm:$0xff]  }
 0x1de   : > { %5274 = vmatprep.subr.bf16.mxu0 %v7674_v17  ;;  %5766 = vmatprep.subr.bf16.mxu1 %v7677_v18  ;;  %v7758_v17 = vld [vmem:[%s8651_s22 + $0xd24] ss:$16 sps:$4 sm:$0xff]   ;;  %v7761_v18 = vld [vmem:[%s8651_s22 + $0xd2c] ss:$16 sps:$4 sm:$0xff]  }
 0x1e1   : > { %5275 = vmatpush1.bf16.msra.mxu0 %v7672_v19  ;;  %5767 = vmatpush1.bf16.msra.mxu1 %v7675_v20  ;;  %v7756_v19 = vld [vmem:[%s8651_s22 + $0xd20] ss:$16 sps:$4 sm:$0xff]   ;;  %v7759_v20 = vld [vmem:[%s8651_s22 + $0xd28] ss:$16 sps:$4 sm:$0xff]  }
 0x1e2   : > { %5276 = vmatprep.subr.bf16.mxu0 %v7680_v22  ;;  %5768 = vmatprep.subr.bf16.mxu1 %v7683_v23  ;;  %v7764_v22 = vld [vmem:[%s8651_s22 + $0xd44] ss:$16 sps:$4 sm:$0xff]   ;;  %v7767_v23 = vld [vmem:[%s8651_s22 + $0xd4c] ss:$16 sps:$4 sm:$0xff]  }
 0x1e5   : > { %5277 = vmatpush1.bf16.msra.mxu0 %v7678_v24  ;;  %5769 = vmatpush1.bf16.msra.mxu1 %v7681_v26  ;;  %v7762_v24 = vld [vmem:[%s8651_s22 + $0xd40] ss:$16 sps:$4 sm:$0xff]   ;;  %v7765_v26 = vld [vmem:[%s8651_s22 + $0xd48] ss:$16 sps:$4 sm:$0xff]  }
 0x1e6   : > { %5278 = vmatprep.subr.bf16.mxu0 %v7686_v27  ;;  %5770 = vmatprep.subr.bf16.mxu1 %v7689_v28  ;;  %v7770_v27 = vld [vmem:[%s8651_s22 + $0xd64] ss:$16 sps:$4 sm:$0xff]   ;;  %v7773_v28 = vld [vmem:[%s8651_s22 + $0xd6c] ss:$16 sps:$4 sm:$0xff]  }
 0x1e9   : > { %5279 = vmatpush1.bf16.msra.mxu0 %v7684_v29  ;;  %5771 = vmatpush1.bf16.msra.mxu1 %v7687_v30  ;;  %v7768_v29 = vld [vmem:[%s8651_s22 + $0xd60] ss:$16 sps:$4 sm:$0xff]   ;;  %v7771_v30 = vld [vmem:[%s8651_s22 + $0xd68] ss:$16 sps:$4 sm:$0xff]  }
 0x1ea   : > { %5280 = vmatprep.subr.bf16.mxu0 %v7692_v15  ;;  %5772 = vmatprep.subr.bf16.mxu1 %v7695_v31  ;;  %v7776_v15 = vld [vmem:[%s8651_s22 + $0xd84] ss:$16 sps:$4 sm:$0xff]   ;;  %v7779_v31 = vld [vmem:[%s8651_s22 + $0xd8c] ss:$16 sps:$4 sm:$0xff]  }
 0x1ed   : > { %5281 = vmatpush1.bf16.msra.mxu0 %v7690_v25  ;;  %5773 = vmatpush1.bf16.msra.mxu1 %v7693_v34  ;;  %v7782_v25 = vld [vmem:[%s8651_s22 + $0xda4] ss:$16 sps:$4 sm:$0xff]   ;;  %v7785_v34 = vld [vmem:[%s8651_s22 + $0xdac] ss:$16 sps:$4 sm:$0xff]  }
 0x1ee   : > { %5282 = vmatprep.subr.bf16.mxu0 %v7698_v36  ;;  %5774 = vmatprep.subr.bf16.mxu1 %v7701_v37  ;;  %v7780_v36 = vld [vmem:[%s8651_s22 + $0xda0] ss:$16 sps:$4 sm:$0xff]   ;;  %v7783_v37 = vld [vmem:[%s8651_s22 + $0xda8] ss:$16 sps:$4 sm:$0xff]  }
 0x1f1   : > { %5283 = vmatpush1.bf16.msra.mxu0 %v7696_v39  ;;  %5775 = vmatpush1.bf16.msra.mxu1 %v7699_v40  ;;  %v7788_v39 = vld [vmem:[%s8651_s22 + $0xdc4] ss:$16 sps:$4 sm:$0xff]   ;;  %v7791_v40 = vld [vmem:[%s8651_s22 + $0xdcc] ss:$16 sps:$4 sm:$0xff]  }
 0x1f2   : > { %5293 = vmatprep.subr.bf16.mxu0 %v7704_v21  ;;  %5785 = vmatprep.subr.bf16.mxu1 %v7707_v41  ;;  %v7786_v21 = vld [vmem:[%s8651_s22 + $0xdc0] ss:$16 sps:$4 sm:$0xff]   ;;  %v7789_v41 = vld [vmem:[%s8651_s22 + $0xdc8] ss:$16 sps:$4 sm:$0xff]  }
 0x1f4   : > { %5285 = vmatmul.mubr.bf16.vlgmr.msra.gmra.mrb[0].mxu0 %v1130_v44  ;;  %5777 = vmatmul.mubr.bf16.vlgmr.msra.gmra.mrb[0].mxu1 %v1130_v44  ;;  %v7797_v44 = vld [vmem:[%s8651_s22 + $0xdec] ss:$16 sps:$4 sm:$0xff]  }
 0x1f5   : > { %5294 = vmatpush1.bf16.msra.mxu0 %v7702_v35  ;;  %5786 = vmatpush1.bf16.msra.mxu1 %v7705_v45  ;;  %v7792_v35 = vld [vmem:[%s8651_s22 + $0xde0] ss:$16 sps:$4 sm:$0xff]   ;;  %v7795_v45 = vld [vmem:[%s8651_s22 + $0xde8] ss:$16 sps:$4 sm:$0xff]  }
 0x1f6   : > { %5295 = vmatprep.subr.bf16.mxu0 %v7710_v46  ;;  %5787 = vmatprep.subr.bf16.mxu1 %v7713_v47  ;;  %v7801_v46 = vld [vmem:[%s8651_s22 + $0xe04] ss:$16 sps:$4 sm:$0xff]   ;;  %v7804_v47 = vld [vmem:[%s8651_s22 + $0xe0c] ss:$16 sps:$4 sm:$0xff]  }
 0x1f7   : > { %5325 = vmatprep.mubr.bf16.mxu0 %v9111_v48  ;;  %5817 = vmatprep.mubr.bf16.mxu1 %v9111_v48 }
 0x1f9   : > { %5296 = vmatpush1.bf16.msra.mxu0 %v7708_v13  ;;  %5788 = vmatpush1.bf16.msra.mxu1 %v7711_v50  ;;  %v9177_v13 = vrot.slane %v9096_v38, %v8704_v49  ;;  %v7799_v50 = vld [vmem:[%s8651_s22 + $0xe00] ss:$16 sps:$4 sm:$0xff]  }
 0x1fa   : > { %5297 = vmatprep.subr.bf16.mxu0 %v7716_v51  ;;  %5789 = vmatprep.subr.bf16.mxu1 %v7719_v53  ;;  %v7802_v51 = vld [vmem:[%s8651_s22 + $0xe08] ss:$16 sps:$4 sm:$0xff]   ;;  %v7807_v53 = vld [vmem:[%s8651_s22 + $0xe24] ss:$16 sps:$4 sm:$0xff]   ;;  %v7805_v38 = vld [vmem:[%s8651_s22 + $0xe20] ss:$16 sps:$4 sm:$0xff]  }
 0x1fd   : > { %5298 = vmatpush1.bf16.msra.mxu0 %v7714_v54  ;;  %5790 = vmatpush1.bf16.msra.mxu1 %v7717_v55  ;;  %v7810_v54 = vld [vmem:[%s8651_s22 + $0xe2c] ss:$16 sps:$4 sm:$0xff]   ;;  %v1133_v55 = vcombine.high %v9111_v48, %v9111_v48  ;;  %v7811_v48 = vld [vmem:[%s8651_s22 + $0xe40] ss:$16 sps:$4 sm:$0xff]  }
 0x1fe   : > { %5299 = vmatprep.subr.bf16.mxu0 %v7722_v56  ;;  %5791 = vmatprep.subr.bf16.mxu1 %v7725_v57  ;;  %v7808_v56 = vld [vmem:[%s8651_s22 + $0xe28] ss:$16 sps:$4 sm:$0xff]   ;;  %v7813_v57 = vld [vmem:[%s8651_s22 + $0xe44] ss:$16 sps:$4 sm:$0xff]  }
 0x201   : > { %5300 = vmatpush1.bf16.msra.mxu0 %v7720_v58  ;;  %5792 = vmatpush1.bf16.msra.mxu1 %v7723_v59  ;;  %v7816_v58 = vld [vmem:[%s8651_s22 + $0xe4c] ss:$16 sps:$4 sm:$0xff]   ;;  %v7814_v59 = vld [vmem:[%s8651_s22 + $0xe48] ss:$16 sps:$4 sm:$0xff]  }
 0x202   : > { %5301 = vmatprep.subr.bf16.mxu0 %v7728_v60  ;;  %5793 = vmatprep.subr.bf16.mxu1 %v7731_v61  ;;  %v7819_v60 = vld [vmem:[%s8651_s22 + $0xe64] ss:$16 sps:$4 sm:$0xff]   ;;  %v7822_v61 = vld [vmem:[%s8651_s22 + $0xe6c] ss:$16 sps:$4 sm:$0xff]  }
 0x205   : > { %5302 = vmatpush1.bf16.msra.mxu0 %v7726_v62  ;;  %5794 = vmatpush1.bf16.msra.mxu1 %v7729_v63  ;;  %v7817_v62 = vld [vmem:[%s8651_s22 + $0xe60] ss:$16 sps:$4 sm:$0xff]   ;;  %v7820_v63 = vld [vmem:[%s8651_s22 + $0xe68] ss:$16 sps:$4 sm:$0xff]  }
 0x206   : > { %5303 = vmatprep.subr.bf16.mxu0 %v7734_v0  ;;  %5795 = vmatprep.subr.bf16.mxu1 %v7737_v1  ;;  %v7825_v0 = vld [vmem:[%s8651_s22 + $0xe84] ss:$16 sps:$4 sm:$0xff]   ;;  %v7828_v1 = vld [vmem:[%s8651_s22 + $0xe8c] ss:$16 sps:$4 sm:$0xff]  }
 0x209   : > { %5304 = vmatpush1.bf16.msra.mxu0 %v7732_v2  ;;  %5796 = vmatpush1.bf16.msra.mxu1 %v7735_v3  ;;  %v7823_v2 = vld [vmem:[%s8651_s22 + $0xe80] ss:$16 sps:$4 sm:$0xff]   ;;  %v7826_v3 = vld [vmem:[%s8651_s22 + $0xe88] ss:$16 sps:$4 sm:$0xff]  }
 0x20a   : > { %5305 = vmatprep.subr.bf16.mxu0 %v7740_v4  ;;  %5797 = vmatprep.subr.bf16.mxu1 %v7743_v5  ;;  %v7831_v4 = vld [vmem:[%s8651_s22 + $0xea4] ss:$16 sps:$4 sm:$0xff]   ;;  %v7834_v5 = vld [vmem:[%s8651_s22 + $0xeac] ss:$16 sps:$4 sm:$0xff]  }
 0x20d   : > { %5306 = vmatpush1.bf16.msra.mxu0 %v7738_v6  ;;  %5798 = vmatpush1.bf16.msra.mxu1 %v7741_v7  ;;  %v7829_v6 = vld [vmem:[%s8651_s22 + $0xea0] ss:$16 sps:$4 sm:$0xff]   ;;  %v7832_v7 = vld [vmem:[%s8651_s22 + $0xea8] ss:$16 sps:$4 sm:$0xff]  }
 0x20e   : > { %5307 = vmatprep.subr.bf16.mxu0 %v7746_v8  ;;  %5799 = vmatprep.subr.bf16.mxu1 %v7749_v9  ;;  %v7837_v8 = vld [vmem:[%s8651_s22 + $0xec4] ss:$16 sps:$4 sm:$0xff]   ;;  %v7840_v9 = vld [vmem:[%s8651_s22 + $0xecc] ss:$16 sps:$4 sm:$0xff]  }
 0x211   : > { %5308 = vmatpush1.bf16.msra.mxu0 %v7744_v10  ;;  %5800 = vmatpush1.bf16.msra.mxu1 %v7747_v11  ;;  %v7835_v10 = vld [vmem:[%s8651_s22 + $0xec0] ss:$16 sps:$4 sm:$0xff]   ;;  %v7838_v11 = vld [vmem:[%s8651_s22 + $0xec8] ss:$16 sps:$4 sm:$0xff]  }
 0x212   : > { %5309 = vmatprep.subr.bf16.mxu0 %v7752_v12  ;;  %5801 = vmatprep.subr.bf16.mxu1 %v7755_v14  ;;  %v7843_v12 = vld [vmem:[%s8651_s22 + $0xee4] ss:$16 sps:$4 sm:$0xff]   ;;  %v7846_v14 = vld [vmem:[%s8651_s22 + $0xeec] ss:$16 sps:$4 sm:$0xff]  }
 0x215   : > { %5310 = vmatpush1.bf16.msra.mxu0 %v7750_v16  ;;  %5802 = vmatpush1.bf16.msra.mxu1 %v7753_v52  ;;  %v7841_v16 = vld [vmem:[%s8651_s22 + $0xee0] ss:$16 sps:$4 sm:$0xff]   ;;  %v7844_v52 = vld [vmem:[%s8651_s22 + $0xee8] ss:$16 sps:$4 sm:$0xff]  }
 0x216   : > { %5311 = vmatprep.subr.bf16.mxu0 %v7758_v17  ;;  %5803 = vmatprep.subr.bf16.mxu1 %v7761_v18  ;;  %v7849_v17 = vld [vmem:[%s8651_s22 + $0xf04] ss:$16 sps:$4 sm:$0xff]   ;;  %v7852_v18 = vld [vmem:[%s8651_s22 + $0xf0c] ss:$16 sps:$4 sm:$0xff]  }
 0x219   : > { %5312 = vmatpush1.bf16.msra.mxu0 %v7756_v19  ;;  %5804 = vmatpush1.bf16.msra.mxu1 %v7759_v20  ;;  %v7847_v19 = vld [vmem:[%s8651_s22 + $0xf00] ss:$16 sps:$4 sm:$0xff]   ;;  %v7850_v20 = vld [vmem:[%s8651_s22 + $0xf08] ss:$16 sps:$4 sm:$0xff]  }
 0x21a   : > { %5313 = vmatprep.subr.bf16.mxu0 %v7764_v22  ;;  %5805 = vmatprep.subr.bf16.mxu1 %v7767_v23  ;;  %v7855_v22 = vld [vmem:[%s8651_s22 + $0xf24] ss:$16 sps:$4 sm:$0xff]   ;;  %v7858_v23 = vld [vmem:[%s8651_s22 + $0xf2c] ss:$16 sps:$4 sm:$0xff]  }
 0x21d   : > { %5314 = vmatpush1.bf16.msra.mxu0 %v7762_v24  ;;  %5806 = vmatpush1.bf16.msra.mxu1 %v7765_v26  ;;  %v7853_v24 = vld [vmem:[%s8651_s22 + $0xf20] ss:$16 sps:$4 sm:$0xff]   ;;  %v7856_v26 = vld [vmem:[%s8651_s22 + $0xf28] ss:$16 sps:$4 sm:$0xff]  }
 0x21e   : > { %5315 = vmatprep.subr.bf16.mxu0 %v7770_v27  ;;  %5807 = vmatprep.subr.bf16.mxu1 %v7773_v28  ;;  %v7861_v27 = vld [vmem:[%s8651_s22 + $0xf44] ss:$16 sps:$4 sm:$0xff]   ;;  %v7864_v28 = vld [vmem:[%s8651_s22 + $0xf4c] ss:$16 sps:$4 sm:$0xff]  }
 0x221   : > { %5316 = vmatpush1.bf16.msra.mxu0 %v7768_v29  ;;  %5808 = vmatpush1.bf16.msra.mxu1 %v7771_v30  ;;  %v7859_v29 = vld [vmem:[%s8651_s22 + $0xf40] ss:$16 sps:$4 sm:$0xff]   ;;  %v7862_v30 = vld [vmem:[%s8651_s22 + $0xf48] ss:$16 sps:$4 sm:$0xff]  }
 0x222   : > { %5317 = vmatprep.subr.bf16.mxu0 %v7776_v15  ;;  %5809 = vmatprep.subr.bf16.mxu1 %v7779_v31  ;;  %v7867_v15 = vld [vmem:[%s8651_s22 + $0xf64] ss:$16 sps:$4 sm:$0xff]   ;;  %v7870_v31 = vld [vmem:[%s8651_s22 + $0xf6c] ss:$16 sps:$4 sm:$0xff]  }
 0x225   : > { %5318 = vmatpush1.bf16.msra.mxu0 %v7774_v32  ;;  %5810 = vmatpush1.bf16.msra.mxu1 %v7777_v33  ;;  %v7865_v32 = vld [vmem:[%s8651_s22 + $0xf60] ss:$16 sps:$4 sm:$0xff]   ;;  %v7868_v33 = vld [vmem:[%s8651_s22 + $0xf68] ss:$16 sps:$4 sm:$0xff]  }
 0x226   : > { %5319 = vmatprep.subr.bf16.mxu0 %v7782_v25  ;;  %5811 = vmatprep.subr.bf16.mxu1 %v7785_v34  ;;  %v7873_v25 = vld [vmem:[%s8651_s22 + $0xf84] ss:$16 sps:$4 sm:$0xff]   ;;  %v7876_v34 = vld [vmem:[%s8651_s22 + $0xf8c] ss:$16 sps:$4 sm:$0xff]  }
 0x229   : > { %5320 = vmatpush1.bf16.msra.mxu0 %v7780_v36  ;;  %5812 = vmatpush1.bf16.msra.mxu1 %v7783_v37  ;;  %v7871_v36 = vld [vmem:[%s8651_s22 + $0xf80] ss:$16 sps:$4 sm:$0xff]   ;;  %v7874_v37 = vld [vmem:[%s8651_s22 + $0xf88] ss:$16 sps:$4 sm:$0xff]  }
 0x22a   : > { %5321 = vmatprep.subr.bf16.mxu0 %v7788_v39  ;;  %5813 = vmatprep.subr.bf16.mxu1 %v7791_v40  ;;  %v7879_v39 = vld [vmem:[%s8651_s22 + $0xfa4] ss:$16 sps:$4 sm:$0xff]   ;;  %v7882_v40 = vld [vmem:[%s8651_s22 + $0xfac] ss:$16 sps:$4 sm:$0xff]  }
 0x22d   : > { %5322 = vmatpush1.bf16.msra.mxu0 %v7786_v21  ;;  %5814 = vmatpush1.bf16.msra.mxu1 %v7789_v41  ;;  %v7877_v21 = vld [vmem:[%s8651_s22 + $0xfa0] ss:$16 sps:$4 sm:$0xff]   ;;  %v7880_v41 = vld [vmem:[%s8651_s22 + $0xfa8] ss:$16 sps:$4 sm:$0xff]  }
 0x22e   : > { %5323 = vmatprep.subr.bf16.mxu0 %v7794_v43  ;;  %5815 = vmatprep.subr.bf16.mxu1 %v7797_v44  ;;  %v7885_v43 = vld [vmem:[%s8651_s22 + $0xfc4] ss:$16 sps:$4 sm:$0xff]   ;;  %v7888_v44 = vld [vmem:[%s8651_s22 + $0xfcc] ss:$16 sps:$4 sm:$0xff]  }
 0x231   : > { %5324 = vmatpush1.bf16.msra.mxu0 %v7792_v35  ;;  %5816 = vmatpush1.bf16.msra.mxu1 %v7795_v45  ;;  %v9239_v35 = vld [vmem:[#allocation2 + $0x10] sm:$0xff]  ;;  %v7883_v45 = vld [vmem:[%s8651_s22 + $0xfc0] ss:$16 sps:$4 sm:$0xff]  }
 0x232   : > { %5334 = vmatprep.subr.bf16.mxu0 %v7801_v46  ;;  %5826 = vmatprep.subr.bf16.mxu1 %v7804_v47  ;;  %v7886_v46 = vld [vmem:[%s8651_s22 + $0xfc8] ss:$16 sps:$4 sm:$0xff]   ;;  %v7891_v47 = vld [vmem:[%s8651_s22 + $0xfe4] ss:$16 sps:$4 sm:$0xff]  }
 0x234   : > { %5326 = vmatmul.mubr.bf16.vlgmr.msra.gmra.mrb[0].mxu0 %v9177_v13  ;;  %5818 = vmatmul.mubr.bf16.vlgmr.msra.gmra.mrb[0].mxu1 %v9177_v13 }
 0x235   : > { %5335 = vmatpush1.bf16.msra.mxu0 %v7799_v50  ;;  %5827 = vmatpush1.bf16.msra.mxu1 %v7802_v51  ;;  %v7894_v50 = vld [vmem:[%s8651_s22 + $0xfec] ss:$16 sps:$4 sm:$0xff]   ;;  %v9247_v51 = vrot.slane %v9239_v35, %v8704_v49 }
 0x236   : > { %5336 = vmatprep.subr.bf16.mxu0 %v7807_v53  ;;  %5828 = vmatprep.subr.bf16.mxu1 %v7810_v54  ;;  %v7889_v53 = vld [vmem:[%s8651_s22 + $0xfe0] ss:$16 sps:$4 sm:$0xff]   ;;  %v7892_v54 = vld [vmem:[%s8651_s22 + $0xfe8] ss:$16 sps:$4 sm:$0xff]  }
 0x237   : > { %5366 = vmatprep.mubr.bf16.mxu0 %v1133_v55  ;;  %5858 = vmatprep.mubr.bf16.mxu1 %v1133_v55  ;;  %v7897_v55 = vld [vmem:[%s8651_s22 + $0x1004] ss:$16 sps:$4 sm:$0xff]  }
 0x239   : > { %5337 = vmatpush1.bf16.msra.mxu0 %v7805_v38  ;;  %5829 = vmatpush1.bf16.msra.mxu1 %v7808_v56  ;;  %v7900_v38 = vld [vmem:[%s8651_s22 + $0x100c] ss:$16 sps:$4 sm:$0xff]   ;;  %v1149_v56 = vcombine.high %v9247_v51, %v9247_v51 }
 0x23a   : > { %5338 = vmatprep.subr.bf16.mxu0 %v7813_v57  ;;  %5830 = vmatprep.subr.bf16.mxu1 %v7816_v58  ;;  %v1131_v57 = vcombine.high %v9177_v13, %v9177_v13  ;;  %v7895_v58 = vld [vmem:[%s8651_s22 + $0x1000] ss:$16 sps:$4 sm:$0xff]  }
 0x23b   : > { %v7901_v13 = vld [vmem:[%s8651_s22 + $0x1020] ss:$16 sps:$4 sm:$0xff]  }
 0x23d   : > { %5339 = vmatpush1.bf16.msra.mxu0 %v7811_v48  ;;  %5831 = vmatpush1.bf16.msra.mxu1 %v7814_v59  ;;  %v7898_v48 = vld [vmem:[%s8651_s22 + $0x1008] ss:$16 sps:$4 sm:$0xff]   ;;  %v7903_v59 = vld [vmem:[%s8651_s22 + $0x1024] ss:$16 sps:$4 sm:$0xff]  }
 0x23e   : > { %5340 = vmatprep.subr.bf16.mxu0 %v7819_v60  ;;  %5832 = vmatprep.subr.bf16.mxu1 %v7822_v61  ;;  %v7906_v60 = vld [vmem:[%s8651_s22 + $0x102c] ss:$16 sps:$4 sm:$0xff]   ;;  %v9262_v61 = vrot.slane %v1149_v56, %v8704_v49  ;;  %v7982_v56 = vld [vmem:[%s8651_s22 + $0x11c8] ss:$16 sps:$4 sm:$0xff]  }
 0x241   : > { %5341 = vmatpush1.bf16.msra.mxu0 %v7817_v62  ;;  %5833 = vmatpush1.bf16.msra.mxu1 %v7820_v63  ;;  %v7904_v62 = vld [vmem:[%s8651_s22 + $0x1028] ss:$16 sps:$4 sm:$0xff]   ;;  %v7909_v63 = vld [vmem:[%s8651_s22 + $0x1044] ss:$16 sps:$4 sm:$0xff]  }
 0x242   : > { %5342 = vmatprep.subr.bf16.mxu0 %v7825_v0  ;;  %5834 = vmatprep.subr.bf16.mxu1 %v7828_v1  ;;  %v7912_v0 = vld [vmem:[%s8651_s22 + $0x104c] ss:$16 sps:$4 sm:$0xff]   ;;  %v7907_v1 = vld [vmem:[%s8651_s22 + $0x1040] ss:$16 sps:$4 sm:$0xff]  }
 0x245   : > { %5343 = vmatpush1.bf16.msra.mxu0 %v7823_v2  ;;  %5835 = vmatpush1.bf16.msra.mxu1 %v7826_v3  ;;  %v7910_v2 = vld [vmem:[%s8651_s22 + $0x1048] ss:$16 sps:$4 sm:$0xff]   ;;  %v7915_v3 = vld [vmem:[%s8651_s22 + $0x1064] ss:$16 sps:$4 sm:$0xff]  }
 0x246   : > { %5344 = vmatprep.subr.bf16.mxu0 %v7831_v4  ;;  %5836 = vmatprep.subr.bf16.mxu1 %v7834_v5  ;;  %v7918_v4 = vld [vmem:[%s8651_s22 + $0x106c] ss:$16 sps:$4 sm:$0xff]   ;;  %v7913_v5 = vld [vmem:[%s8651_s22 + $0x1060] ss:$16 sps:$4 sm:$0xff]  }
 0x249   : > { %5345 = vmatpush1.bf16.msra.mxu0 %v7829_v6  ;;  %5837 = vmatpush1.bf16.msra.mxu1 %v7832_v7  ;;  %v7916_v6 = vld [vmem:[%s8651_s22 + $0x1068] ss:$16 sps:$4 sm:$0xff]   ;;  %v7921_v7 = vld [vmem:[%s8651_s22 + $0x1084] ss:$16 sps:$4 sm:$0xff]  }
 0x24a   : > { %5346 = vmatprep.subr.bf16.mxu0 %v7837_v8  ;;  %5838 = vmatprep.subr.bf16.mxu1 %v7840_v9  ;;  %v7924_v8 = vld [vmem:[%s8651_s22 + $0x108c] ss:$16 sps:$4 sm:$0xff]   ;;  %v7919_v9 = vld [vmem:[%s8651_s22 + $0x1080] ss:$16 sps:$4 sm:$0xff]  }
 0x24d   : > { %5347 = vmatpush1.bf16.msra.mxu0 %v7835_v10  ;;  %5839 = vmatpush1.bf16.msra.mxu1 %v7838_v11  ;;  %v7922_v10 = vld [vmem:[%s8651_s22 + $0x1088] ss:$16 sps:$4 sm:$0xff]   ;;  %v7927_v11 = vld [vmem:[%s8651_s22 + $0x10a4] ss:$16 sps:$4 sm:$0xff]  }
 0x24e   : > { %5348 = vmatprep.subr.bf16.mxu0 %v7843_v12  ;;  %5840 = vmatprep.subr.bf16.mxu1 %v7846_v14  ;;  %v7930_v12 = vld [vmem:[%s8651_s22 + $0x10ac] ss:$16 sps:$4 sm:$0xff]   ;;  %v7925_v14 = vld [vmem:[%s8651_s22 + $0x10a0] ss:$16 sps:$4 sm:$0xff]  }
 0x251   : > { %5349 = vmatpush1.bf16.msra.mxu0 %v7841_v16  ;;  %5841 = vmatpush1.bf16.msra.mxu1 %v7844_v52  ;;  %v7928_v16 = vld [vmem:[%s8651_s22 + $0x10a8] ss:$16 sps:$4 sm:$0xff]   ;;  %v7933_v52 = vld [vmem:[%s8651_s22 + $0x10c4] ss:$16 sps:$4 sm:$0xff]  }
 0x252   : > { %5350 = vmatprep.subr.bf16.mxu0 %v7849_v17  ;;  %5842 = vmatprep.subr.bf16.mxu1 %v7852_v18  ;;  %v7936_v17 = vld [vmem:[%s8651_s22 + $0x10cc] ss:$16 sps:$4 sm:$0xff]   ;;  %v7931_v18 = vld [vmem:[%s8651_s22 + $0x10c0] ss:$16 sps:$4 sm:$0xff]  }
 0x255   : > { %5351 = vmatpush1.bf16.msra.mxu0 %v7847_v19  ;;  %5843 = vmatpush1.bf16.msra.mxu1 %v7850_v20  ;;  %v7934_v19 = vld [vmem:[%s8651_s22 + $0x10c8] ss:$16 sps:$4 sm:$0xff]   ;;  %v7939_v20 = vld [vmem:[%s8651_s22 + $0x10e4] ss:$16 sps:$4 sm:$0xff]  }
 0x256   : > { %5352 = vmatprep.subr.bf16.mxu0 %v7855_v22  ;;  %5844 = vmatprep.subr.bf16.mxu1 %v7858_v23  ;;  %v7942_v22 = vld [vmem:[%s8651_s22 + $0x10ec] ss:$16 sps:$4 sm:$0xff]   ;;  %v7937_v23 = vld [vmem:[%s8651_s22 + $0x10e0] ss:$16 sps:$4 sm:$0xff]  }
 0x259   : > { %5353 = vmatpush1.bf16.msra.mxu0 %v7853_v24  ;;  %5845 = vmatpush1.bf16.msra.mxu1 %v7856_v26  ;;  %v7940_v24 = vld [vmem:[%s8651_s22 + $0x10e8] ss:$16 sps:$4 sm:$0xff]   ;;  %v7945_v26 = vld [vmem:[%s8651_s22 + $0x1104] ss:$16 sps:$4 sm:$0xff]  }
 0x25a   : > { %5354 = vmatprep.subr.bf16.mxu0 %v7861_v27  ;;  %5846 = vmatprep.subr.bf16.mxu1 %v7864_v28  ;;  %v7948_v27 = vld [vmem:[%s8651_s22 + $0x110c] ss:$16 sps:$4 sm:$0xff]   ;;  %v7943_v28 = vld [vmem:[%s8651_s22 + $0x1100] ss:$16 sps:$4 sm:$0xff]  }
 0x25d   : > { %5355 = vmatpush1.bf16.msra.mxu0 %v7859_v29  ;;  %5847 = vmatpush1.bf16.msra.mxu1 %v7862_v30  ;;  %v7946_v29 = vld [vmem:[%s8651_s22 + $0x1108] ss:$16 sps:$4 sm:$0xff]   ;;  %v7951_v30 = vld [vmem:[%s8651_s22 + $0x1124] ss:$16 sps:$4 sm:$0xff]  }
 0x25e   : > { %5356 = vmatprep.subr.bf16.mxu0 %v7867_v15  ;;  %5848 = vmatprep.subr.bf16.mxu1 %v7870_v31  ;;  %v7954_v15 = vld [vmem:[%s8651_s22 + $0x112c] ss:$16 sps:$4 sm:$0xff]   ;;  %v7949_v31 = vld [vmem:[%s8651_s22 + $0x1120] ss:$16 sps:$4 sm:$0xff]  }
 0x261   : > { %5357 = vmatpush1.bf16.msra.mxu0 %v7865_v32  ;;  %5849 = vmatpush1.bf16.msra.mxu1 %v7868_v33  ;;  %v7952_v32 = vld [vmem:[%s8651_s22 + $0x1128] ss:$16 sps:$4 sm:$0xff]   ;;  %v7957_v33 = vld [vmem:[%s8651_s22 + $0x1144] ss:$16 sps:$4 sm:$0xff]  }
 0x262   : > { %5358 = vmatprep.subr.bf16.mxu0 %v7873_v25  ;;  %5850 = vmatprep.subr.bf16.mxu1 %v7876_v34  ;;  %v7960_v25 = vld [vmem:[%s8651_s22 + $0x114c] ss:$16 sps:$4 sm:$0xff]   ;;  %v7955_v34 = vld [vmem:[%s8651_s22 + $0x1140] ss:$16 sps:$4 sm:$0xff]  }
 0x265   : > { %5359 = vmatpush1.bf16.msra.mxu0 %v7871_v36  ;;  %5851 = vmatpush1.bf16.msra.mxu1 %v7874_v37  ;;  %v7958_v36 = vld [vmem:[%s8651_s22 + $0x1148] ss:$16 sps:$4 sm:$0xff]   ;;  %v7963_v37 = vld [vmem:[%s8651_s22 + $0x1164] ss:$16 sps:$4 sm:$0xff]  }
 0x266   : > { %5360 = vmatprep.subr.bf16.mxu0 %v7879_v39  ;;  %5852 = vmatprep.subr.bf16.mxu1 %v7882_v40  ;;  %v7966_v39 = vld [vmem:[%s8651_s22 + $0x116c] ss:$16 sps:$4 sm:$0xff]   ;;  %v7961_v40 = vld [vmem:[%s8651_s22 + $0x1160] ss:$16 sps:$4 sm:$0xff]  }
 0x269   : > { %5361 = vmatpush1.bf16.msra.mxu0 %v7877_v21  ;;  %5853 = vmatpush1.bf16.msra.mxu1 %v7880_v41  ;;  %v7964_v21 = vld [vmem:[%s8651_s22 + $0x1168] ss:$16 sps:$4 sm:$0xff]   ;;  %v7969_v41 = vld [vmem:[%s8651_s22 + $0x1184] ss:$16 sps:$4 sm:$0xff]  }
 0x26a   : > { %5362 = vmatprep.subr.bf16.mxu0 %v7885_v43  ;;  %5854 = vmatprep.subr.bf16.mxu1 %v7888_v44  ;;  %v7972_v43 = vld [vmem:[%s8651_s22 + $0x118c] ss:$16 sps:$4 sm:$0xff]   ;;  %v7967_v44 = vld [vmem:[%s8651_s22 + $0x1180] ss:$16 sps:$4 sm:$0xff]  }
 0x26d   : > { %5363 = vmatpush1.bf16.msra.mxu0 %v7883_v45  ;;  %5855 = vmatpush1.bf16.msra.mxu1 %v7886_v46  ;;  %v7970_v45 = vld [vmem:[%s8651_s22 + $0x1188] ss:$16 sps:$4 sm:$0xff]   ;;  %v7975_v46 = vld [vmem:[%s8651_s22 + $0x11a4] ss:$16 sps:$4 sm:$0xff]  }
 0x26e   : > { %5364 = vmatprep.subr.bf16.mxu0 %v7891_v47  ;;  %5856 = vmatprep.subr.bf16.mxu1 %v7894_v50  ;;  %v7978_v47 = vld [vmem:[%s8651_s22 + $0x11ac] ss:$16 sps:$4 sm:$0xff]   ;;  %v7973_v50 = vld [vmem:[%s8651_s22 + $0x11a0] ss:$16 sps:$4 sm:$0xff]  }
 0x271   : > { %5365 = vmatpush1.bf16.msra.mxu0 %v7889_v53  ;;  %5857 = vmatpush1.bf16.msra.mxu1 %v7892_v54  ;;  %v7976_v53 = vld [vmem:[%s8651_s22 + $0x11a8] ss:$16 sps:$4 sm:$0xff]   ;;  %v7981_v54 = vld [vmem:[%s8651_s22 + $0x11c4] ss:$16 sps:$4 sm:$0xff]  }
 0x272   : > { %5375 = vmatprep.subr.bf16.mxu0 %v7897_v55  ;;  %5867 = vmatprep.subr.bf16.mxu1 %v7900_v38  ;;  %v7984_v55 = vld [vmem:[%s8651_s22 + $0x11cc] ss:$16 sps:$4 sm:$0xff]   ;;  %v7979_v38 = vld [vmem:[%s8651_s22 + $0x11c0] ss:$16 sps:$4 sm:$0xff]  }
 0x274   : > { %5367 = vmatmul.mubr.bf16.vlgmr.msra.gmra.mrb[0].mxu0 %v1131_v57  ;;  %5859 = vmatmul.mubr.bf16.vlgmr.msra.gmra.mrb[0].mxu1 %v1131_v57  ;;  %v7987_v57 = vld [vmem:[%s8651_s22 + $0x11e4] ss:$16 sps:$4 sm:$0xff]  }
 0x275   : > { %5376 = vmatpush1.bf16.msra.mxu0 %v7895_v58  ;;  %5868 = vmatpush1.bf16.msra.mxu1 %v7898_v48  ;;  %v7990_v58 = vld [vmem:[%s8651_s22 + $0x11ec] ss:$16 sps:$4 sm:$0xff]   ;;  %v7985_v48 = vld [vmem:[%s8651_s22 + $0x11e0] ss:$16 sps:$4 sm:$0xff]  }
 0x276   : > { %5377 = vmatprep.subr.bf16.mxu0 %v7903_v59  ;;  %5869 = vmatprep.subr.bf16.mxu1 %v7906_v60  ;;  %v7988_v59 = vld [vmem:[%s8651_s22 + $0x11e8] ss:$16 sps:$4 sm:$0xff]   ;;  %v7993_v60 = vld [vmem:[%s8651_s22 + $0x1204] ss:$16 sps:$4 sm:$0xff]  }
 0x277   : > { %5407 = vmatprep.mubr.bf16.mxu0 %v9262_v61  ;;  %5899 = vmatprep.mubr.bf16.mxu1 %v9262_v61 }
 0x279   : > { %5378 = vmatpush1.bf16.msra.mxu0 %v7901_v13  ;;  %5870 = vmatpush1.bf16.msra.mxu1 %v7904_v62  ;;  %v7996_v13 = vld [vmem:[%s8651_s22 + $0x120c] ss:$16 sps:$4 sm:$0xff]   ;;  %v9328_v62 = vrot.slane %v9247_v51, %v8704_v49  ;;  %v7997_v51 = vld [vmem:[%s8651_s22 + $0x1220] ss:$16 sps:$4 sm:$0xff]  }
 0x27a   : > { %5379 = vmatprep.subr.bf16.mxu0 %v7909_v63  ;;  %5871 = vmatprep.subr.bf16.mxu1 %v7912_v0  ;;  %v7991_v63 = vld [vmem:[%s8651_s22 + $0x1200] ss:$16 sps:$4 sm:$0xff]   ;;  %v7994_v0 = vld [vmem:[%s8651_s22 + $0x1208] ss:$16 sps:$4 sm:$0xff]  }
 0x27d   : > { %5380 = vmatpush1.bf16.msra.mxu0 %v7907_v1  ;;  %5872 = vmatpush1.bf16.msra.mxu1 %v7910_v2  ;;  %v7999_v1 = vld [vmem:[%s8651_s22 + $0x1224] ss:$16 sps:$4 sm:$0xff]   ;;  %v8002_v2 = vld [vmem:[%s8651_s22 + $0x122c] ss:$16 sps:$4 sm:$0xff]  }
 0x27e   : > { %5381 = vmatprep.subr.bf16.mxu0 %v7915_v3  ;;  %5873 = vmatprep.subr.bf16.mxu1 %v7918_v4  ;;  %v1181_v3 = vcombine.high %v9262_v61, %v9262_v61  ;;  %v8000_v4 = vld [vmem:[%s8651_s22 + $0x1228] ss:$16 sps:$4 sm:$0xff]   ;;  %v8003_v61 = vld [vmem:[%s8651_s22 + $0x1240] ss:$16 sps:$4 sm:$0xff]  }
 0x281   : > { %5382 = vmatpush1.bf16.msra.mxu0 %v7913_v5  ;;  %5874 = vmatpush1.bf16.msra.mxu1 %v7916_v6  ;;  %v8005_v5 = vld [vmem:[%s8651_s22 + $0x1244] ss:$16 sps:$4 sm:$0xff]   ;;  %v8008_v6 = vld [vmem:[%s8651_s22 + $0x124c] ss:$16 sps:$4 sm:$0xff]  }
 0x282   : > { %5383 = vmatprep.subr.bf16.mxu0 %v7921_v7  ;;  %5875 = vmatprep.subr.bf16.mxu1 %v7924_v8  ;;  %v8006_v7 = vld [vmem:[%s8651_s22 + $0x1248] ss:$16 sps:$4 sm:$0xff]   ;;  %v8011_v8 = vld [vmem:[%s8651_s22 + $0x1264] ss:$16 sps:$4 sm:$0xff]  }
 0x285   : > { %5384 = vmatpush1.bf16.msra.mxu0 %v7919_v9  ;;  %5876 = vmatpush1.bf16.msra.mxu1 %v7922_v10  ;;  %v8014_v9 = vld [vmem:[%s8651_s22 + $0x126c] ss:$16 sps:$4 sm:$0xff]   ;;  %v8009_v10 = vld [vmem:[%s8651_s22 + $0x1260] ss:$16 sps:$4 sm:$0xff]  }
 0x286   : > { %5385 = vmatprep.subr.bf16.mxu0 %v7927_v11  ;;  %5877 = vmatprep.subr.bf16.mxu1 %v7930_v12  ;;  %v8012_v11 = vld [vmem:[%s8651_s22 + $0x1268] ss:$16 sps:$4 sm:$0xff]   ;;  %v8017_v12 = vld [vmem:[%s8651_s22 + $0x1284] ss:$16 sps:$4 sm:$0xff]  }
 0x289   : > { %5386 = vmatpush1.bf16.msra.mxu0 %v7925_v14  ;;  %5878 = vmatpush1.bf16.msra.mxu1 %v7928_v16  ;;  %v8020_v14 = vld [vmem:[%s8651_s22 + $0x128c] ss:$16 sps:$4 sm:$0xff]   ;;  %v8015_v16 = vld [vmem:[%s8651_s22 + $0x1280] ss:$16 sps:$4 sm:$0xff]  }
 0x28a   : > { %5387 = vmatprep.subr.bf16.mxu0 %v7933_v52  ;;  %5879 = vmatprep.subr.bf16.mxu1 %v7936_v17  ;;  %v8018_v52 = vld [vmem:[%s8651_s22 + $0x1288] ss:$16 sps:$4 sm:$0xff]   ;;  %v8023_v17 = vld [vmem:[%s8651_s22 + $0x12a4] ss:$16 sps:$4 sm:$0xff]  }
 0x28d   : > { %5388 = vmatpush1.bf16.msra.mxu0 %v7931_v18  ;;  %5880 = vmatpush1.bf16.msra.mxu1 %v7934_v19  ;;  %v8026_v18 = vld [vmem:[%s8651_s22 + $0x12ac] ss:$16 sps:$4 sm:$0xff]   ;;  %v8021_v19 = vld [vmem:[%s8651_s22 + $0x12a0] ss:$16 sps:$4 sm:$0xff]  }
 0x28e   : > { %5389 = vmatprep.subr.bf16.mxu0 %v7939_v20  ;;  %5881 = vmatprep.subr.bf16.mxu1 %v7942_v22  ;;  %v8024_v20 = vld [vmem:[%s8651_s22 + $0x12a8] ss:$16 sps:$4 sm:$0xff]   ;;  %v8029_v22 = vld [vmem:[%s8651_s22 + $0x12c4] ss:$16 sps:$4 sm:$0xff]  }
 0x291   : > { %5390 = vmatpush1.bf16.msra.mxu0 %v7937_v23  ;;  %5882 = vmatpush1.bf16.msra.mxu1 %v7940_v24  ;;  %v8032_v23 = vld [vmem:[%s8651_s22 + $0x12cc] ss:$16 sps:$4 sm:$0xff]   ;;  %v8027_v24 = vld [vmem:[%s8651_s22 + $0x12c0] ss:$16 sps:$4 sm:$0xff]  }
 0x292   : > { %5391 = vmatprep.subr.bf16.mxu0 %v7945_v26  ;;  %5883 = vmatprep.subr.bf16.mxu1 %v7948_v27  ;;  %v8030_v26 = vld [vmem:[%s8651_s22 + $0x12c8] ss:$16 sps:$4 sm:$0xff]   ;;  %v8035_v27 = vld [vmem:[%s8651_s22 + $0x12e4] ss:$16 sps:$4 sm:$0xff]  }
 0x295   : > { %5392 = vmatpush1.bf16.msra.mxu0 %v7943_v28  ;;  %5884 = vmatpush1.bf16.msra.mxu1 %v7946_v29  ;;  %v8038_v28 = vld [vmem:[%s8651_s22 + $0x12ec] ss:$16 sps:$4 sm:$0xff]   ;;  %v8033_v29 = vld [vmem:[%s8651_s22 + $0x12e0] ss:$16 sps:$4 sm:$0xff]  }
 0x296   : > { %5393 = vmatprep.subr.bf16.mxu0 %v7951_v30  ;;  %5885 = vmatprep.subr.bf16.mxu1 %v7954_v15  ;;  %v8036_v30 = vld [vmem:[%s8651_s22 + $0x12e8] ss:$16 sps:$4 sm:$0xff]   ;;  %v8041_v15 = vld [vmem:[%s8651_s22 + $0x1304] ss:$16 sps:$4 sm:$0xff]  }
 0x299   : > { %5394 = vmatpush1.bf16.msra.mxu0 %v7949_v31  ;;  %5886 = vmatpush1.bf16.msra.mxu1 %v7952_v32  ;;  %v8044_v31 = vld [vmem:[%s8651_s22 + $0x130c] ss:$16 sps:$4 sm:$0xff]   ;;  %v8039_v32 = vld [vmem:[%s8651_s22 + $0x1300] ss:$16 sps:$4 sm:$0xff]  }
 0x29a   : > { %5395 = vmatprep.subr.bf16.mxu0 %v7957_v33  ;;  %5887 = vmatprep.subr.bf16.mxu1 %v7960_v25  ;;  %v8042_v33 = vld [vmem:[%s8651_s22 + $0x1308] ss:$16 sps:$4 sm:$0xff]   ;;  %v8047_v25 = vld [vmem:[%s8651_s22 + $0x1324] ss:$16 sps:$4 sm:$0xff]  }
 0x29d   : > { %5396 = vmatpush1.bf16.msra.mxu0 %v7955_v34  ;;  %5888 = vmatpush1.bf16.msra.mxu1 %v7958_v36  ;;  %v8050_v34 = vld [vmem:[%s8651_s22 + $0x132c] ss:$16 sps:$4 sm:$0xff]   ;;  %v8045_v36 = vld [vmem:[%s8651_s22 + $0x1320] ss:$16 sps:$4 sm:$0xff]  }
 0x29e   : > { %5397 = vmatprep.subr.bf16.mxu0 %v7963_v37  ;;  %5889 = vmatprep.subr.bf16.mxu1 %v7966_v39  ;;  %v8048_v37 = vld [vmem:[%s8651_s22 + $0x1328] ss:$16 sps:$4 sm:$0xff]   ;;  %v8053_v39 = vld [vmem:[%s8651_s22 + $0x1344] ss:$16 sps:$4 sm:$0xff]  }
 0x2a1   : > { %5398 = vmatpush1.bf16.msra.mxu0 %v7961_v40  ;;  %5890 = vmatpush1.bf16.msra.mxu1 %v7964_v21  ;;  %v8056_v40 = vld [vmem:[%s8651_s22 + $0x134c] ss:$16 sps:$4 sm:$0xff]   ;;  %v8051_v21 = vld [vmem:[%s8651_s22 + $0x1340] ss:$16 sps:$4 sm:$0xff]  }
 0x2a2   : > { %5399 = vmatprep.subr.bf16.mxu0 %v7969_v41  ;;  %5891 = vmatprep.subr.bf16.mxu1 %v7972_v43  ;;  %v8054_v41 = vld [vmem:[%s8651_s22 + $0x1348] ss:$16 sps:$4 sm:$0xff]   ;;  %v8059_v43 = vld [vmem:[%s8651_s22 + $0x1364] ss:$16 sps:$4 sm:$0xff]  }
 0x2a5   : > { %5400 = vmatpush1.bf16.msra.mxu0 %v7967_v44  ;;  %5892 = vmatpush1.bf16.msra.mxu1 %v7970_v45  ;;  %v8062_v44 = vld [vmem:[%s8651_s22 + $0x136c] ss:$16 sps:$4 sm:$0xff]   ;;  %v8057_v45 = vld [vmem:[%s8651_s22 + $0x1360] ss:$16 sps:$4 sm:$0xff]  }
 0x2a6   : > { %5401 = vmatprep.subr.bf16.mxu0 %v7975_v46  ;;  %5893 = vmatprep.subr.bf16.mxu1 %v7978_v47  ;;  %v8060_v46 = vld [vmem:[%s8651_s22 + $0x1368] ss:$16 sps:$4 sm:$0xff]   ;;  %v8065_v47 = vld [vmem:[%s8651_s22 + $0x1384] ss:$16 sps:$4 sm:$0xff]  }
 0x2a9   : > { %5402 = vmatpush1.bf16.msra.mxu0 %v7973_v50  ;;  %5894 = vmatpush1.bf16.msra.mxu1 %v7976_v53  ;;  %v8068_v50 = vld [vmem:[%s8651_s22 + $0x138c] ss:$16 sps:$4 sm:$0xff]   ;;  %v8063_v53 = vld [vmem:[%s8651_s22 + $0x1380] ss:$16 sps:$4 sm:$0xff]  }
 0x2aa   : > { %5403 = vmatprep.subr.bf16.mxu0 %v7981_v54  ;;  %5895 = vmatprep.subr.bf16.mxu1 %v7984_v55  ;;  %v8066_v54 = vld [vmem:[%s8651_s22 + $0x1388] ss:$16 sps:$4 sm:$0xff]   ;;  %v8071_v55 = vld [vmem:[%s8651_s22 + $0x13a4] ss:$16 sps:$4 sm:$0xff]  }
 0x2ad   : > { %5404 = vmatpush1.bf16.msra.mxu0 %v7979_v38  ;;  %5896 = vmatpush1.bf16.msra.mxu1 %v7982_v56  ;;  %v8074_v38 = vld [vmem:[%s8651_s22 + $0x13ac] ss:$16 sps:$4 sm:$0xff]   ;;  %v8069_v56 = vld [vmem:[%s8651_s22 + $0x13a0] ss:$16 sps:$4 sm:$0xff]  }
 0x2ae   : > { %5405 = vmatprep.subr.bf16.mxu0 %v7987_v57  ;;  %5897 = vmatprep.subr.bf16.mxu1 %v7990_v58  ;;  %v8072_v57 = vld [vmem:[%s8651_s22 + $0x13a8] ss:$16 sps:$4 sm:$0xff]   ;;  %v8077_v58 = vld [vmem:[%s8651_s22 + $0x13c4] ss:$16 sps:$4 sm:$0xff]  }
 0x2b1   : > { %5406 = vmatpush1.bf16.msra.mxu0 %v7985_v48  ;;  %5898 = vmatpush1.bf16.msra.mxu1 %v7988_v59  ;;  %v8080_v48 = vld [vmem:[%s8651_s22 + $0x13cc] ss:$16 sps:$4 sm:$0xff]   ;;  %v1134_v59 = vcombine.high %v9239_v35, %v9239_v35  ;;  %v8081_v35 = vld [vmem:[%s8651_s22 + $0x13e0] ss:$16 sps:$4 sm:$0xff]  }
 0x2b2   : > { %5416 = vmatprep.subr.bf16.mxu0 %v7993_v60  ;;  %5908 = vmatprep.subr.bf16.mxu1 %v7996_v13  ;;  %v8075_v60 = vld [vmem:[%s8651_s22 + $0x13c0] ss:$16 sps:$4 sm:$0xff]   ;;  %v8078_v13 = vld [vmem:[%s8651_s22 + $0x13c8] ss:$16 sps:$4 sm:$0xff]  }
 0x2b4   : > { %5408 = vmatmul.mubr.bf16.vlgmr.msra.gmra.mrb[0].mxu0 %v9328_v62  ;;  %5900 = vmatmul.mubr.bf16.vlgmr.msra.gmra.mrb[0].mxu1 %v9328_v62 }
 0x2b5   : > { %5417 = vmatpush1.bf16.msra.mxu0 %v7991_v63  ;;  %5909 = vmatpush1.bf16.msra.mxu1 %v7994_v0  ;;  %v8083_v63 = vld [vmem:[%s8651_s22 + $0x13e4] ss:$16 sps:$4 sm:$0xff]   ;;  %v8086_v0 = vld [vmem:[%s8651_s22 + $0x13ec] ss:$16 sps:$4 sm:$0xff]  }
 0x2b6   : > { %5418 = vmatprep.subr.bf16.mxu0 %v7999_v1  ;;  %5910 = vmatprep.subr.bf16.mxu1 %v8002_v2  ;;  %v9397_v1 = vrot.slane %v1134_v59, %v8704_v49  ;;  %v8084_v2 = vld [vmem:[%s8651_s22 + $0x13e8] ss:$16 sps:$4 sm:$0xff]  }
 0x2b7   : > { %5448 = vmatprep.mubr.bf16.mxu0 %v1181_v3  ;;  %5940 = vmatprep.mubr.bf16.mxu1 %v1181_v3  ;;  %v8089_v3 = vld [vmem:[%s8651_s22 + $0x1404] ss:$16 sps:$4 sm:$0xff]   ;;  %v8162_v59 = vld [vmem:[%s8651_s22 + $0x1588] ss:$16 sps:$4 sm:$0xff]  }
 0x2b9   : > { %5419 = vmatpush1.bf16.msra.mxu0 %v7997_v51  ;;  %5911 = vmatpush1.bf16.msra.mxu1 %v8000_v4  ;;  %v8092_v51 = vld [vmem:[%s8651_s22 + $0x140c] ss:$16 sps:$4 sm:$0xff]   ;;  %v1150_v4 = vcombine.high %v9397_v1, %v9397_v1 }
 0x2ba   : > { %5420 = vmatprep.subr.bf16.mxu0 %v8005_v5  ;;  %5912 = vmatprep.subr.bf16.mxu1 %v8008_v6  ;;  %v1179_v5 = vcombine.high %v9328_v62, %v9328_v62  ;;  %v8087_v6 = vld [vmem:[%s8651_s22 + $0x1400] ss:$16 sps:$4 sm:$0xff]  }
 0x2bb   : > { %v8093_v62 = vld [vmem:[%s8651_s22 + $0x1420] ss:$16 sps:$4 sm:$0xff]  }
 0x2bd   : > { %5421 = vmatpush1.bf16.msra.mxu0 %v8003_v61  ;;  %5913 = vmatpush1.bf16.msra.mxu1 %v8006_v7  ;;  %v8090_v61 = vld [vmem:[%s8651_s22 + $0x1408] ss:$16 sps:$4 sm:$0xff]   ;;  %v8095_v7 = vld [vmem:[%s8651_s22 + $0x1424] ss:$16 sps:$4 sm:$0xff]  }
 0x2be   : > { %5422 = vmatprep.subr.bf16.mxu0 %v8011_v8  ;;  %5914 = vmatprep.subr.bf16.mxu1 %v8014_v9  ;;  %v8098_v8 = vld [vmem:[%s8651_s22 + $0x142c] ss:$16 sps:$4 sm:$0xff]   ;;  %v9412_v9 = vrot.slane %v1150_v4, %v8704_v49  ;;  %v8179_v4 = vld [vmem:[%s8651_s22 + $0x15e4] ss:$16 sps:$4 sm:$0xff]  }
 0x2c1   : > { %5423 = vmatpush1.bf16.msra.mxu0 %v8009_v10  ;;  %5915 = vmatpush1.bf16.msra.mxu1 %v8012_v11  ;;  %v8096_v10 = vld [vmem:[%s8651_s22 + $0x1428] ss:$16 sps:$4 sm:$0xff]   ;;  %v8101_v11 = vld [vmem:[%s8651_s22 + $0x1444] ss:$16 sps:$4 sm:$0xff]  }
 0x2c2   : > { %5424 = vmatprep.subr.bf16.mxu0 %v8017_v12  ;;  %5916 = vmatprep.subr.bf16.mxu1 %v8020_v14  ;;  %v8104_v12 = vld [vmem:[%s8651_s22 + $0x144c] ss:$16 sps:$4 sm:$0xff]   ;;  %v8099_v14 = vld [vmem:[%s8651_s22 + $0x1440] ss:$16 sps:$4 sm:$0xff]  }
 0x2c5   : > { %5425 = vmatpush1.bf16.msra.mxu0 %v8015_v16  ;;  %5917 = vmatpush1.bf16.msra.mxu1 %v8018_v52  ;;  %v8102_v16 = vld [vmem:[%s8651_s22 + $0x1448] ss:$16 sps:$4 sm:$0xff]   ;;  %v8107_v52 = vld [vmem:[%s8651_s22 + $0x1464] ss:$16 sps:$4 sm:$0xff]  }
 0x2c6   : > { %5426 = vmatprep.subr.bf16.mxu0 %v8023_v17  ;;  %5918 = vmatprep.subr.bf16.mxu1 %v8026_v18  ;;  %v8110_v17 = vld [vmem:[%s8651_s22 + $0x146c] ss:$16 sps:$4 sm:$0xff]   ;;  %v8105_v18 = vld [vmem:[%s8651_s22 + $0x1460] ss:$16 sps:$4 sm:$0xff]  }
 0x2c9   : > { %5427 = vmatpush1.bf16.msra.mxu0 %v8021_v19  ;;  %5919 = vmatpush1.bf16.msra.mxu1 %v8024_v20  ;;  %v8108_v19 = vld [vmem:[%s8651_s22 + $0x1468] ss:$16 sps:$4 sm:$0xff]   ;;  %v8113_v20 = vld [vmem:[%s8651_s22 + $0x1484] ss:$16 sps:$4 sm:$0xff]  }
 0x2ca   : > { %5428 = vmatprep.subr.bf16.mxu0 %v8029_v22  ;;  %5920 = vmatprep.subr.bf16.mxu1 %v8032_v23  ;;  %v8116_v22 = vld [vmem:[%s8651_s22 + $0x148c] ss:$16 sps:$4 sm:$0xff]   ;;  %v8111_v23 = vld [vmem:[%s8651_s22 + $0x1480] ss:$16 sps:$4 sm:$0xff]  }
 0x2cd   : > { %5429 = vmatpush1.bf16.msra.mxu0 %v8027_v24  ;;  %5921 = vmatpush1.bf16.msra.mxu1 %v8030_v26  ;;  %v8114_v24 = vld [vmem:[%s8651_s22 + $0x1488] ss:$16 sps:$4 sm:$0xff]   ;;  %v8119_v26 = vld [vmem:[%s8651_s22 + $0x14a4] ss:$16 sps:$4 sm:$0xff]  }
 0x2ce   : > { %5430 = vmatprep.subr.bf16.mxu0 %v8035_v27  ;;  %5922 = vmatprep.subr.bf16.mxu1 %v8038_v28  ;;  %v8122_v27 = vld [vmem:[%s8651_s22 + $0x14ac] ss:$16 sps:$4 sm:$0xff]   ;;  %v8117_v28 = vld [vmem:[%s8651_s22 + $0x14a0] ss:$16 sps:$4 sm:$0xff]  }
 0x2d1   : > { %5431 = vmatpush1.bf16.msra.mxu0 %v8033_v29  ;;  %5923 = vmatpush1.bf16.msra.mxu1 %v8036_v30  ;;  %v8120_v29 = vld [vmem:[%s8651_s22 + $0x14a8] ss:$16 sps:$4 sm:$0xff]   ;;  %v8125_v30 = vld [vmem:[%s8651_s22 + $0x14c4] ss:$16 sps:$4 sm:$0xff]  }
 0x2d2   : > { %5432 = vmatprep.subr.bf16.mxu0 %v8041_v15  ;;  %5924 = vmatprep.subr.bf16.mxu1 %v8044_v31  ;;  %v8128_v15 = vld [vmem:[%s8651_s22 + $0x14cc] ss:$16 sps:$4 sm:$0xff]   ;;  %v8123_v31 = vld [vmem:[%s8651_s22 + $0x14c0] ss:$16 sps:$4 sm:$0xff]  }
 0x2d5   : > { %5433 = vmatpush1.bf16.msra.mxu0 %v8039_v32  ;;  %5925 = vmatpush1.bf16.msra.mxu1 %v8042_v33  ;;  %v8126_v32 = vld [vmem:[%s8651_s22 + $0x14c8] ss:$16 sps:$4 sm:$0xff]   ;;  %v8131_v33 = vld [vmem:[%s8651_s22 + $0x14e4] ss:$16 sps:$4 sm:$0xff]  }
 0x2d6   : > { %5434 = vmatprep.subr.bf16.mxu0 %v8047_v25  ;;  %5926 = vmatprep.subr.bf16.mxu1 %v8050_v34  ;;  %v8134_v25 = vld [vmem:[%s8651_s22 + $0x14ec] ss:$16 sps:$4 sm:$0xff]   ;;  %v8129_v34 = vld [vmem:[%s8651_s22 + $0x14e0] ss:$16 sps:$4 sm:$0xff]  }
 0x2d9   : > { %5435 = vmatpush1.bf16.msra.mxu0 %v8045_v36  ;;  %5927 = vmatpush1.bf16.msra.mxu1 %v8048_v37  ;;  %v8132_v36 = vld [vmem:[%s8651_s22 + $0x14e8] ss:$16 sps:$4 sm:$0xff]   ;;  %v8137_v37 = vld [vmem:[%s8651_s22 + $0x1504] ss:$16 sps:$4 sm:$0xff]  }
 0x2da   : > { %5436 = vmatprep.subr.bf16.mxu0 %v8053_v39  ;;  %5928 = vmatprep.subr.bf16.mxu1 %v8056_v40  ;;  %v8140_v39 = vld [vmem:[%s8651_s22 + $0x150c] ss:$16 sps:$4 sm:$0xff]   ;;  %v8135_v40 = vld [vmem:[%s8651_s22 + $0x1500] ss:$16 sps:$4 sm:$0xff]  }
 0x2dd   : > { %5437 = vmatpush1.bf16.msra.mxu0 %v8051_v21  ;;  %5929 = vmatpush1.bf16.msra.mxu1 %v8054_v41  ;;  %v8138_v21 = vld [vmem:[%s8651_s22 + $0x1508] ss:$16 sps:$4 sm:$0xff]   ;;  %v8143_v41 = vld [vmem:[%s8651_s22 + $0x1524] ss:$16 sps:$4 sm:$0xff]  }
 0x2de   : > { %5438 = vmatprep.subr.bf16.mxu0 %v8059_v43  ;;  %5930 = vmatprep.subr.bf16.mxu1 %v8062_v44  ;;  %v8146_v43 = vld [vmem:[%s8651_s22 + $0x152c] ss:$16 sps:$4 sm:$0xff]   ;;  %v8141_v44 = vld [vmem:[%s8651_s22 + $0x1520] ss:$16 sps:$4 sm:$0xff]  }
 0x2e1   : > { %5439 = vmatpush1.bf16.msra.mxu0 %v8057_v45  ;;  %5931 = vmatpush1.bf16.msra.mxu1 %v8060_v46  ;;  %v8144_v45 = vld [vmem:[%s8651_s22 + $0x1528] ss:$16 sps:$4 sm:$0xff]   ;;  %v8149_v46 = vld [vmem:[%s8651_s22 + $0x1544] ss:$16 sps:$4 sm:$0xff]  }
 0x2e2   : > { %5440 = vmatprep.subr.bf16.mxu0 %v8065_v47  ;;  %5932 = vmatprep.subr.bf16.mxu1 %v8068_v50  ;;  %v8152_v47 = vld [vmem:[%s8651_s22 + $0x154c] ss:$16 sps:$4 sm:$0xff]   ;;  %v8147_v50 = vld [vmem:[%s8651_s22 + $0x1540] ss:$16 sps:$4 sm:$0xff]  }
 0x2e5   : > { %5441 = vmatpush1.bf16.msra.mxu0 %v8063_v53  ;;  %5933 = vmatpush1.bf16.msra.mxu1 %v8066_v54  ;;  %v8150_v53 = vld [vmem:[%s8651_s22 + $0x1548] ss:$16 sps:$4 sm:$0xff]   ;;  %v8155_v54 = vld [vmem:[%s8651_s22 + $0x1564] ss:$16 sps:$4 sm:$0xff]  }
 0x2e6   : > { %5442 = vmatprep.subr.bf16.mxu0 %v8071_v55  ;;  %5934 = vmatprep.subr.bf16.mxu1 %v8074_v38  ;;  %v8158_v55 = vld [vmem:[%s8651_s22 + $0x156c] ss:$16 sps:$4 sm:$0xff]   ;;  %v8153_v38 = vld [vmem:[%s8651_s22 + $0x1560] ss:$16 sps:$4 sm:$0xff]  }
 0x2e9   : > { %5443 = vmatpush1.bf16.msra.mxu0 %v8069_v56  ;;  %5935 = vmatpush1.bf16.msra.mxu1 %v8072_v57  ;;  %v8156_v56 = vld [vmem:[%s8651_s22 + $0x1568] ss:$16 sps:$4 sm:$0xff]   ;;  %v8161_v57 = vld [vmem:[%s8651_s22 + $0x1584] ss:$16 sps:$4 sm:$0xff]  }
 0x2ea   : > { %5444 = vmatprep.subr.bf16.mxu0 %v8077_v58  ;;  %5936 = vmatprep.subr.bf16.mxu1 %v8080_v48  ;;  %v8164_v58 = vld [vmem:[%s8651_s22 + $0x158c] ss:$16 sps:$4 sm:$0xff]   ;;  %v8159_v48 = vld [vmem:[%s8651_s22 + $0x1580] ss:$16 sps:$4 sm:$0xff]  }
 0x2ed   : > { %5445 = vmatpush1.bf16.msra.mxu0 %v8075_v60  ;;  %5937 = vmatpush1.bf16.msra.mxu1 %v8078_v13  ;;  %v8167_v60 = vld [vmem:[%s8651_s22 + $0x15a4] ss:$16 sps:$4 sm:$0xff]   ;;  %v8170_v13 = vld [vmem:[%s8651_s22 + $0x15ac] ss:$16 sps:$4 sm:$0xff]  }
 0x2ee   : > { %5446 = vmatprep.subr.bf16.mxu0 %v8083_v63  ;;  %5938 = vmatprep.subr.bf16.mxu1 %v8086_v0  ;;  %v8165_v63 = vld [vmem:[%s8651_s22 + $0x15a0] ss:$16 sps:$4 sm:$0xff]   ;;  %v8168_v0 = vld [vmem:[%s8651_s22 + $0x15a8] ss:$16 sps:$4 sm:$0xff]  }
 0x2f1   : > { %5447 = vmatpush1.bf16.msra.mxu0 %v8081_v35  ;;  %5939 = vmatpush1.bf16.msra.mxu1 %v8084_v2  ;;  %v8173_v35 = vld [vmem:[%s8651_s22 + $0x15c4] ss:$16 sps:$4 sm:$0xff]   ;;  %v8176_v2 = vld [vmem:[%s8651_s22 + $0x15cc] ss:$16 sps:$4 sm:$0xff]  }
 0x2f2   : > { %5457 = vmatprep.subr.bf16.mxu0 %v8089_v3  ;;  %5949 = vmatprep.subr.bf16.mxu1 %v8092_v51  ;;  %v8171_v3 = vld [vmem:[%s8651_s22 + $0x15c0] ss:$16 sps:$4 sm:$0xff]   ;;  %v8174_v51 = vld [vmem:[%s8651_s22 + $0x15c8] ss:$16 sps:$4 sm:$0xff]  }
 0x2f4   : > { %5449 = vmatmul.mubr.bf16.vlgmr.msra.gmra.mrb[0].mxu0 %v1179_v5  ;;  %5941 = vmatmul.mubr.bf16.vlgmr.msra.gmra.mrb[0].mxu1 %v1179_v5  ;;  %v8182_v5 = vld [vmem:[%s8651_s22 + $0x15ec] ss:$16 sps:$4 sm:$0xff]  }
 0x2f5   : > { %5458 = vmatpush1.bf16.msra.mxu0 %v8087_v6  ;;  %5950 = vmatpush1.bf16.msra.mxu1 %v8090_v61  ;;  %v8177_v6 = vld [vmem:[%s8651_s22 + $0x15e0] ss:$16 sps:$4 sm:$0xff]   ;;  %v8180_v61 = vld [vmem:[%s8651_s22 + $0x15e8] ss:$16 sps:$4 sm:$0xff]  }
 0x2f6   : > { %5459 = vmatprep.subr.bf16.mxu0 %v8095_v7  ;;  %5951 = vmatprep.subr.bf16.mxu1 %v8098_v8  ;;  %v8186_v7 = vld [vmem:[%s8651_s22 + $0x1604] ss:$16 sps:$4 sm:$0xff]   ;;  %v8189_v8 = vld [vmem:[%s8651_s22 + $0x160c] ss:$16 sps:$4 sm:$0xff]  }
 0x2f7   : > { %5489 = vmatprep.mubr.bf16.mxu0 %v9412_v9  ;;  %5981 = vmatprep.mubr.bf16.mxu1 %v9412_v9 }
 0x2f9   : > { %5460 = vmatpush1.bf16.msra.mxu0 %v8093_v62  ;;  %5952 = vmatpush1.bf16.msra.mxu1 %v8096_v10  ;;  %v9478_v62 = vrot.slane %v9397_v1, %v8704_v49  ;;  %v8184_v10 = vld [vmem:[%s8651_s22 + $0x1600] ss:$16 sps:$4 sm:$0xff]   ;;  %v8193_v1 = vld [vmem:[%s8651_s22 + $0x1628] ss:$16 sps:$4 sm:$0xff]  }
 0x2fa   : > { %5461 = vmatprep.subr.bf16.mxu0 %v8101_v11  ;;  %5953 = vmatprep.subr.bf16.mxu1 %v8104_v12  ;;  %v8187_v11 = vld [vmem:[%s8651_s22 + $0x1608] ss:$16 sps:$4 sm:$0xff]   ;;  %v8192_v12 = vld [vmem:[%s8651_s22 + $0x1624] ss:$16 sps:$4 sm:$0xff]   ;;  %v8190_v49 = vld [vmem:[%s8651_s22 + $0x1620] ss:$16 sps:$4 sm:$0xff]  }
 0x2fd   : > { %5462 = vmatpush1.bf16.msra.mxu0 %v8099_v14  ;;  %5954 = vmatpush1.bf16.msra.mxu1 %v8102_v16  ;;  %v8195_v14 = vld [vmem:[%s8651_s22 + $0x162c] ss:$16 sps:$4 sm:$0xff]   ;;  %v1182_v16 = vcombine.high %v9412_v9, %v9412_v9  ;;  %v8196_v9 = vld [vmem:[%s8651_s22 + $0x1640] ss:$16 sps:$4 sm:$0xff]  }
 0x2fe   : > { %5463 = vmatprep.subr.bf16.mxu0 %v8107_v52  ;;  %5955 = vmatprep.subr.bf16.mxu1 %v8110_v17  ;;  %v8198_v52 = vld [vmem:[%s8651_s22 + $0x1644] ss:$16 sps:$4 sm:$0xff]   ;;  %v8201_v17 = vld [vmem:[%s8651_s22 + $0x164c] ss:$16 sps:$4 sm:$0xff]  }
 0x301   : > { %5464 = vmatpush1.bf16.msra.mxu0 %v8105_v18  ;;  %5956 = vmatpush1.bf16.msra.mxu1 %v8108_v19  ;;  %v8199_v18 = vld [vmem:[%s8651_s22 + $0x1648] ss:$16 sps:$4 sm:$0xff]   ;;  %v8204_v19 = vld [vmem:[%s8651_s22 + $0x1664] ss:$16 sps:$4 sm:$0xff]  }
 0x302   : > { %5465 = vmatprep.subr.bf16.mxu0 %v8113_v20  ;;  %5957 = vmatprep.subr.bf16.mxu1 %v8116_v22  ;;  %v8207_v20 = vld [vmem:[%s8651_s22 + $0x166c] ss:$16 sps:$4 sm:$0xff]   ;;  %v8202_v22 = vld [vmem:[%s8651_s22 + $0x1660] ss:$16 sps:$4 sm:$0xff]  }
 0x305   : > { %5466 = vmatpush1.bf16.msra.mxu0 %v8111_v23  ;;  %5958 = vmatpush1.bf16.msra.mxu1 %v8114_v24  ;;  %v8205_v23 = vld [vmem:[%s8651_s22 + $0x1668] ss:$16 sps:$4 sm:$0xff]   ;;  %v8210_v24 = vld [vmem:[%s8651_s22 + $0x1684] ss:$16 sps:$4 sm:$0xff]  }
 0x306   : > { %5467 = vmatprep.subr.bf16.mxu0 %v8119_v26  ;;  %5959 = vmatprep.subr.bf16.mxu1 %v8122_v27  ;;  %v8213_v26 = vld [vmem:[%s8651_s22 + $0x168c] ss:$16 sps:$4 sm:$0xff]   ;;  %v8208_v27 = vld [vmem:[%s8651_s22 + $0x1680] ss:$16 sps:$4 sm:$0xff]  }
 0x309   : > { %5468 = vmatpush1.bf16.msra.mxu0 %v8117_v28  ;;  %5960 = vmatpush1.bf16.msra.mxu1 %v8120_v29  ;;  %v8211_v28 = vld [vmem:[%s8651_s22 + $0x1688] ss:$16 sps:$4 sm:$0xff]   ;;  %v8216_v29 = vld [vmem:[%s8651_s22 + $0x16a4] ss:$16 sps:$4 sm:$0xff]  }
 0x30a   : > { %5469 = vmatprep.subr.bf16.mxu0 %v8125_v30  ;;  %5961 = vmatprep.subr.bf16.mxu1 %v8128_v15  ;;  %v8219_v30 = vld [vmem:[%s8651_s22 + $0x16ac] ss:$16 sps:$4 sm:$0xff]   ;;  %v8214_v15 = vld [vmem:[%s8651_s22 + $0x16a0] ss:$16 sps:$4 sm:$0xff]  }
 0x30d   : > { %5470 = vmatpush1.bf16.msra.mxu0 %v8123_v31  ;;  %5962 = vmatpush1.bf16.msra.mxu1 %v8126_v32  ;;  %v8217_v31 = vld [vmem:[%s8651_s22 + $0x16a8] ss:$16 sps:$4 sm:$0xff]   ;;  %v8222_v32 = vld [vmem:[%s8651_s22 + $0x16c4] ss:$16 sps:$4 sm:$0xff]  }
 0x30e   : > { %5471 = vmatprep.subr.bf16.mxu0 %v8131_v33  ;;  %5963 = vmatprep.subr.bf16.mxu1 %v8134_v25  ;;  %v8225_v33 = vld [vmem:[%s8651_s22 + $0x16cc] ss:$16 sps:$4 sm:$0xff]   ;;  %v8220_v25 = vld [vmem:[%s8651_s22 + $0x16c0] ss:$16 sps:$4 sm:$0xff]  }
 0x311   : > { %5472 = vmatpush1.bf16.msra.mxu0 %v8129_v34  ;;  %5964 = vmatpush1.bf16.msra.mxu1 %v8132_v36  ;;  %v8223_v34 = vld [vmem:[%s8651_s22 + $0x16c8] ss:$16 sps:$4 sm:$0xff]   ;;  %v8228_v36 = vld [vmem:[%s8651_s22 + $0x16e4] ss:$16 sps:$4 sm:$0xff]  }
 0x312   : > { %5473 = vmatprep.subr.bf16.mxu0 %v8137_v37  ;;  %5965 = vmatprep.subr.bf16.mxu1 %v8140_v39  ;;  %v8231_v37 = vld [vmem:[%s8651_s22 + $0x16ec] ss:$16 sps:$4 sm:$0xff]   ;;  %v8226_v39 = vld [vmem:[%s8651_s22 + $0x16e0] ss:$16 sps:$4 sm:$0xff]  }
 0x315   : > { %5474 = vmatpush1.bf16.msra.mxu0 %v8135_v40  ;;  %5966 = vmatpush1.bf16.msra.mxu1 %v8138_v21  ;;  %v8229_v40 = vld [vmem:[%s8651_s22 + $0x16e8] ss:$16 sps:$4 sm:$0xff]   ;;  %v8234_v21 = vld [vmem:[%s8651_s22 + $0x1704] ss:$16 sps:$4 sm:$0xff]  }
 0x316   : > { %5475 = vmatprep.subr.bf16.mxu0 %v8143_v41  ;;  %5967 = vmatprep.subr.bf16.mxu1 %v8146_v43  ;;  %v8237_v41 = vld [vmem:[%s8651_s22 + $0x170c] ss:$16 sps:$4 sm:$0xff]   ;;  %v8232_v43 = vld [vmem:[%s8651_s22 + $0x1700] ss:$16 sps:$4 sm:$0xff]  }
 0x319   : > { %5476 = vmatpush1.bf16.msra.mxu0 %v8141_v44  ;;  %5968 = vmatpush1.bf16.msra.mxu1 %v8144_v45  ;;  %v8235_v44 = vld [vmem:[%s8651_s22 + $0x1708] ss:$16 sps:$4 sm:$0xff]   ;;  %v8240_v45 = vld [vmem:[%s8651_s22 + $0x1724] ss:$16 sps:$4 sm:$0xff]  }
 0x31a   : > { %5477 = vmatprep.subr.bf16.mxu0 %v8149_v46  ;;  %5969 = vmatprep.subr.bf16.mxu1 %v8152_v47  ;;  %v8243_v46 = vld [vmem:[%s8651_s22 + $0x172c] ss:$16 sps:$4 sm:$0xff]   ;;  %v8238_v47 = vld [vmem:[%s8651_s22 + $0x1720] ss:$16 sps:$4 sm:$0xff]  }
 0x31d   : > { %5478 = vmatpush1.bf16.msra.mxu0 %v8147_v50  ;;  %5970 = vmatpush1.bf16.msra.mxu1 %v8150_v53  ;;  %v8241_v50 = vld [vmem:[%s8651_s22 + $0x1728] ss:$16 sps:$4 sm:$0xff]   ;;  %v8246_v53 = vld [vmem:[%s8651_s22 + $0x1744] ss:$16 sps:$4 sm:$0xff]  }
 0x31e   : > { %5479 = vmatprep.subr.bf16.mxu0 %v8155_v54  ;;  %5971 = vmatprep.subr.bf16.mxu1 %v8158_v55  ;;  %v8249_v54 = vld [vmem:[%s8651_s22 + $0x174c] ss:$16 sps:$4 sm:$0xff]   ;;  %v8244_v55 = vld [vmem:[%s8651_s22 + $0x1740] ss:$16 sps:$4 sm:$0xff]  }
 0x321   : > { %5480 = vmatpush1.bf16.msra.mxu0 %v8153_v38  ;;  %5972 = vmatpush1.bf16.msra.mxu1 %v8156_v56  ;;  %v8247_v38 = vld [vmem:[%s8651_s22 + $0x1748] ss:$16 sps:$4 sm:$0xff]   ;;  %v8252_v56 = vld [vmem:[%s8651_s22 + $0x1764] ss:$16 sps:$4 sm:$0xff]  }
 0x322   : > { %5481 = vmatprep.subr.bf16.mxu0 %v8161_v57  ;;  %5973 = vmatprep.subr.bf16.mxu1 %v8164_v58  ;;  %v8255_v57 = vld [vmem:[%s8651_s22 + $0x176c] ss:$16 sps:$4 sm:$0xff]   ;;  %v8250_v58 = vld [vmem:[%s8651_s22 + $0x1760] ss:$16 sps:$4 sm:$0xff]  }
 0x325   : > { %5482 = vmatpush1.bf16.msra.mxu0 %v8159_v48  ;;  %5974 = vmatpush1.bf16.msra.mxu1 %v8162_v59  ;;  %v8253_v48 = vld [vmem:[%s8651_s22 + $0x1768] ss:$16 sps:$4 sm:$0xff]   ;;  %v8258_v59 = vld [vmem:[%s8651_s22 + $0x1784] ss:$16 sps:$4 sm:$0xff]  }
 0x326   : > { %5483 = vmatprep.subr.bf16.mxu0 %v8167_v60  ;;  %5975 = vmatprep.subr.bf16.mxu1 %v8170_v13  ;;  %v8261_v60 = vld [vmem:[%s8651_s22 + $0x178c] ss:$16 sps:$4 sm:$0xff]   ;;  %v8256_v13 = vld [vmem:[%s8651_s22 + $0x1780] ss:$16 sps:$4 sm:$0xff]  }
 0x329   : > { %5484 = vmatpush1.bf16.msra.mxu0 %v8165_v63  ;;  %5976 = vmatpush1.bf16.msra.mxu1 %v8168_v0  ;;  %v8259_v63 = vld [vmem:[%s8651_s22 + $0x1788] ss:$16 sps:$4 sm:$0xff]   ;;  %v8264_v0 = vld [vmem:[%s8651_s22 + $0x17a4] ss:$16 sps:$4 sm:$0xff]  }
 0x32a   : > { %5485 = vmatprep.subr.bf16.mxu0 %v8173_v35  ;;  %5977 = vmatprep.subr.bf16.mxu1 %v8176_v2  ;;  %v8267_v35 = vld [vmem:[%s8651_s22 + $0x17ac] ss:$16 sps:$4 sm:$0xff]   ;;  %v8262_v2 = vld [vmem:[%s8651_s22 + $0x17a0] ss:$16 sps:$4 sm:$0xff]  }
 0x32d   : > { %5486 = vmatpush1.bf16.msra.mxu0 %v8171_v3  ;;  %5978 = vmatpush1.bf16.msra.mxu1 %v8174_v51  ;;  %v8265_v3 = vld [vmem:[%s8651_s22 + $0x17a8] ss:$16 sps:$4 sm:$0xff]   ;;  %v8270_v51 = vld [vmem:[%s8651_s22 + $0x17c4] ss:$16 sps:$4 sm:$0xff]  }
 0x32e   : > { %5487 = vmatprep.subr.bf16.mxu0 %v8179_v4  ;;  %5979 = vmatprep.subr.bf16.mxu1 %v8182_v5  ;;  %v8273_v4 = vld [vmem:[%s8651_s22 + $0x17cc] ss:$16 sps:$4 sm:$0xff]   ;;  %v8268_v5 = vld [vmem:[%s8651_s22 + $0x17c0] ss:$16 sps:$4 sm:$0xff]  }
 0x331   : > { %5488 = vmatpush1.bf16.msra.mxu0 %v8177_v6  ;;  %5980 = vmatpush1.bf16.msra.mxu1 %v8180_v61  ;;  %v8271_v6 = vld [vmem:[%s8651_s22 + $0x17c8] ss:$16 sps:$4 sm:$0xff]   ;;  %v8276_v61 = vld [vmem:[%s8651_s22 + $0x17e4] ss:$16 sps:$4 sm:$0xff]  }
 0x332   : > { %5498 = vmatprep.subr.bf16.mxu0 %v8186_v7  ;;  %5990 = vmatprep.subr.bf16.mxu1 %v8189_v8  ;;  %v8279_v7 = vld [vmem:[%s8651_s22 + $0x17ec] ss:$16 sps:$4 sm:$0xff]   ;;  %v8274_v8 = vld [vmem:[%s8651_s22 + $0x17e0] ss:$16 sps:$4 sm:$0xff]  }
 0x334   : > { %5490 = vmatmul.mubr.bf16.vlgmr.msra.gmra.mrb[0].mxu0 %v9478_v62  ;;  %5982 = vmatmul.mubr.bf16.vlgmr.msra.gmra.mrb[0].mxu1 %v9478_v62 }
 0x335   : > { %5499 = vmatpush1.bf16.msra.mxu0 %v8184_v10  ;;  %5991 = vmatpush1.bf16.msra.mxu1 %v8187_v11  ;;  %v8277_v10 = vld [vmem:[%s8651_s22 + $0x17e8] ss:$16 sps:$4 sm:$0xff]   ;;  %v1180_v11 = vcombine.high %v9478_v62, %v9478_v62 }
 0x336   : > { %5500 = vmatprep.subr.bf16.mxu0 %v8192_v12  ;;  %5992 = vmatprep.subr.bf16.mxu1 %v8195_v14  ;;  %v1015_v12 = vsub.s32 0, %v8696_v42  ;;  %v1023_v14 = vsub.s32 2, %v8696_v42 }
 0x337   : > { %5530 = vmatprep.mubr.bf16.mxu0 %v1182_v16  ;;  %6022 = vmatprep.mubr.bf16.mxu1 %v1182_v16  ;;  %v1011_v16 = vld [vmem:[%s209_s28] sm:$0xf] }
 0x338   : > { %v1024_v62 = vrot.slane %v1011_v16, %v1023_v14 }
 0x339   : > { %5501 = vmatpush1.bf16.msra.mxu0 %v8190_v49  ;;  %5993 = vmatpush1.bf16.msra.mxu1 %v8193_v1  ;;  %v1019_v49 = vsub.s32 1, %v8696_v42  ;;  %v1027_v1 = vsub.s32 3, %v8696_v42 }
 0x33a   : > { %5502 = vmatprep.subr.bf16.mxu0 %v8198_v52  ;;  %5994 = vmatprep.subr.bf16.mxu1 %v8201_v17  ;;  %v8449_v52 = vmov 1983009808  }
 0x33b   : > { %v6042_v17 = vunpack.c.l.s4 %v8449_v52 }
 0x33d   : > { %5503 = vmatpush1.bf16.msra.mxu0 %v8196_v9  ;;  %5995 = vmatpush1.bf16.msra.mxu1 %v8199_v18  ;;  %v1016_v9 = vrot.slane %v1011_v16, %v1015_v12  ;;  %v1020_v18 = vrot.slane %v1011_v16, %v1019_v49 }
 0x33e   : > { %5504 = vmatprep.subr.bf16.mxu0 %v8204_v19  ;;  %5996 = vmatprep.subr.bf16.mxu1 %v8207_v20  ;;  %v1028_v19 = vrot.slane %v1011_v16, %v1027_v1 }
 0x341   : > { %5505 = vmatpush1.bf16.msra.mxu0 %v8202_v22  ;;  %5997 = vmatpush1.bf16.msra.mxu1 %v8205_v23  ;;  %v6043_v23 = vunpack.c.0.s8 %v6042_v17 }
 0x342   : > { %5506 = vmatprep.subr.bf16.mxu0 %v8210_v24  ;;  %5998 = vmatprep.subr.bf16.mxu1 %v8213_v26 }
 0x345   : > { %5507 = vmatpush1.bf16.msra.mxu0 %v8208_v27  ;;  %5999 = vmatpush1.bf16.msra.mxu1 %v8211_v28 }
 0x346   : > { %5508 = vmatprep.subr.bf16.mxu0 %v8216_v29  ;;  %6000 = vmatprep.subr.bf16.mxu1 %v8219_v30 }
 0x349   : > { %5509 = vmatpush1.bf16.msra.mxu0 %v8214_v15  ;;  %6001 = vmatpush1.bf16.msra.mxu1 %v8217_v31 }
 0x34a   : > { %5510 = vmatprep.subr.bf16.mxu0 %v8222_v32  ;;  %6002 = vmatprep.subr.bf16.mxu1 %v8225_v33 }
 0x34d   : > { %5511 = vmatpush1.bf16.msra.mxu0 %v8220_v25  ;;  %6003 = vmatpush1.bf16.msra.mxu1 %v8223_v34 }
 0x34e   : > { %5512 = vmatprep.subr.bf16.mxu0 %v8228_v36  ;;  %6004 = vmatprep.subr.bf16.mxu1 %v8231_v37  ;;  %v6046_v37 = vsub.s32 %v6043_v23, %v8696_v42 }
 0x351   : > { %5513 = vmatpush1.bf16.msra.mxu0 %v8226_v39  ;;  %6005 = vmatpush1.bf16.msra.mxu1 %v8229_v40 }
 0x352   : > { %5514 = vmatprep.subr.bf16.mxu0 %v8234_v21  ;;  %6006 = vmatprep.subr.bf16.mxu1 %v8237_v41 }
 0x355   : > { %5515 = vmatpush1.bf16.msra.mxu0 %v8232_v43  ;;  %6007 = vmatpush1.bf16.msra.mxu1 %v8235_v44 }
 0x356   : > { %5516 = vmatprep.subr.bf16.mxu0 %v8240_v45  ;;  %6008 = vmatprep.subr.bf16.mxu1 %v8243_v46 }
 0x359   : > { %5517 = vmatpush1.bf16.msra.mxu0 %v8238_v47  ;;  %6009 = vmatpush1.bf16.msra.mxu1 %v8241_v50 }
 0x35a   : > { %5518 = vmatprep.subr.bf16.mxu0 %v8246_v53  ;;  %6010 = vmatprep.subr.bf16.mxu1 %v8249_v54 }
 0x35d   : > { %5519 = vmatpush1.bf16.msra.mxu0 %v8244_v55  ;;  %6011 = vmatpush1.bf16.msra.mxu1 %v8247_v38 }
 0x35e   : > { %5520 = vmatprep.subr.bf16.mxu0 %v8252_v56  ;;  %6012 = vmatprep.subr.bf16.mxu1 %v8255_v57 }
 0x361   : > { %5521 = vmatpush1.bf16.msra.mxu0 %v8250_v58  ;;  %6013 = vmatpush1.bf16.msra.mxu1 %v8253_v48 }
 0x362   : > { %5522 = vmatprep.subr.bf16.mxu0 %v8258_v59  ;;  %6014 = vmatprep.subr.bf16.mxu1 %v8261_v60 }
 0x365   : > { %5523 = vmatpush1.bf16.msra.mxu0 %v8256_v13  ;;  %6015 = vmatpush1.bf16.msra.mxu1 %v8259_v63 }
 0x366   : > { %5524 = vmatprep.subr.bf16.mxu0 %v8264_v0  ;;  %6016 = vmatprep.subr.bf16.mxu1 %v8267_v35 }
 0x369   : > { %5525 = vmatpush1.bf16.msra.mxu0 %v8262_v2  ;;  %6017 = vmatpush1.bf16.msra.mxu1 %v8265_v3 }
 0x36a   : > { %5526 = vmatprep.subr.bf16.mxu0 %v8270_v51  ;;  %6018 = vmatprep.subr.bf16.mxu1 %v8273_v4 }
 0x36d   : > { %5527 = vmatpush1.bf16.msra.mxu0 %v8268_v5  ;;  %6019 = vmatpush1.bf16.msra.mxu1 %v8271_v6 }
 0x36e   : > { %5528 = vmatprep.subr.bf16.mxu0 %v8276_v61  ;;  %6020 = vmatprep.subr.bf16.mxu1 %v8279_v7 }
 0x371   : > { %5529 = vmatpush1.bf16.msra.mxu0 %v8274_v8  ;;  %6021 = vmatpush1.bf16.msra.mxu1 %v8277_v10 }
 0x374   : > { %5531 = vmatmul.mubr.bf16.vlgmr.msra.gmra.mrb[0].mxu0 %v1180_v11  ;;  %6023 = vmatmul.mubr.bf16.vlgmr.msra.gmra.mrb[0].mxu1 %v1180_v11 }
 0x447   : > { %v5532_v20 = vpop.f32.mrb[0].mxu0  ;;  %v6024_v22 = vpop.f32.mrb[0].mxu1 }
 0x448   : > { %v6964_v24 = vadd.f32 %v5532_v20, %v1016_v9  ;;  %v6966_v26 = vadd.f32 %v6024_v22, %v1024_v62  ;;  %v5534_v27 = vpop.f32.mrb[1].mxu0  ;;  %v6026_v28 = vpop.f32.mrb[1].mxu1 }
 0x449   : > { %v6965_v29 = vadd.f32 %v5534_v27, %v1020_v18  ;;  %v6967_v30 = vadd.f32 %v6026_v28, %v1028_v19  ;;  %v5536_v15 = vpop.f32.mrb[2].mxu0  ;;  %v6028_v31 = vpop.f32.mrb[2].mxu1 }
 0x44a   : > { %v6031_v32 = vmax.f32 %v6964_v24, 0.0  ;;  %v6033_v33 = vmax.f32 %v6966_v26, 0.0  ;;  %v5537_v25 = vpop.f32.mrb[3].mxu0  ;;  %v6029_v34 = vpop.f32.mrb[3].mxu1 }
 0x44b   : > { %v6032_v36 = vmax.f32 %v6965_v29, 0.0  ;;  %v6034_v39 = vmax.f32 %v6967_v30, 0.0 }
 0x44d   : > { %v6039_v40 = vcombine.low %v6031_v32, %v6032_v36  ;;  %v6040_v21 = vcombine.low %v6033_v33, %v6034_v39 }
 0x44f   : > { %v6047_v41 = vrot.slane %v6039_v40, %v6046_v37  ;;  %v6054_v43 = vrot.slane %v6040_v21, %v6046_v37 }
 0x451   : > { %v6055_v44 = vcombine.low %v6047_v41, %v6054_v43 }
 0x453   : > { %6057 = vst [vmem:[%s236_s20] sm:$0xff] %v6055_v44 }
 0x454   : > { %8383 = shalt.err (!%p8380_p1)
}
 0x455   : > { %s8384_s17 = scalar_lea.hbm %s9559_s5, 128  ;;  %s8388_s21 = scalar_lea.hbm %s9605_s3, 512 }
 0x456   : > { %p8385_p5 = scmp.ne.s32.totalorder %s9559_s5, %s8384_s17  ;;  %p8389_p6 = scmp.lt.u32.totalorder %s9559_s5, %s9605_s3 }
 0x457   : > { %p8390_p8 = scmp.lt.u32.totalorder %s8388_s21, %s8384_s17  ;;  %p8392_p11 = scmp.lt.u32.totalorder %s8384_s17, %s9559_s5 }
 0x458   : > { %p8386_p4 = pnand %p8385_p5, %p9626_p3 }
 0x459   : > { %p8391_p13 = por %p8390_p8, %p8389_p6 }
 0x45a   : > { %p8387_p2 = pneg %p8386_p4 }
 0x45b   : > { %p8393_p0 = por %p8392_p11, %p8391_p13 }
 0x45d   : > { %p8394_p10 = pnand %p8393_p0, %p8387_p2 }
 0x45f   : > { %8397 = shalt.err (!%p8394_p10)
}
 0x460   : > { %7066 = dma.vmem_to_hbm [thread:$0]  (%p9626_p3), %s9561_s23, 128, %s9559_s5, %s6059_s6  }
 0x461 PF: > { %p7086_p12 = scmp.ge.s32.totalorder %s8440_s15, 2  ;;  %s6085_s28 = sand.u32 1, %s8428_s12  }
 0x462   : > { %p9627_p9 = scmp.ne.s32.totalorder %s9616_s29, 0  ;;  %s6086_s4 = scalar_lea.sflag [#allocation4], %s6085_s28 }
 0x464   : > { %p7080_p7 = pnand %p7086_p12, %p9627_p9 }
 0x466   : > { %8423 = dma.done.wait (!%p7080_p7), %s6086_s4, 128  }
 0x467   : > { %8425 = vsyncadd (!%p7080_p7), %s6086_s4, 4294967168  ;;  %p17_p1 = scmp.ge.s32.totalorder %s8492_s16, 6   ;;  %s9628_s12 = smov %s8432_s13 }
 0x468   : > { %s9629_s13 = smov %s8436_s14  ;;  %s9630_s14 = smov %s8502_s19 }
 0x469   : > { %s9631_s15 = smov %s8492_s16  ;;  %19 = sbr.rel (!%p17_p1) target bundleno = 6 (0x6), region = 93 }
 0x470   :  { %6091 = vsyncpa [#allocation3], 1 }
 0x471   :  { %6093 = vsyncpa [#allocation3 + $0x1], 1 }
 0x472   :  { %6094 = vsyncpa [#allocation6], 1 }
 0x473   :  { %6096 = vsyncpa [#allocation6 + $0x1], 1 }
 0x474   :  { %6097 = vsyncpa [#allocation4], 1 }
 0x475   :  { %6099 = vsyncpa [#allocation4 + $0x1], 1 }

</bundles_post_ra>
